<compile_context>
chip_gen: v7x
topology: tpu7x:2x2x1
jax: 0.10.0
libtpu: 0.0.40
codegen_flags: <defaults>
</compile_context>

<pallas_src>
import functools
import math

import jax
import jax.numpy as jnp
from jax.experimental import pallas as pl
from jax.experimental.pallas import tpu as pltpu


def _fused_kernel(x_ref, cwt_ref, cb_ref, fcw_ref, fcb_ref, mask_ref, sel_ref, out_ref,
                  *, tap_offsets, sp):
    # x_ref:    (1, C, H*W) f32   one image, spatial flattened at input row stride
    # cwt_ref:  (KH*KW, Cout, C) f32  conv weight, tap-major / channel-minor
    # cb_ref:   (Cout, 1) f32     conv bias with the +100 input offset folded in
    # fcw_ref:  (Nout*Cout, Sp) bf16  fc weight, strided-flatten order, junk cols = 0
    # fcb_ref:  (Nout, 1) f32
    # mask_ref: (Nout*Cout, Cout) f32  mask[m, c] = (m % Cout == c)
    # sel_ref:  (Nout, Nout*Cout) f32  sel[n, m]  = (m // Cout == n)
    # out_ref:  (1, Nout, 1) f32

    # ---- conv as 9 accumulating tap matmuls on lane-shifted slices of the image row.
    acc = None
    for t, off in enumerate(tap_offsets):
        xs = x_ref[0, :, off:off + sp]                                   # (C, Sp) f32
        part = jnp.dot(cwt_ref[t], xs, preferred_element_type=jnp.float32)  # (Cout, Sp)
        acc = part if acc is None else acc + part

    # (+100 folded into bias) + ReLU, cast to bf16 for the FC MXU pass.
    act = jnp.maximum(acc + cb_ref[...], 0.0).astype(jnp.bfloat16)       # (Cout, Sp)

    # ---- fc: one NT contraction over Sp, then block-diagonal extraction.
    # g[m, c'] = sum_s fcw[m, s] * act[c', s],   m = n*Cout + c
    g = jax.lax.dot_general(fcw_ref[...], act,
                            dimension_numbers=(((1,), (1,)), ((), ())),
                            preferred_element_type=jnp.float32)          # (Nout*Cout, Cout)
    # keep only c' == m % Cout, then sum each group of Cout rows -> out[n]
    h = jnp.dot(sel_ref[...], g * mask_ref[...],
                preferred_element_type=jnp.float32)                      # (Nout, Cout)
    out_ref[0] = jnp.sum(h, axis=1, keepdims=True) + fcb_ref[...]        # (Nout, 1)


def prepare_params(conv_w, conv_b, fc_w, fc_b, H, W):
    """One-time parameter preprocessing (hoisted out of the forward pass)."""
    Cout, C, KH, KW = conv_w.shape
    Ho, Wo = H - KH + 1, W - KW + 1
    Sp = (Ho - 1) * W + Wo                      # strided-flatten length (row stride = W)
    Nout, F = fc_w.shape
    assert F == Cout * Ho * Wo

    # conv weight, tap-major / channel-minor: cwt[kh*KW+kw, co, c] = conv_w[co, c, kh, kw]
    cwt = jnp.transpose(conv_w, (2, 3, 0, 1)).reshape(KH * KW, Cout, C).astype(jnp.float32)

    # Fold the 100 x (+1) into the conv bias: exact, f32, matches the f32 conv matmul.
    cb = (conv_b + 100.0 * jnp.sum(conv_w, axis=(1, 2, 3))).reshape(Cout, 1).astype(jnp.float32)

    # FC weight permuted to the strided-flatten order; junk columns (j >= Wo) are exact
    # zeros, so the wrapped-window junk activations contribute exactly nothing.
    w4 = fc_w.reshape(Nout, Cout, Ho, Wo)
    w4p = jnp.pad(w4, ((0, 0), (0, 0), (0, 0), (0, W - Wo)))             # (N, Cout, Ho, W)
    fcw = w4p.reshape(Nout, Cout, Ho * W)[:, :, :Sp]                     # (N, Cout, Sp)
    fcw = fcw.reshape(Nout * Cout, Sp).astype(jnp.bfloat16)              # (N*Cout, Sp)

    # Block-diagonal extraction helpers: out[n] = sum_c g[n*Cout + c, c].
    m = jnp.arange(Nout * Cout)
    mask = (m[:, None] % Cout == jnp.arange(Cout)[None, :]).astype(jnp.float32)
    sel = (m[None, :] // Cout == jnp.arange(Nout)[:, None]).astype(jnp.float32)

    fcb = fc_b.reshape(Nout, 1).astype(jnp.float32)
    return dict(cwt=cwt, cb=cb, fcw=fcw, fcb=fcb, mask=mask, sel=sel)


def slow_model_forward(x, params):
    """x: (B, C, H, W) NCHW float32. Returns (B, Nout) float32."""
    cwt, cb = params["cwt"], params["cb"]
    fcw, fcb = params["fcw"], params["fcb"]
    mask, sel = params["mask"], params["sel"]

    B, C, H, W = x.shape
    T, Cout, _ = cwt.shape
    KH = KW = int(round(math.sqrt(T)))
    Nout = fcb.shape[0]
    NC, Sp = fcw.shape
    tap_offsets = tuple(kh * W + kw for kh in range(KH) for kw in range(KW))
    assert Sp + tap_offsets[-1] == H * W

    # Free reshape: same HBM bytes, spatial flattened at the input row stride.
    x3 = x.reshape(B, C, H * W)

    kernel = functools.partial(_fused_kernel, tap_offsets=tap_offsets, sp=Sp)
    out3 = pl.pallas_call(
        kernel,
        out_shape=jax.ShapeDtypeStruct((B, Nout, 1), jnp.float32),
        grid=(B,),
        in_specs=[
            pl.BlockSpec((1, C, H * W), lambda b: (b, 0, 0)),   # one image per step
            pl.BlockSpec((T, Cout, C), lambda b: (0, 0, 0)),    # conv weight (resident)
            pl.BlockSpec((Cout, 1), lambda b: (0, 0)),          # folded conv bias
            pl.BlockSpec((NC, Sp), lambda b: (0, 0)),           # fc weight (resident, bf16)
            pl.BlockSpec((Nout, 1), lambda b: (0, 0)),          # fc bias
            pl.BlockSpec((NC, Cout), lambda b: (0, 0)),         # diag mask
            pl.BlockSpec((Nout, NC), lambda b: (0, 0)),         # group-sum selector
        ],
        out_specs=pl.BlockSpec((1, Nout, 1), lambda b: (b, 0, 0)),
        compiler_params=pltpu.CompilerParams(dimension_semantics=("parallel",)),
    )(x3, cwt, cb, fcw, fcb, mask, sel)
    return out3.reshape(B, Nout)


def _reference(x, conv_w, conv_b, fc_w, fc_b):
    """Pure-JAX reference with PyTorch semantics (NCHW flatten)."""
    xp = x + 100.0
    y = jax.lax.conv_general_dilated(
        xp, conv_w, window_strides=(1, 1), padding="VALID",
        dimension_numbers=("NCHW", "OIHW", "NCHW"),
        precision=jax.lax.Precision.HIGHEST)
    y = jnp.maximum(y + conv_b[None, :, None, None], 0.0)
    flat = y.reshape(y.shape[0], -1)
    return jnp.dot(flat, fc_w.T, precision=jax.lax.Precision.HIGHEST) + fc_b


if __name__ == "__main__":
    key = jax.random.PRNGKey(0)
    k1, k2, k3, k4, k5 = jax.random.split(key, 5)

    # fc expects 16*62*62 features -> input spatial must be 64x64 with 3 channels.
    B, C, H, W = 2, 3, 64, 64
    x = jax.random.normal(k1, (B, C, H, W), dtype=jnp.float32)

    # Deterministic PyTorch-default-style init (uniform +- 1/sqrt(fan_in)).
    cbound = 1.0 / math.sqrt(C * 3 * 3)
    conv_w = jax.random.uniform(k2, (16, C, 3, 3), jnp.float32, minval=-cbound, maxval=cbound)
    conv_b = jax.random.uniform(k3, (16,), jnp.float32, minval=-cbound, maxval=cbound)
    fbound = 1.0 / math.sqrt(16 * 62 * 62)
    fc_w = jax.random.uniform(k4, (10, 16 * 62 * 62), jnp.float32, minval=-fbound, maxval=fbound)
    fc_b = jax.random.uniform(k5, (10,), jnp.float32, minval=-fbound, maxval=fbound)

    params = prepare_params(conv_w, conv_b, fc_w, fc_b, H, W)   # one-time setup
    fwd = jax.jit(slow_model_forward)

    y = jax.block_until_ready(fwd(x, params))
    assert y.shape == (B, 10) and y.dtype == jnp.float32

    ref = _reference(x, conv_w, conv_b, fc_w, fc_b)
    rel_err = float(jnp.max(jnp.abs(y - ref)) / (jnp.max(jnp.abs(ref)) + 1e-6))
    assert rel_err < 5e-2, f"relative error too large: {rel_err}"

    print("KERNEL_OK")
</pallas_src>

<mosaic_0001>
module attributes {stable_mosaic.version = 11 : i64} {
  func.func @_fused_kernel(%arg0: i32, %arg1: memref<1x3x4096xf32, #tpu.memory_space<vmem>>, %arg2: memref<9x16x3xf32, #tpu.memory_space<vmem>>, %arg3: memref<16x1xf32, #tpu.memory_space<vmem>>, %arg4: memref<160x3966xbf16, #tpu.memory_space<vmem>>, %arg5: memref<10x1xf32, #tpu.memory_space<vmem>>, %arg6: memref<160x16xf32, #tpu.memory_space<vmem>>, %arg7: memref<10x160xf32, #tpu.memory_space<vmem>>, %arg8: memref<1x10x1xf32, #tpu.memory_space<vmem>>) attributes {dimension_semantics = [#tpu.dimension_semantics<parallel>], iteration_bounds = array<i64: 2>, scalar_prefetch = 0 : i64, scratch_operands = 0 : i64, tpu.core_type = #tpu.core_type<tc>, window_params = [{transform_indices = @transform_0, window_bounds = array<i64: 1, 3, 4096>}, {pipeline_mode = #tpu.pipeline_mode<synchronous>, transform_indices = @transform_1, window_bounds = array<i64: 9, 16, 3>}, {pipeline_mode = #tpu.pipeline_mode<synchronous>, transform_indices = @transform_2, window_bounds = array<i64: 16, 1>}, {pipeline_mode = #tpu.pipeline_mode<synchronous>, transform_indices = @transform_3, window_bounds = array<i64: 160, 3966>}, {pipeline_mode = #tpu.pipeline_mode<synchronous>, transform_indices = @transform_4, window_bounds = array<i64: 10, 1>}, {pipeline_mode = #tpu.pipeline_mode<synchronous>, transform_indices = @transform_5, window_bounds = array<i64: 160, 16>}, {pipeline_mode = #tpu.pipeline_mode<synchronous>, transform_indices = @transform_6, window_bounds = array<i64: 10, 160>}, {transform_indices = @transform_7, window_bounds = array<i64: 1, 10, 1>}]} {
    %c0 = arith.constant 0 : index
    %c0_0 = arith.constant 0 : index
    %c0_1 = arith.constant 0 : index
    %0 = vector.load %arg1[%c0, %c0_0, %c0_1] : memref<1x3x4096xf32, #tpu.memory_space<vmem>>, vector<1x3x3966xf32>
    %1 = vector.shape_cast %0 : vector<1x3x3966xf32> to vector<3x3966xf32>
    %c0_2 = arith.constant 0 : index
    %c0_3 = arith.constant 0 : index
    %c0_4 = arith.constant 0 : index
    %2 = vector.load %arg2[%c0_2, %c0_3, %c0_4] : memref<9x16x3xf32, #tpu.memory_space<vmem>>, vector<1x16x3xf32>
    %3 = vector.shape_cast %2 : vector<1x16x3xf32> to vector<16x3xf32>
    %cst = arith.constant dense<0.000000e+00> : vector<16x3966xf32>
    %4 = tpu.matmul %3, %1, %cst {dimension_numbers = #tpu.dot_dimension_numbers<[1], [0], [0], [1], [0, 0, 1, 1], [], []>} : vector<16x3xf32>, vector<3x3966xf32>, vector<16x3966xf32> -> vector<16x3966xf32>
    %c0_5 = arith.constant 0 : index
    %c0_6 = arith.constant 0 : index
    %c1 = arith.constant 1 : index
    %5 = vector.load %arg1[%c0_5, %c0_6, %c1] : memref<1x3x4096xf32, #tpu.memory_space<vmem>>, vector<1x3x3966xf32>
    %6 = vector.shape_cast %5 : vector<1x3x3966xf32> to vector<3x3966xf32>
    %c1_7 = arith.constant 1 : index
    %c0_8 = arith.constant 0 : index
    %c0_9 = arith.constant 0 : index
    %7 = vector.load %arg2[%c1_7, %c0_8, %c0_9] : memref<9x16x3xf32, #tpu.memory_space<vmem>>, vector<1x16x3xf32>
    %8 = vector.shape_cast %7 : vector<1x16x3xf32> to vector<16x3xf32>
    %cst_10 = arith.constant dense<0.000000e+00> : vector<16x3966xf32>
    %9 = tpu.matmul %8, %6, %cst_10 {dimension_numbers = #tpu.dot_dimension_numbers<[1], [0], [0], [1], [0, 0, 1, 1], [], []>} : vector<16x3xf32>, vector<3x3966xf32>, vector<16x3966xf32> -> vector<16x3966xf32>
    %10 = arith.addf %4, %9 : vector<16x3966xf32>
    %c0_11 = arith.constant 0 : index
    %c0_12 = arith.constant 0 : index
    %c2 = arith.constant 2 : index
    %11 = vector.load %arg1[%c0_11, %c0_12, %c2] : memref<1x3x4096xf32, #tpu.memory_space<vmem>>, vector<1x3x3966xf32>
    %12 = vector.shape_cast %11 : vector<1x3x3966xf32> to vector<3x3966xf32>
    %c2_13 = arith.constant 2 : index
    %c0_14 = arith.constant 0 : index
    %c0_15 = arith.constant 0 : index
    %13 = vector.load %arg2[%c2_13, %c0_14, %c0_15] : memref<9x16x3xf32, #tpu.memory_space<vmem>>, vector<1x16x3xf32>
    %14 = vector.shape_cast %13 : vector<1x16x3xf32> to vector<16x3xf32>
    %cst_16 = arith.constant dense<0.000000e+00> : vector<16x3966xf32>
    %15 = tpu.matmul %14, %12, %cst_16 {dimension_numbers = #tpu.dot_dimension_numbers<[1], [0], [0], [1], [0, 0, 1, 1], [], []>} : vector<16x3xf32>, vector<3x3966xf32>, vector<16x3966xf32> -> vector<16x3966xf32>
    %16 = arith.addf %10, %15 : vector<16x3966xf32>
    %c0_17 = arith.constant 0 : index
    %c0_18 = arith.constant 0 : index
    %c64 = arith.constant 64 : index
    %17 = vector.load %arg1[%c0_17, %c0_18, %c64] : memref<1x3x4096xf32, #tpu.memory_space<vmem>>, vector<1x3x3966xf32>
    %18 = vector.shape_cast %17 : vector<1x3x3966xf32> to vector<3x3966xf32>
    %c3 = arith.constant 3 : index
    %c0_19 = arith.constant 0 : index
    %c0_20 = arith.constant 0 : index
    %19 = vector.load %arg2[%c3, %c0_19, %c0_20] : memref<9x16x3xf32, #tpu.memory_space<vmem>>, vector<1x16x3xf32>
    %20 = vector.shape_cast %19 : vector<1x16x3xf32> to vector<16x3xf32>
    %cst_21 = arith.constant dense<0.000000e+00> : vector<16x3966xf32>
    %21 = tpu.matmul %20, %18, %cst_21 {dimension_numbers = #tpu.dot_dimension_numbers<[1], [0], [0], [1], [0, 0, 1, 1], [], []>} : vector<16x3xf32>, vector<3x3966xf32>, vector<16x3966xf32> -> vector<16x3966xf32>
    %22 = arith.addf %16, %21 : vector<16x3966xf32>
    %c0_22 = arith.constant 0 : index
    %c0_23 = arith.constant 0 : index
    %c65 = arith.constant 65 : index
    %23 = vector.load %arg1[%c0_22, %c0_23, %c65] : memref<1x3x4096xf32, #tpu.memory_space<vmem>>, vector<1x3x3966xf32>
    %24 = vector.shape_cast %23 : vector<1x3x3966xf32> to vector<3x3966xf32>
    %c4 = arith.constant 4 : index
    %c0_24 = arith.constant 0 : index
    %c0_25 = arith.constant 0 : index
    %25 = vector.load %arg2[%c4, %c0_24, %c0_25] : memref<9x16x3xf32, #tpu.memory_space<vmem>>, vector<1x16x3xf32>
    %26 = vector.shape_cast %25 : vector<1x16x3xf32> to vector<16x3xf32>
    %cst_26 = arith.constant dense<0.000000e+00> : vector<16x3966xf32>
    %27 = tpu.matmul %26, %24, %cst_26 {dimension_numbers = #tpu.dot_dimension_numbers<[1], [0], [0], [1], [0, 0, 1, 1], [], []>} : vector<16x3xf32>, vector<3x3966xf32>, vector<16x3966xf32> -> vector<16x3966xf32>
    %28 = arith.addf %22, %27 : vector<16x3966xf32>
    %c0_27 = arith.constant 0 : index
    %c0_28 = arith.constant 0 : index
    %c66 = arith.constant 66 : index
    %29 = vector.load %arg1[%c0_27, %c0_28, %c66] : memref<1x3x4096xf32, #tpu.memory_space<vmem>>, vector<1x3x3966xf32>
    %30 = vector.shape_cast %29 : vector<1x3x3966xf32> to vector<3x3966xf32>
    %c5 = arith.constant 5 : index
    %c0_29 = arith.constant 0 : index
    %c0_30 = arith.constant 0 : index
    %31 = vector.load %arg2[%c5, %c0_29, %c0_30] : memref<9x16x3xf32, #tpu.memory_space<vmem>>, vector<1x16x3xf32>
    %32 = vector.shape_cast %31 : vector<1x16x3xf32> to vector<16x3xf32>
    %cst_31 = arith.constant dense<0.000000e+00> : vector<16x3966xf32>
    %33 = tpu.matmul %32, %30, %cst_31 {dimension_numbers = #tpu.dot_dimension_numbers<[1], [0], [0], [1], [0, 0, 1, 1], [], []>} : vector<16x3xf32>, vector<3x3966xf32>, vector<16x3966xf32> -> vector<16x3966xf32>
    %34 = arith.addf %28, %33 : vector<16x3966xf32>
    %c0_32 = arith.constant 0 : index
    %c0_33 = arith.constant 0 : index
    %c128 = arith.constant 128 : index
    %35 = vector.load %arg1[%c0_32, %c0_33, %c128] : memref<1x3x4096xf32, #tpu.memory_space<vmem>>, vector<1x3x3966xf32>
    %36 = vector.shape_cast %35 : vector<1x3x3966xf32> to vector<3x3966xf32>
    %c6 = arith.constant 6 : index
    %c0_34 = arith.constant 0 : index
    %c0_35 = arith.constant 0 : index
    %37 = vector.load %arg2[%c6, %c0_34, %c0_35] : memref<9x16x3xf32, #tpu.memory_space<vmem>>, vector<1x16x3xf32>
    %38 = vector.shape_cast %37 : vector<1x16x3xf32> to vector<16x3xf32>
    %cst_36 = arith.constant dense<0.000000e+00> : vector<16x3966xf32>
    %39 = tpu.matmul %38, %36, %cst_36 {dimension_numbers = #tpu.dot_dimension_numbers<[1], [0], [0], [1], [0, 0, 1, 1], [], []>} : vector<16x3xf32>, vector<3x3966xf32>, vector<16x3966xf32> -> vector<16x3966xf32>
    %40 = arith.addf %34, %39 : vector<16x3966xf32>
    %c0_37 = arith.constant 0 : index
    %c0_38 = arith.constant 0 : index
    %c129 = arith.constant 129 : index
    %41 = vector.load %arg1[%c0_37, %c0_38, %c129] : memref<1x3x4096xf32, #tpu.memory_space<vmem>>, vector<1x3x3966xf32>
    %42 = vector.shape_cast %41 : vector<1x3x3966xf32> to vector<3x3966xf32>
    %c7 = arith.constant 7 : index
    %c0_39 = arith.constant 0 : index
    %c0_40 = arith.constant 0 : index
    %43 = vector.load %arg2[%c7, %c0_39, %c0_40] : memref<9x16x3xf32, #tpu.memory_space<vmem>>, vector<1x16x3xf32>
    %44 = vector.shape_cast %43 : vector<1x16x3xf32> to vector<16x3xf32>
    %cst_41 = arith.constant dense<0.000000e+00> : vector<16x3966xf32>
    %45 = tpu.matmul %44, %42, %cst_41 {dimension_numbers = #tpu.dot_dimension_numbers<[1], [0], [0], [1], [0, 0, 1, 1], [], []>} : vector<16x3xf32>, vector<3x3966xf32>, vector<16x3966xf32> -> vector<16x3966xf32>
    %46 = arith.addf %40, %45 : vector<16x3966xf32>
    %c0_42 = arith.constant 0 : index
    %c0_43 = arith.constant 0 : index
    %c130 = arith.constant 130 : index
    %47 = vector.load %arg1[%c0_42, %c0_43, %c130] : memref<1x3x4096xf32, #tpu.memory_space<vmem>>, vector<1x3x3966xf32>
    %48 = vector.shape_cast %47 : vector<1x3x3966xf32> to vector<3x3966xf32>
    %c8 = arith.constant 8 : index
    %c0_44 = arith.constant 0 : index
    %c0_45 = arith.constant 0 : index
    %49 = vector.load %arg2[%c8, %c0_44, %c0_45] : memref<9x16x3xf32, #tpu.memory_space<vmem>>, vector<1x16x3xf32>
    %50 = vector.shape_cast %49 : vector<1x16x3xf32> to vector<16x3xf32>
    %cst_46 = arith.constant dense<0.000000e+00> : vector<16x3966xf32>
    %51 = tpu.matmul %50, %48, %cst_46 {dimension_numbers = #tpu.dot_dimension_numbers<[1], [0], [0], [1], [0, 0, 1, 1], [], []>} : vector<16x3xf32>, vector<3x3966xf32>, vector<16x3966xf32> -> vector<16x3966xf32>
    %52 = arith.addf %46, %51 : vector<16x3966xf32>
    %c0_47 = arith.constant 0 : index
    %c0_48 = arith.constant 0 : index
    %53 = vector.load %arg3[%c0_47, %c0_48] : memref<16x1xf32, #tpu.memory_space<vmem>>, vector<16x1xf32>
    %54 = vector.broadcast %53 : vector<16x1xf32> to vector<16x3966xf32>
    %55 = arith.addf %52, %54 : vector<16x3966xf32>
    %cst_49 = arith.constant 0.000000e+00 : f32
    %56 = vector.broadcast %cst_49 : f32 to vector<16x3966xf32>
    %57 = arith.maximumf %55, %56 : vector<16x3966xf32>
    %58 = arith.truncf %57 : vector<16x3966xf32> to vector<16x3966xbf16>
    %c0_50 = arith.constant 0 : index
    %c0_51 = arith.constant 0 : index
    %59 = vector.load %arg4[%c0_50, %c0_51] : memref<160x3966xbf16, #tpu.memory_space<vmem>>, vector<160x3966xbf16>
    %cst_52 = arith.constant dense<0.000000e+00> : vector<160x16xf32>
    %60 = tpu.matmul %59, %58, %cst_52 {dimension_numbers = #tpu.dot_dimension_numbers<[1], [1], [0], [0], [0, 0, 1, 0], [], []>} : vector<160x3966xbf16>, vector<16x3966xbf16>, vector<160x16xf32> -> vector<160x16xf32>
    %c0_53 = arith.constant 0 : index
    %c0_54 = arith.constant 0 : index
    %61 = vector.load %arg7[%c0_53, %c0_54] : memref<10x160xf32, #tpu.memory_space<vmem>>, vector<10x160xf32>
    %c0_55 = arith.constant 0 : index
    %c0_56 = arith.constant 0 : index
    %62 = vector.load %arg6[%c0_55, %c0_56] : memref<160x16xf32, #tpu.memory_space<vmem>>, vector<160x16xf32>
    %63 = arith.mulf %60, %62 : vector<160x16xf32>
    %cst_57 = arith.constant dense<0.000000e+00> : vector<10x16xf32>
    %64 = tpu.matmul %61, %63, %cst_57 {dimension_numbers = #tpu.dot_dimension_numbers<[1], [0], [0], [1], [0, 0, 1, 1], [], []>} : vector<10x160xf32>, vector<160x16xf32>, vector<10x16xf32> -> vector<10x16xf32>
    %cst_58 = arith.constant dense<0.000000e+00> : vector<10xf32>
    %65 = vector.multi_reduction <add>, %64, %cst_58 [1] : vector<10x16xf32> to vector<10xf32>
    %66 = vector.shape_cast %65 : vector<10xf32> to vector<10x1xf32>
    %c0_59 = arith.constant 0 : index
    %c0_60 = arith.constant 0 : index
    %67 = vector.load %arg5[%c0_59, %c0_60] : memref<10x1xf32, #tpu.memory_space<vmem>>, vector<10x1xf32>
    %68 = arith.addf %66, %67 : vector<10x1xf32>
    %c0_61 = arith.constant 0 : index
    %c0_62 = arith.constant 0 : index
    %c0_63 = arith.constant 0 : index
    %69 = vector.load %arg8[%c0_61, %c0_62, %c0_63] : memref<1x10x1xf32, #tpu.memory_space<vmem>>, vector<1x10x1xf32>
    %70 = vector.shape_cast %69 : vector<1x10x1xf32> to vector<10x1xf32>
    %71 = vector.shape_cast %68 : vector<10x1xf32> to vector<1x10x1xf32>
    tpu.vector_store %arg8[%c0_61, %c0_62, %c0_63], %71 {strides = array<i32>} : memref<1x10x1xf32, #tpu.memory_space<vmem>>, vector<1x10x1xf32>,
    return
  }
  func.func @transform_0(%arg0: i32) -> (i32, i32, i32) {
    %c0_i32 = arith.constant 0 : i32
    %c0_i32_0 = arith.constant 0 : i32
    %c0_i32_1 = arith.constant 0 : i32
    return %arg0, %c0_i32, %c0_i32_0 : i32, i32, i32
  }
  func.func @transform_1(%arg0: i32) -> (i32, i32, i32) {
    %c0_i32 = arith.constant 0 : i32
    %c0_i32_0 = arith.constant 0 : i32
    %c0_i32_1 = arith.constant 0 : i32
    %c0_i32_2 = arith.constant 0 : i32
    return %c0_i32, %c0_i32_0, %c0_i32_1 : i32, i32, i32
  }
  func.func @transform_2(%arg0: i32) -> (i32, i32) {
    %c0_i32 = arith.constant 0 : i32
    %c0_i32_0 = arith.constant 0 : i32
    %c0_i32_1 = arith.constant 0 : i32
    return %c0_i32, %c0_i32_0 : i32, i32
  }
  func.func @transform_3(%arg0: i32) -> (i32, i32) {
    %c0_i32 = arith.constant 0 : i32
    %c0_i32_0 = arith.constant 0 : i32
    %c0_i32_1 = arith.constant 0 : i32
    return %c0_i32, %c0_i32_0 : i32, i32
  }
  func.func @transform_4(%arg0: i32) -> (i32, i32) {
    %c0_i32 = arith.constant 0 : i32
    %c0_i32_0 = arith.constant 0 : i32
    %c0_i32_1 = arith.constant 0 : i32
    return %c0_i32, %c0_i32_0 : i32, i32
  }
  func.func @transform_5(%arg0: i32) -> (i32, i32) {
    %c0_i32 = arith.constant 0 : i32
    %c0_i32_0 = arith.constant 0 : i32
    %c0_i32_1 = arith.constant 0 : i32
    return %c0_i32, %c0_i32_0 : i32, i32
  }
  func.func @transform_6(%arg0: i32) -> (i32, i32) {
    %c0_i32 = arith.constant 0 : i32
    %c0_i32_0 = arith.constant 0 : i32
    %c0_i32_1 = arith.constant 0 : i32
    return %c0_i32, %c0_i32_0 : i32, i32
  }
  func.func @transform_7(%arg0: i32) -> (i32, i32, i32) {
    %c0_i32 = arith.constant 0 : i32
    %c0_i32_0 = arith.constant 0 : i32
    %c0_i32_1 = arith.constant 0 : i32
    return %arg0, %c0_i32, %c0_i32_0 : i32, i32, i32
  }
}

</mosaic_0001>

<bundles_post_ra>
// kernel: slow_model_forward.1
= control target key start
LH: loop header
LB: loop body
LE: loop exit
PB: predicated region body
PF: predicated region fallthrough
CT: control target
= control target key end

     0   :  { %12 = vsyncpa [#allocation3], 0  ;;  %s23616_s0 = inlined_call_operand.vmem [shape: f32[2,3,4096], index: 0, kind: input, shape index: {}]   ;;  %s23617_s1 = inlined_call_operand.vmem [shape: f32[9,16,3], index: 1, kind: input, shape index: {}]   ;;  %s23618_s2 = inlined_call_operand.vmem [shape: f32[16,1], index: 2, kind: input, shape index: {}]   ;;  %s23619_s3 = inlined_call_operand.hbm [shape: bf16[160,3966], index: 3, kind: input, shape index: {}]   ;;  %s23620_s4 = inlined_call_operand.vmem [shape: f32[10,1], index: 4, kind: input, shape index: {}]   ;;  %s23621_s5 = inlined_call_operand.vmem [shape: f32[160,16], index: 5, kind: input, shape index: {}]   ;;  %s23622_s6 = inlined_call_operand.hbm [shape: f32[10,160], index: 6, kind: input, shape index: {}]   ;;  %s23623_s7 = inlined_call_operand.vmem [shape: f32[2,10,1], index: 7, kind: output, shape index: {}]  }
   0x1   :  { %13 = vsyncpa [#allocation5], 0  ;;  %s20450_s24 = smov 0  }
   0x2 LB: > { %s20396_s25 = smov [#allocation2]   ;;  %s20456_s27 = sadd.s32 4294967295, %s20394_s24   ;;  %s20394_s24 = sphi %s20450_s24, %s19_s24  }
   0x3   : > { %s220_s26 = sshll.u32 %s20396_s25, 4  ;;  %p17590_p0 = scmp.ge.s32.totalorder %s20394_s24, 1  ;;  %s221_s26 = int_to_ptr.vmem [resolvable:$true] %s220_s26 }
   0x4   : > { %p202_p1 = scmp.lt.s32.totalorder %s20394_s24, 3  ;;  %p23624_p3 = scmp.eq.s32.totalorder %s20456_s27, 0 }
   0x5   : > { %s20397_s29 = smov [#allocation4]   ;;  %s20324_s11 = scalar_lea.hbm %s23619_s3, 39680 }
   0x6   : > { %p20460_p2 = pnand %p17590_p0, %p202_p1  ;;  %s239_s30 = sshll.u32 %s20397_s29, 4  ;;  %s20473_s30 = int_to_ptr.vmem [resolvable:$true] %s239_s30 }
   0x7   : > { %p20325_p6 = scmp.ne.s32.totalorder %s23619_s3, %s20324_s11  ;;  %p20331_p10 = scmp.lt.u32.totalorder %s20324_s11, %s23619_s3 }
   0x8   : > { %s23626_s28 = scalar_select %p20460_p2, 1, 0 }
   0x9   : > { %p19690_p4 = pneg %p20460_p2 }
   0xb   : > { %p20469_p5 = pnand %p23624_p3, %p19690_p4 }
   0xd   : > { %p20326_p7 = pneg %p20469_p5 }
   0xf   : > { %p20327_p8 = pnand %p20326_p7, %p20325_p6 }
  0x11   : > { %p20328_p9 = pneg %p20327_p8 }
  0x13   : > { %p20333_p11 = pnand %p20331_p10, %p20328_p9 }
  0x15   : > { %20336 = shalt.err (!%p20333_p11)
}
  0x16   : > { %s20337_s16 = scalar_lea.vmem %s221_s26, 39680  ;;  %p20345_p1 = scmp.lt.s32.totalorder %s221_s26, %s221_s26 }
  0x17   : > { %p20338_p12 = scmp.ne.s32.totalorder %s221_s26, %s20337_s16  ;;  %p20346_p4 = scmp.lt.s32.totalorder %s20337_s16, %s20337_s16 }
  0x19   : > { %p20340_p13 = pnand %p20338_p12, %p20326_p7  ;;  %p20347_p3 = por %p20346_p4, %p20345_p1 }
  0x1b   : > { %p20341_p0 = pneg %p20340_p13 }
  0x1d   : > { %p20348_p2 = pnand %p20347_p3, %p20341_p0 }
  0x1f   : > { %20351 = shalt.err (!%p20348_p2)
}
  0x20   : > { %s20398_s17 = smov 1984   ;;  %s20399_s18 = smov 124  }
  0x21   : > { %19693 = dma.hbm_to_vmem [thread:$0]  (!%p20469_p5), %s23619_s3, 39680, %s221_s26, [#allocation3], %s20398_s17, %s20398_s17, %s20399_s18  }
  0x22   : > { %s20352_s23 = scalar_lea.hbm %s23622_s6, 512 }
  0x23   : > { %p20353_p6 = scmp.ne.s32.totalorder %s23622_s6, %s20352_s23  ;;  %p20359_p8 = scmp.lt.u32.totalorder %s20352_s23, %s23622_s6 }
  0x25   : > { %p20355_p2 = pnand %p20353_p6, %p20326_p7 }
  0x27   : > { %p20356_p3 = pneg %p20355_p2 }
  0x29   : > { %p20361_p9 = pnand %p20359_p8, %p20356_p3 }
  0x2b   : > { %20364 = shalt.err (!%p20361_p9)
}
  0x2c   : > { %s20365_s26 = scalar_lea.vmem %s20473_s30, 512  ;;  %p20373_p13 = scmp.lt.s32.totalorder %s20473_s30, %s20473_s30 }
  0x2d   : > { %p20366_p10 = scmp.ne.s32.totalorder %s20473_s30, %s20365_s26  ;;  %p20374_p0 = scmp.lt.s32.totalorder %s20365_s26, %s20365_s26 }
  0x2f   : > { %p20368_p11 = pnand %p20366_p10, %p20326_p7  ;;  %p20375_p1 = por %p20374_p0, %p20373_p13 }
  0x31   : > { %p20369_p12 = pneg %p20368_p11 }
  0x33   : > { %p20376_p4 = pnand %p20375_p1, %p20369_p12 }
  0x35   : > { %20379 = shalt.err (!%p20376_p4)
}
  0x36   : > { %s20400_s11 = smov 256   ;;  %s20401_s12 = smov 16  }
  0x37   : > { %19696 = dma.hbm_to_vmem [thread:$0]  (!%p20469_p5), %s23622_s6, 512, %s20473_s30, [#allocation5], %s20400_s11, %s20400_s11, %s20401_s12  }
  0x38   : > { %p23628_p6 = scmp.ne.s32.totalorder %s23626_s28, 0 }
  0x39   : > { %p23629_p7 = scmp.eq.s32.totalorder (!%p23628_p6), %s20456_s27, 0 }
  0x3a   : > { %263 = sbr.rel (%p23628_p6) target bundleno = 2158 (0x86e), region = 48 }
  0x41   : > { %20385 = dma.done.wait (%p23629_p7), [#allocation3], 39680   ;;  %p23630_p2 = pmov %p23629_p7 }
  0x43   : > { %20387 = vsyncadd (%p23630_p2), [#allocation3], 4294927616  ;;  %p23631_p3 = pmov %p23630_p2 }
  0x44   : > { %p23632_p8 = pmov %p23630_p2 }
  0x45   : > { %20389 = dma.done.wait (%p23631_p3), [#allocation5], 512  }
  0x46   : > { %20391 = vsyncadd (%p23632_p8), [#allocation5], 4294966784  ;;  %p299_p9 = scmp.lt.s32.totalorder %s20456_s27, 1  ;;  %v20402_v0 = vmov 0.0   ;;  %s20403_s16 = smov 127   ;;  %vm424_vm0 = vcmask 1039360  }
  0x47   : > { %666 = vmatprep.mubr.f32.mxu1 %v20402_v0  ;;  %589 = vmatprep.mubr.f32.mxu0 %v20402_v0  ;;  %s20404_s17 = smov 126   ;;  %s20405_s18 = smov 64   ;;  %vm462_vm1 = vcmask 1042432   ;;  %vm455_vm2 = vcmask 23552   ;;  %vm3165_vm3 = vcmask 1031168   ;;  %vm4671_vm4 = vcmask 523264  }
  0x48   : > { %s23634_s27 = smov (!%p299_p9, %s20456_s27), 1  ;;  %s20406_s23 = smov 63   ;;  %vm6178_vm5 = vcmask 515072   ;;  %vm7685_vm6 = vcmask 506880   ;;  %vm17413_vm7 = vcmask 261120   ;;  %vm17495_vm8 = vcmask 130048  }
  0x49   : > { %s18508_s28 = sshll.u32 %s23634_s27, 7  ;;  %s20407_s26 = smov 62   ;;  %vm17499_vm9 = vcmask 123904   ;;  %vm17507_vm10 = vcmask 7168   ;;  %vm17509_vm11 = vcmask 1024  }
  0x4a   : > { %s20542_s15 = scalar_lea.vmem %s23616_s0, %s18508_s28  ;;  %s18509_s20 = sshll.u32 %s23634_s27, 4 }
  0x4b   : > { %v311_v1 = vld [vmem:[%s20542_s15 + $0x8] sm:$0x77]  ;;  %v313_v2 = vld [vmem:[%s20542_s15 + $0x18] sm:$0x77]  ;;  %v312_v5 = vld [vmem:[%s20542_s15 + $0x10] sm:$0x77]  ;;  %s308_s29 = scalar_lea.vmem %s23623_s7, %s18509_s20 }
  0x4c   : > { %366 = vrot.lane.b32.xlu1 %v311_v1, %s20403_s16  ;;  %v20547_v3 = vcombine.high %v311_v1, %v311_v1  ;;  %v20549_v4 = vcombine.high %v313_v2, %v313_v2  ;;  %v314_v6 = vld [vmem:[%s20542_s15 + $0x20] sm:$0x77]  ;;  %v315_v7 = vld [vmem:[%s20542_s15 + $0x28] sm:$0x77]  ;;  %v316_v8 = vld [vmem:[%s20542_s15 + $0x30] sm:$0x77]  ;;  %v20587_v18 = vcombine.high %v312_v5, %v312_v5 }
  0x4d   : > { %v317_v9 = vld [vmem:[%s20542_s15 + $0x38] sm:$0x77]  ;;  %v20563_v10 = vcombine.high %v315_v7, %v315_v7  ;;  %v318_v12 = vld [vmem:[%s20542_s15 + $0x40] sm:$0x77]  ;;  %v319_v15 = vld [vmem:[%s20542_s15 + $0x48] sm:$0x77]  ;;  %v20599_v22 = vcombine.high %v314_v6, %v314_v6  ;;  %v20611_v26 = vcombine.high %v316_v8, %v316_v8 }
  0x4e   : > { %368 = vrot.lane.b32.xlu0 %v20547_v3, %s20403_s16  ;;  %v20566_v11 = vcombine.high %v317_v9, %v317_v9  ;;  %v310_v13 = vld [vmem:[%s20542_s15] sm:$0x77]  ;;  %v320_v16 = vld [vmem:[%s20542_s15 + $0x50] sm:$0x77]  ;;  %v20584_v17 = vcombine.high %v319_v15, %v319_v15  ;;  %v321_v19 = vld [vmem:[%s20542_s15 + $0x58] sm:$0x77]  ;;  %v20617_v27 = vcombine.high %v318_v12, %v318_v12 }
  0x4f   : > { %v20577_v14 = vcombine.high %v310_v13, %v310_v13  ;;  %v322_v20 = vld [vmem:[%s20542_s15 + $0x60] sm:$0x77]  ;;  %v20596_v21 = vcombine.high %v321_v19, %v321_v19  ;;  %v324_v23 = vld [vmem:[%s20542_s15 + $0x70] sm:$0x77]  ;;  %v323_v24 = vld [vmem:[%s20542_s15 + $0x68] sm:$0x77]  ;;  %v20627_v31 = vcombine.high %v320_v16, %v320_v16 }
  0x50   : > { %376 = vrot.lane.b32.xlu1 %v20549_v4, %s20403_s16  ;;  %v20608_v25 = vcombine.high %v323_v24, %v323_v24  ;;  %v325_v28 = vld [vmem:[%s20542_s15 + $0x78] sm:$0x7]  ;;  %v3054_v29 = vld [vmem:[%s20542_s15 + $0x8] sm:$0x77]  ;;  %v20624_v30 = vcombine.high %v322_v20, %v322_v20  ;;  %v20633_v33 = vcombine.high %v324_v23, %v324_v23  ;;  %v3055_v34 = vld [vmem:[%s20542_s15 + $0x10] sm:$0x77] }
  0x51   : > { %v3089_v32 = vcombine.high %v3054_v29, %v3054_v29  ;;  %v3057_v35 = vld [vmem:[%s20542_s15 + $0x20] sm:$0x77]  ;;  %v3056_v36 = vld [vmem:[%s20542_s15 + $0x18] sm:$0x77]  ;;  %v3058_v37 = vld [vmem:[%s20542_s15 + $0x28] sm:$0x77]  ;;  %v3090_v52 = vcombine.high %v3055_v34, %v3055_v34 }
  0x52   : > { %370 = vrot.lane.b32.xlu0 %v312_v5, %s20403_s16  ;;  %v3091_v38 = vcombine.high %v3056_v36, %v3056_v36  ;;  %v3093_v39 = vcombine.high %v3058_v37, %v3058_v37  ;;  %v3059_v40 = vld [vmem:[%s20542_s15 + $0x30] sm:$0x77]  ;;  %v3060_v41 = vld [vmem:[%s20542_s15 + $0x38] sm:$0x77]  ;;  %v20651_v42 = vld [vmem:[%s20542_s15 + $0x40] sm:$0x77]  ;;  %v3092_v57 = vcombine.high %v3057_v35, %v3057_v35 }
  0x53   : > { %v3062_v43 = vld [vmem:[%s20542_s15 + $0x48] sm:$0x77]  ;;  %v3095_v44 = vcombine.high %v3060_v41, %v3060_v41  ;;  %v20661_v46 = vld [vmem:[%s20542_s15 + $0x50] sm:$0x77]  ;;  %v3053_v47 = vld [vmem:[%s20542_s15] sm:$0x77]  ;;  %v3094_v60 = vcombine.high %v3059_v40, %v3059_v40 }
  0x54   : > { %374 = vrot.lane.b32.xlu1 %v313_v2, %s20403_s16  ;;  %v3097_v45 = vcombine.high %v3062_v43, %v3062_v43  ;;  %v3064_v48 = vld [vmem:[%s20542_s15 + $0x58] sm:$0x77]  ;;  %v3088_v49 = vcombine.high %v3053_v47, %v3053_v47  ;;  %v20670_v50 = vld [vmem:[%s20542_s15 + $0x60] sm:$0x77]  ;;  %v20678_v53 = vld [vmem:[%s20542_s15 + $0x70] sm:$0x77] }
  0x55   : > { %v3099_v51 = vcombine.high %v3064_v48, %v3064_v48  ;;  %v3066_v54 = vld [vmem:[%s20542_s15 + $0x68] sm:$0x77]  ;;  %v3068_v59 = vld [vmem:[%s20542_s15 + $0x78] sm:$0x7]  ;;  %v20693_v62 = vld [vmem:[%s20542_s15 + $0x10] sm:$0x77] }
  0x56   : > { %378 = vrot.lane.b32.xlu0 %v314_v6, %s20403_s16  ;;  %v3101_v55 = vcombine.high %v3066_v54, %v3066_v54  ;;  %v4557_v56 = vld [vmem:[%s20542_s15 + $0x8] sm:$0x77]  ;;  %v4559_v61 = vld [vmem:[%s20542_s15 + $0x18] sm:$0x77]  ;;  %v20704_v6 = vld [vmem:[%s23617_s1 + $0x10] sm:$0xff] }
  0x57   : > { %v4592_v58 = vcombine.high %v4557_v56, %v4557_v56  ;;  %v4594_v2 = vcombine.high %v4559_v61, %v4559_v61 }
  0x58   : > { %386 = vrot.lane.b32.xlu1 %v316_v8, %s20403_s16 }
  0x5a   : > { %384 = vrot.lane.b32.xlu0 %v20563_v10, %s20403_s16 }
  0x5c   : > { %392 = vrot.lane.b32.xlu1 %v20566_v11, %s20403_s16 }
  0x5e   : > { %382 = vrot.lane.b32.xlu0 %v315_v7, %s20403_s16  ;;  %v3096_v7 = vcombine.high %v20651_v42, %v20651_v42 }
  0x60   : > { %390 = vrot.lane.b32.xlu1 %v317_v9, %s20403_s16 }
  0x62   : > { %394 = vrot.lane.b32.xlu0 %v318_v12, %s20403_s16  ;;  %v4561_v12 = vld [vmem:[%s20542_s15 + $0x28] sm:$0x77] }
  0x64   : > { %362 = vrot.lane.b32.xlu1 %v310_v13, %s20403_s16 }
  0x66   : > { %364 = vrot.lane.b32.xlu0 %v20577_v14, %s20403_s16 }
  0x68   : > { %402 = vrot.lane.b32.xlu1 %v320_v16, %s20403_s16  ;;  %v20721_v16 = vld [vmem:[%s20542_s15 + $0x20] sm:$0x77] }
  0x6a   : > { %400 = vrot.lane.b32.xlu0 %v20584_v17, %s20403_s16 }
  0x6c   : > { %372 = vrot.lane.b32.xlu1 %v20587_v18, %s20403_s16 }
  0x6e   : > { %398 = vrot.lane.b32.xlu0 %v319_v15, %s20403_s16 }
  0x70   : > { %410 = vrot.lane.b32.xlu1 %v322_v20, %s20403_s16 }
  0x72   : > { %408 = vrot.lane.b32.xlu0 %v20596_v21, %s20403_s16 }
  0x74   : > { %380 = vrot.lane.b32.xlu1 %v20599_v22, %s20403_s16 }
  0x76   : > { %406 = vrot.lane.b32.xlu0 %v321_v19, %s20403_s16  ;;  %v20727_v19 = vld [vmem:[%s23617_s1 + $0x18] sm:$0xff] }
  0x78   : > { %418 = vrot.lane.b32.xlu1 %v324_v23, %s20403_s16 }
  0x7a   : > { %416 = vrot.lane.b32.xlu0 %v20608_v25, %s20403_s16 }
  0x7c   : > { %388 = vrot.lane.b32.xlu1 %v20611_v26, %s20403_s16 }
  0x7e   : > { %414 = vrot.lane.b32.xlu0 %v323_v24, %s20403_s16  ;;  %v4596_v24 = vcombine.high %v4561_v12, %v4561_v12 }
  0x80   : > { %396 = vrot.lane.b32.xlu1 %v20617_v27, %s20403_s16 }
  0x82   : > { %422 = vrot.lane.b32.xlu0 %v325_v28, %s20403_s16 }
  0x84   : > { %412 = vrot.lane.b32.xlu1 %v20624_v30, %s20403_s16 }
  0x86   : > { %404 = vrot.lane.b32.xlu0 %v20627_v31, %s20403_s16 }
  0x88   : > { %3109 = vrot.lane.b32.xlu1 %v3089_v32, %s20404_s17  ;;  %v4563_v32 = vld [vmem:[%s20542_s15 + $0x38] sm:$0x77] }
  0x8a   : > { %420 = vrot.lane.b32.xlu0 %v20633_v33, %s20403_s16 }
  0x8c   : > { %3107 = vrot.lane.b32.xlu1 %v3054_v29, %s20404_s17 }
  0x8e   : > { %3111 = vrot.lane.b32.xlu0 %v3055_v34, %s20404_s17  ;;  %v3098_v34 = vcombine.high %v20661_v46, %v20661_v46 }
  0x90   : > { %3119 = vrot.lane.b32.xlu1 %v3057_v35, %s20404_s17 }
  0x92   : > { %3117 = vrot.lane.b32.xlu0 %v3091_v38, %s20404_s17  ;;  %v20757_v38 = vld [vmem:[%s20542_s15 + $0x30] sm:$0x77] }
  0x94   : > { %3125 = vrot.lane.b32.xlu1 %v3093_v39, %s20404_s17 }
  0x96   : > { %3115 = vrot.lane.b32.xlu0 %v3056_v36, %s20404_s17 }
  0x98   : > { %3123 = vrot.lane.b32.xlu1 %v3058_v37, %s20404_s17 }
  0x9a   : > { %3127 = vrot.lane.b32.xlu0 %v3059_v40, %s20404_s17  ;;  %v4598_v40 = vcombine.high %v4563_v32, %v4563_v32 }
  0x9c   : > { %3135 = vrot.lane.b32.xlu1 %v20651_v42, %s20404_s17 }
  0x9e   : > { %3133 = vrot.lane.b32.xlu0 %v3095_v44, %s20404_s17 }
  0xa0   : > { %3141 = vrot.lane.b32.xlu1 %v3097_v45, %s20404_s17 }
  0xa2   : > { %3131 = vrot.lane.b32.xlu0 %v3060_v41, %s20404_s17 }
  0xa4   : > { %3139 = vrot.lane.b32.xlu1 %v3062_v43, %s20404_s17  ;;  %v3100_v43 = vcombine.high %v20670_v50, %v20670_v50 }
  0xa6   : > { %3143 = vrot.lane.b32.xlu0 %v20661_v46, %s20404_s17  ;;  %v4565_v46 = vld [vmem:[%s20542_s15 + $0x48] sm:$0x77] }
  0xa8   : > { %3103 = vrot.lane.b32.xlu1 %v3053_v47, %s20404_s17 }
  0xaa   : > { %3105 = vrot.lane.b32.xlu0 %v3088_v49, %s20404_s17  ;;  %v20788_v49 = vld [vmem:[%s20542_s15 + $0x40] sm:$0x77] }
  0xac   : > { %3151 = vrot.lane.b32.xlu1 %v20670_v50, %s20404_s17 }
  0xae   : > { %3149 = vrot.lane.b32.xlu0 %v3099_v51, %s20404_s17  ;;  %v4600_v51 = vcombine.high %v4565_v46, %v4565_v46 }
  0xb0   : > { %3113 = vrot.lane.b32.xlu1 %v3090_v52, %s20404_s17 }
  0xb2   : > { %3147 = vrot.lane.b32.xlu0 %v3064_v48, %s20404_s17 }
  0xb4   : > { %3159 = vrot.lane.b32.xlu1 %v20678_v53, %s20404_s17 }
  0xb6   : > { %3157 = vrot.lane.b32.xlu0 %v3101_v55, %s20404_s17 }
  0xb8   : > { %3121 = vrot.lane.b32.xlu1 %v3092_v57, %s20404_s17 }
  0xba   : > { %3155 = vrot.lane.b32.xlu0 %v3066_v54, %s20404_s17 }
  0xbc   : > { %4613 = vrot.lane.b32.xlu1 %v4592_v58, %s20405_s18 }
  0xbe   : > { %v20695_v63 = vpop.permute.xlu1 %366  ;;  %3163 = vrot.lane.b32.xlu0 %v3068_v59, %s20404_s17  ;;  %v4567_v59 = vld [vmem:[%s20542_s15 + $0x58] sm:$0x77] }
  0xc0   : > { %v369_v1 = vpop.permute.xlu0 %368  ;;  %3129 = vrot.lane.b32.xlu1 %v3094_v60, %s20404_s17 }
  0xc1   : > { %v427_v15 = vsel %vm424_vm0, %v20695_v63, %v369_v1 }
  0xc2   : > { %v377_v5 = vpop.permute.xlu1 %376  ;;  %4615 = vrot.lane.b32.xlu0 %v20693_v62, %s20405_s18 }
  0xc4   : > { %v20708_v8 = vpop.permute.xlu0 %370  ;;  %4621 = vrot.lane.b32.xlu1 %v4594_v2, %s20405_s18  ;;  %v4602_v2 = vcombine.high %v4567_v59, %v4567_v59 }
  0xc5   : > { %v428_v9 = vsel %vm424_vm0, %v369_v1, %v20708_v8 }
  0xc6   : > { %v20714_v13 = vpop.permute.xlu1 %374  ;;  %17607 = vmatprep.subr.msk.mxu1 %vm462_vm1, %v428_v9  ;;  %4611 = vrot.lane.b32.xlu0 %v4557_v56, %s20405_s18  ;;  %v3102_v56 = vcombine.high %v20678_v53, %v20678_v53 }
  0xc7   : > { %17608 = vmatpush1.msk.msra.mxu1 %vm462_vm1, %v427_v15  ;;  %v431_v20 = vsel %vm424_vm0, %v20714_v13, %v377_v5 }
  0xc8   : > { %17609 = vmatmul.mubr.msk.f32.vlgmr.msra.gmra.mrb[0].mxu1 %vm455_vm2, %v20704_v6  ;;  %v20733_v23 = vpop.permute.xlu0 %378  ;;  %3137 = vrot.lane.b32.xlu1 %v3096_v7, %s20404_s17 }
  0xc9   : > { %v432_v28 = vsel %vm424_vm0, %v377_v5, %v20733_v23  ;;  %672 = vmatprep.mubr.f32.mxu1 %v20402_v0  ;;  %v4556_v5 = vld [vmem:[%s20542_s15] sm:$0x77] }
  0xca   : > { %v20739_v29 = vpop.permute.xlu1 %386  ;;  %17615 = vmatprep.subr.msk.mxu1 %vm462_vm1, %v432_v28  ;;  %4623 = vrot.lane.b32.xlu0 %v20721_v16, %s20405_s18  ;;  %v20860_v28 = vld [vmem:[%s20542_s15 + $0x60] sm:$0x77] }
  0xcb   : > { %17616 = vmatpush1.msk.msra.mxu1 %vm462_vm1, %v431_v20 }
  0xcc   : > { %17610 = vmatmul.mubr.msk.f32.gmra.mrb[2].mxu1 %vm455_vm2, %v20727_v19  ;;  %v385_v35 = vpop.permute.xlu0 %384  ;;  %4629 = vrot.lane.b32.xlu1 %v4596_v24, %s20405_s18 }
  0xcd   : > { %v436_v36 = vsel %vm424_vm0, %v385_v35, %v20739_v29  ;;  %820 = vmatprep.mubr.f32.mxu1 %v20402_v0 }
  0xce   : > { %v393_v37 = vpop.permute.xlu1 %392  ;;  %17623 = vmatprep.subr.msk.mxu1 %vm462_vm1, %v436_v36  ;;  %4619 = vrot.lane.b32.xlu0 %v4559_v61, %s20405_s18 }
  0xd0   : > { %17617 = vmatmul.mubr.msk.f32.vlgmr.msra.gmra.mrb[4].mxu1 %vm455_vm2, %v20704_v6  ;;  %v20761_v39 = vpop.permute.xlu0 %382  ;;  %3145 = vrot.lane.b32.xlu1 %v3098_v34, %s20404_s17 }
  0xd1   : > { %v435_v41 = vsel %vm424_vm0, %v20761_v39, %v385_v35  ;;  %826 = vmatprep.mubr.f32.mxu1 %v20402_v0  ;;  %v4569_v35 = vld [vmem:[%s20542_s15 + $0x68] sm:$0x77] }
  0xd2   : > { %v20767_v42 = vpop.permute.xlu1 %390  ;;  %17624 = vmatpush1.msk.msra.mxu1 %vm462_vm1, %v435_v41  ;;  %4631 = vrot.lane.b32.xlu0 %v20757_v38, %s20405_s18  ;;  %v4604_v41 = vcombine.high %v4569_v35, %v4569_v35 }
  0xd3   : > { %v439_v47 = vsel %vm424_vm0, %v20767_v42, %v393_v37 }
  0xd4   : > { %17618 = vmatmul.mubr.msk.f32.gmra.mrb[6].mxu1 %vm455_vm2, %v20727_v19  ;;  %v20776_v44 = vpop.permute.xlu0 %394  ;;  %4637 = vrot.lane.b32.xlu1 %v4598_v40, %s20405_s18 }
  0xd5   : > { %v440_v45 = vsel %vm424_vm0, %v393_v37, %v20776_v44  ;;  %974 = vmatprep.mubr.f32.mxu1 %v20402_v0 }
  0xd6   : > { %17631 = vmatprep.subr.msk.mxu1 %vm462_vm1, %v440_v45  ;;  %v363_v48 = vpop.permute.xlu1 %362  ;;  %4627 = vrot.lane.b32.xlu0 %v4561_v12, %s20405_s18  ;;  %v4591_v12 = vcombine.high %v4556_v5, %v4556_v5 }
  0xd8   : > { %17625 = vmatmul.mubr.msk.f32.vlgmr.msra.gmra.mrb[8].mxu1 %vm455_vm2, %v20704_v6  ;;  %3153 = vrot.lane.b32.xlu1 %v3100_v43, %s20404_s17  ;;  %v365_v50 = vpop.permute.xlu0 %364 }
  0xd9   : > { %17632 = vmatpush1.msk.msra.mxu1 %vm462_vm1, %v439_v47  ;;  %v426_v52 = vsel %vm424_vm0, %v365_v50, %v20695_v63  ;;  %v425_v54 = vsel %vm424_vm0, %v363_v48, %v365_v50  ;;  %980 = vmatprep.mubr.f32.mxu1 %v20402_v0  ;;  %v20823_v63 = vld [vmem:[%s20542_s15 + $0x50] sm:$0x77]  ;;  %v4593_v47 = vcombine.high %v20693_v62, %v20693_v62 }
  0xda   : > { %v20798_v55 = vpop.permute.xlu1 %402  ;;  %4639 = vrot.lane.b32.xlu0 %v20788_v49, %s20405_s18  ;;  %17603 = vmatprep.subr.msk.mxu0 %vm462_vm1, %v426_v52 }
  0xdb   : > { %17604 = vmatpush1.msk.msra.mxu0 %vm462_vm1, %v425_v54 }
  0xdc   : > { %17626 = vmatmul.mubr.msk.f32.gmra.mrb[10].mxu1 %vm455_vm2, %v20727_v19  ;;  %4645 = vrot.lane.b32.xlu1 %v4600_v51, %s20405_s18  ;;  %v401_v57 = vpop.permute.xlu0 %400 }
  0xdd   : > { %17605 = vmatmul.mubr.msk.f32.vlgmr.msra.gmra.mrb[0].mxu0 %vm455_vm2, %v20704_v6  ;;  %v444_v58 = vsel %vm424_vm0, %v401_v57, %v20798_v55  ;;  %1128 = vmatprep.mubr.f32.mxu1 %v20402_v0 }
  0xde   : > { %v373_v60 = vpop.permute.xlu1 %372  ;;  %4635 = vrot.lane.b32.xlu0 %v4563_v32, %s20405_s18  ;;  %17639 = vmatprep.subr.msk.mxu1 %vm462_vm1, %v444_v58 }
  0xdf   : > { %v429_v53 = vsel %vm424_vm0, %v20708_v8, %v373_v60  ;;  %595 = vmatprep.mubr.f32.mxu0 %v20402_v0  ;;  %v430_v61 = vsel %vm424_vm0, %v373_v60, %v20714_v13  ;;  %v4595_v60 = vcombine.high %v20721_v16, %v20721_v16 }
  0xe0   : > { %17633 = vmatmul.mubr.msk.f32.vlgmr.msra.gmra.mrb[12].mxu1 %vm455_vm2, %v20704_v6  ;;  %3161 = vrot.lane.b32.xlu1 %v3102_v56, %s20404_s17  ;;  %v20828_v1 = vpop.permute.xlu0 %398 }
  0xe1   : > { %17606 = vmatmul.mubr.msk.f32.gmra.mrb[2].mxu0 %vm455_vm2, %v20727_v19  ;;  %17611 = vmatprep.subr.msk.mxu0 %vm462_vm1, %v430_v61  ;;  %v443_v7 = vsel %vm424_vm0, %v20828_v1, %v401_v57 }
  0xe2   : > { %17612 = vmatpush1.msk.msra.mxu0 %vm462_vm1, %v429_v53  ;;  %v20837_v8 = vpop.permute.xlu1 %410  ;;  %4647 = vrot.lane.b32.xlu0 %v20823_v63, %s20405_s18 }
  0xe3   : > { %743 = vmatprep.mubr.f32.mxu0 %v20402_v0  ;;  %1134 = vmatprep.mubr.f32.mxu1 %v20402_v0 }
  0xe4   : > { %17634 = vmatmul.mubr.msk.f32.gmra.mrb[14].mxu1 %vm455_vm2, %v20727_v19  ;;  %4653 = vrot.lane.b32.xlu1 %v4602_v2, %s20405_s18  ;;  %v409_v9 = vpop.permute.xlu0 %408  ;;  %v6066_v2 = vld [vmem:[%s20542_s15 + $0x18] sm:$0x77] }
  0xe5   : > { %17613 = vmatmul.mubr.msk.f32.vlgmr.msra.gmra.mrb[4].mxu0 %vm455_vm2, %v20704_v6  ;;  %17640 = vmatpush1.msk.msra.mxu1 %vm462_vm1, %v443_v7  ;;  %v448_v13 = vsel %vm424_vm0, %v409_v9, %v20837_v8  ;;  %v6101_v7 = vcombine.high %v6066_v2, %v6066_v2 }
  0xe6   : > { %v381_v15 = vpop.permute.xlu1 %380  ;;  %4643 = vrot.lane.b32.xlu0 %v4565_v46, %s20405_s18  ;;  %17647 = vmatprep.subr.msk.mxu1 %vm462_vm1, %v448_v13  ;;  %v20982_v13 = vld [vmem:[%s23617_s1] sm:$0xff] }
  0xe7   : > { %v433_v20 = vsel %vm424_vm0, %v20733_v23, %v381_v15  ;;  %749 = vmatprep.mubr.f32.mxu0 %v20402_v0  ;;  %1282 = vmatprep.mubr.f32.mxu1 %v20402_v0  ;;  %v434_v24 = vsel %vm424_vm0, %v381_v15, %v20761_v39  ;;  %v20886_v39 = vld [vmem:[%s20542_s15 + $0x70] sm:$0x77]  ;;  %v20308_v15 = vld [vmem:[%s20542_s15 + $0x8] sm:$0x77] }
  0xe8   : > { %4609 = vrot.lane.b32.xlu1 %v4591_v12, %s20405_s18  ;;  %17619 = vmatprep.subr.msk.mxu0 %vm462_vm1, %v434_v24  ;;  %v407_v32 = vpop.permute.xlu0 %406  ;;  %v4597_v12 = vcombine.high %v20757_v38, %v20757_v38 }
  0xe9   : > { %17614 = vmatmul.mubr.msk.f32.gmra.mrb[6].mxu0 %vm455_vm2, %v20727_v19  ;;  %17641 = vmatmul.mubr.msk.f32.vlgmr.msra.gmra.mrb[16].mxu1 %vm455_vm2, %v20704_v6  ;;  %v447_v23 = vsel %vm424_vm0, %v407_v32, %v409_v9 }
  0xea   : > { %17620 = vmatpush1.msk.msra.mxu0 %vm462_vm1, %v433_v20  ;;  %v20870_v34 = vpop.permute.xlu1 %418  ;;  %4655 = vrot.lane.b32.xlu0 %v20860_v28, %s20405_s18 }
  0xeb   : > { %897 = vmatprep.mubr.f32.mxu0 %v20402_v0  ;;  %1288 = vmatprep.mubr.f32.mxu1 %v20402_v0 }
  0xec   : > { %4607 = vrot.lane.b32.xlu1 %v4556_v5, %s20405_s18  ;;  %v417_v36 = vpop.permute.xlu0 %416  ;;  %17648 = vmatpush1.msk.msra.mxu1 %vm462_vm1, %v447_v23  ;;  %v20963_v5 = vld [vmem:[%s20542_s15 + $0x10] sm:$0x77] }
  0xed   : > { %17621 = vmatmul.mubr.msk.f32.vlgmr.msra.gmra.mrb[8].mxu0 %vm455_vm2, %v20704_v6  ;;  %17642 = vmatmul.mubr.msk.f32.gmra.mrb[18].mxu1 %vm455_vm2, %v20727_v19  ;;  %v452_v37 = vsel %vm424_vm0, %v417_v36, %v20870_v34 }
  0xee   : > { %v389_v40 = vpop.permute.xlu1 %388  ;;  %4651 = vrot.lane.b32.xlu0 %v4567_v59, %s20405_s18  ;;  %17655 = vmatprep.subr.msk.mxu1 %vm462_vm1, %v452_v37 }
  0xef   : > { %v437_v43 = vsel %vm424_vm0, %v20739_v29, %v389_v40  ;;  %903 = vmatprep.mubr.f32.mxu0 %v20402_v0  ;;  %1436 = vmatprep.mubr.f32.mxu1 %v20402_v0  ;;  %v438_v45 = vsel %vm424_vm0, %v389_v40, %v20767_v42  ;;  %v4571_v29 = vld [vmem:[%s20542_s15 + $0x78] sm:$0x77]  ;;  %v4599_v40 = vcombine.high %v20788_v49, %v20788_v49 }
  0xf0   : > { %4663 = vrot.lane.b32.xlu1 %v20886_v39, %s20405_s18  ;;  %17627 = vmatprep.subr.msk.mxu0 %vm462_vm1, %v438_v45  ;;  %v415_v46 = vpop.permute.xlu0 %414  ;;  %v4606_v52 = vcombine.high %v4571_v29, %v4571_v29  ;;  %v6070_v49 = vld [vmem:[%s20542_s15 + $0x38] sm:$0x77] }
  0xf1   : > { %17622 = vmatmul.mubr.msk.f32.gmra.mrb[10].mxu0 %vm455_vm2, %v20727_v19  ;;  %17649 = vmatmul.mubr.msk.f32.vlgmr.msra.gmra.mrb[20].mxu1 %vm455_vm2, %v20704_v6  ;;  %v451_v51 = vsel %vm424_vm0, %v415_v46, %v417_v36 }
  0xf2   : > { %17628 = vmatpush1.msk.msra.mxu0 %vm462_vm1, %v437_v43  ;;  %v397_v42 = vpop.permute.xlu1 %396  ;;  %4661 = vrot.lane.b32.xlu0 %v4604_v41, %s20405_s18  ;;  %v20309_v41 = vld [vmem:[%s20542_s15 + $0x18] sm:$0x77] }
  0xf3   : > { %v441_v48 = vsel %vm424_vm0, %v20776_v44, %v397_v42  ;;  %1051 = vmatprep.mubr.f32.mxu0 %v20402_v0  ;;  %1442 = vmatprep.mubr.f32.mxu1 %v20402_v0  ;;  %v442_v50 = vsel %vm424_vm0, %v397_v42, %v20828_v1  ;;  %v6064_v44 = vld [vmem:[%s20542_s15 + $0x8] sm:$0x77]  ;;  %v4601_v42 = vcombine.high %v20823_v63, %v20823_v63 }
  0xf4   : > { %4659 = vrot.lane.b32.xlu1 %v4569_v35, %s20405_s18  ;;  %17635 = vmatprep.subr.msk.mxu0 %vm462_vm1, %v442_v50  ;;  %v423_v62 = vpop.permute.xlu0 %422  ;;  %v6099_v57 = vcombine.high %v6064_v44, %v6064_v44  ;;  %v21013_v35 = vld [vmem:[%s20542_s15 + $0x20] sm:$0x77]  ;;  %v6072_v50 = vld [vmem:[%s20542_s15 + $0x48] sm:$0x77] }
  0xf5   : > { %17629 = vmatmul.mubr.msk.f32.vlgmr.msra.gmra.mrb[12].mxu0 %vm455_vm2, %v20704_v6  ;;  %17650 = vmatmul.mubr.msk.f32.gmra.mrb[22].mxu1 %vm455_vm2, %v20727_v19 }
  0xf6   : > { %17636 = vmatpush1.msk.msra.mxu0 %vm462_vm1, %v441_v48  ;;  %v413_v54 = vpop.permute.xlu1 %412  ;;  %4617 = vrot.lane.b32.xlu0 %v4593_v47, %s20405_s18 }
  0xf7   : > { %17656 = vmatpush1.msk.msra.mxu1 %vm462_vm1, %v451_v51  ;;  %1057 = vmatprep.mubr.f32.mxu0 %v20402_v0  ;;  %v450_v16 = vsel %vm424_vm0, %v413_v54, %v415_v46  ;;  %v449_v38 = vsel %vm424_vm0, %v20837_v8, %v413_v54  ;;  %v21006_v8 = vld [vmem:[%s23617_s1 + $0x8] sm:$0xff]  ;;  %v21051_v46 = vld [vmem:[%s20542_s15 + $0x30] sm:$0x77]  ;;  %v6074_v54 = vld [vmem:[%s20542_s15 + $0x58] sm:$0x77] }
  0xf8   : > { %1590 = vmatprep.mubr.f32.mxu1 %v20402_v0  ;;  %4669 = vrot.lane.b32.xlu1 %v4606_v52, %s20405_s18  ;;  %v405_v56 = vpop.permute.xlu0 %404 }
  0xf9   : > { %17630 = vmatmul.mubr.msk.f32.gmra.mrb[14].mxu0 %vm455_vm2, %v20727_v19  ;;  %17657 = vmatmul.mubr.msk.f32.vlgmr.msra.gmra.mrb[24].mxu1 %vm455_vm2, %v20704_v6  ;;  %v446_v58 = vsel %vm424_vm0, %v405_v56, %v407_v32  ;;  %v445_v61 = vsel %vm424_vm0, %v20798_v55, %v405_v56  ;;  %v6068_v32 = vld [vmem:[%s20542_s15 + $0x28] sm:$0x77] }
  0xfa   : > { %v20933_v59 = vpop.permute.xlu1 %3109  ;;  %4667 = vrot.lane.b32.xlu0 %v4571_v29, %s20405_s18  ;;  %17643 = vmatprep.subr.msk.mxu0 %vm462_vm1, %v446_v58  ;;  %v6103_v36 = vcombine.high %v6068_v32, %v6068_v32  ;;  %v6105_v29 = vcombine.high %v6070_v49, %v6070_v49  ;;  %v6109_v58 = vcombine.high %v6074_v54, %v6074_v54 }
  0xfb   : > { %1205 = vmatprep.mubr.f32.mxu0 %v20402_v0  ;;  %1596 = vmatprep.mubr.f32.mxu1 %v20402_v0 }
  0xfc   : > { %6120 = vrot.lane.b32.xlu1 %v6099_v57, %s20406_s23  ;;  %18548 = vmatprep.subr.msk.mxu1 %vm462_vm1, %v423_v62  ;;  %v421_v53 = vpop.permute.xlu0 %420  ;;  %v20313_v57 = vld [vmem:[%s20542_s15 + $0x10] sm:$0x77] }
  0xfd   : > { %17637 = vmatmul.mubr.msk.f32.vlgmr.msra.gmra.mrb[16].mxu0 %vm455_vm2, %v20704_v6  ;;  %17658 = vmatmul.mubr.msk.f32.gmra.mrb[26].mxu1 %vm455_vm2, %v20727_v19  ;;  %v454_v20 = vsel %vm424_vm0, %v421_v53, %v423_v62  ;;  %v453_v45 = vsel %vm424_vm0, %v20870_v34, %v421_v53  ;;  %v20314_v53 = vld [vmem:[%s20542_s15 + $0x48] sm:$0x77] }
  0xfe   : > { %17644 = vmatpush1.msk.msra.mxu0 %vm462_vm1, %v445_v61  ;;  %18549 = vmatpush3.msk.msra.mxu1 %vm462_vm1, %v423_v62  ;;  %v20952_v1 = vpop.permute.xlu1 %3107  ;;  %v6107_v62 = vcombine.high %v6072_v50, %v6072_v50 }
  0xff   : > { %17651 = vmatprep.subr.msk.mxu0 %vm462_vm1, %v450_v16  ;;  %4625 = vrot.lane.b32.xlu0 %v4595_v60, %s20405_s18 }
 0x100   : > { %1211 = vmatprep.mubr.f32.mxu0 %v20402_v0  ;;  %18550 = vmatprep.mubr.msk.f32.mxu1 %vm455_vm2, %v20704_v6  ;;  %v20960_v55 = vpop.permute.xlu0 %3111 }
 0x101   : > { %6118 = vrot.lane.b32.xlu1 %v6064_v44, %s20406_s23  ;;  %17638 = vmatmul.mubr.msk.f32.gmra.mrb[18].mxu0 %vm455_vm2, %v20727_v19  ;;  %v20312_v44 = vld [vmem:[%s20542_s15 + $0x38] sm:$0x77] }
 0x102   : > { %18551 = vmatmul.mubr.msk.f32.vlgmr.msra.gmra.mrb[28].mxu1 %vm455_vm2, %v20727_v19  ;;  %v20970_v9 = vpop.permute.xlu1 %3119  ;;  %17670 = vmatprep.subr.msk.mxu1 %vm462_vm1, %v20547_v3 }
 0x103   : > { %6122 = vrot.lane.b32.xlu0 %v20963_v5, %s20406_s23  ;;  %1359 = vmatprep.mubr.f32.mxu0 %v20402_v0 }
 0x104   : > { %17671 = vmatpush1.msk.msra.mxu1 %vm462_vm1, %v20308_v15  ;;  %1964 = vmatprep.mubr.f32.mxu1 %v20402_v0  ;;  %v20987_v3 = vpop.permute.xlu0 %3117 }
 0x105   : > { %6128 = vrot.lane.b32.xlu1 %v6101_v7, %s20406_s23  ;;  %17645 = vmatmul.mubr.msk.f32.vlgmr.msra.gmra.mrb[20].mxu0 %vm455_vm2, %v20704_v6  ;;  %v6063_v7 = vld [vmem:[%s20542_s15] sm:$0x77] }
 0x106   : > { %17652 = vmatpush1.msk.msra.mxu0 %vm462_vm1, %v449_v38  ;;  %17672 = vmatmul.mubr.msk.f32.vlgmr.msra.gmra.mrb[0].mxu1 %vm455_vm2, %v20982_v13  ;;  %v20998_v24 = vpop.permute.xlu1 %3125  ;;  %v6098_v15 = vcombine.high %v6063_v7, %v6063_v7 }
 0x107   : > { %17659 = vmatprep.subr.msk.mxu0 %vm462_vm1, %v454_v20  ;;  %4633 = vrot.lane.b32.xlu0 %v4597_v12, %s20405_s18  ;;  %v6076_v20 = vld [vmem:[%s20542_s15 + $0x68] sm:$0x77] }
 0x108   : > { %1365 = vmatprep.mubr.f32.mxu0 %v20402_v0  ;;  %1970 = vmatprep.mubr.f32.mxu1 %v20402_v0  ;;  %v21010_v23 = vpop.permute.xlu0 %3115 }
 0x109   : > { %6126 = vrot.lane.b32.xlu1 %v6066_v2, %s20406_s23  ;;  %17646 = vmatmul.mubr.msk.f32.gmra.mrb[22].mxu0 %vm455_vm2, %v20727_v19  ;;  %v20315_v2 = vld [vmem:[%s20542_s15 + $0x20] sm:$0x77] }
 0x10a   : > { %17673 = vmatmul.mubr.msk.f32.gmra.mrb[2].mxu1 %vm455_vm2, %v21006_v8  ;;  %v21020_v37 = vpop.permute.xlu1 %3123  ;;  %17678 = vmatprep.subr.msk.mxu1 %vm462_vm1, %v20549_v4 }
 0x10b   : > { %6130 = vrot.lane.b32.xlu0 %v21013_v35, %s20406_s23  ;;  %1513 = vmatprep.mubr.f32.mxu0 %v20402_v0 }
 0x10c   : > { %17679 = vmatpush1.msk.msra.mxu1 %vm462_vm1, %v20309_v41  ;;  %2118 = vmatprep.mubr.f32.mxu1 %v20402_v0  ;;  %v21032_v43 = vpop.permute.xlu0 %3127  ;;  %v20317_v41 = vld [vmem:[%s20542_s15 + $0x68] sm:$0x77] }
 0x10d   : > { %6136 = vrot.lane.b32.xlu1 %v6103_v36, %s20406_s23  ;;  %17653 = vmatmul.mubr.msk.f32.vlgmr.msra.gmra.mrb[24].mxu0 %vm455_vm2, %v20704_v6  ;;  %v21199_v36 = vld [vmem:[%s20542_s15 + $0x70] sm:$0x77] }
 0x10e   : > { %17660 = vmatpush1.msk.msra.mxu0 %vm462_vm1, %v453_v45  ;;  %17680 = vmatmul.mubr.msk.f32.vlgmr.msra.gmra.mrb[4].mxu1 %vm455_vm2, %v20982_v13  ;;  %v21042_v4 = vpop.permute.xlu1 %3135  ;;  %v6100_v45 = vcombine.high %v20963_v5, %v20963_v5  ;;  %v20319_v5 = vld [vmem:[%s20542_s15 + $0x78] sm:$0x7] }
 0x10f   : > { %4641 = vrot.lane.b32.xlu0 %v4599_v40, %s20405_s18  ;;  %1519 = vmatprep.mubr.f32.mxu0 %v20402_v0 }
 0x110   : > { %2124 = vmatprep.mubr.f32.mxu1 %v20402_v0  ;;  %v21048_v34 = vpop.permute.xlu0 %3133  ;;  %17686 = vmatprep.subr.msk.mxu1 %vm462_vm1, %v20563_v10  ;;  %v20310_v10 = vld [vmem:[%s20542_s15 + $0x28] sm:$0x77] }
 0x111   : > { %6134 = vrot.lane.b32.xlu1 %v6068_v32, %s20406_s23  ;;  %17654 = vmatmul.mubr.msk.f32.gmra.mrb[26].mxu0 %vm455_vm2, %v20727_v19 }
 0x112   : > { %17681 = vmatmul.mubr.msk.f32.gmra.mrb[6].mxu1 %vm455_vm2, %v21006_v8  ;;  %v21060_v47 = vpop.permute.xlu1 %3141  ;;  %1667 = vmatprep.mubr.f32.mxu0 %v20402_v0 }
 0x113   : > { %6138 = vrot.lane.b32.xlu0 %v21051_v46, %s20406_s23  ;;  %17687 = vmatpush1.msk.msra.mxu1 %vm462_vm1, %v20310_v10  ;;  %v3169_v10 = vsel %vm3165_vm3, %v20933_v59, %v20960_v55 }
 0x114   : > { %2272 = vmatprep.mubr.f32.mxu1 %v20402_v0  ;;  %v21070_v48 = vpop.permute.xlu0 %3131  ;;  %17666 = vmatprep.subr.msk.mxu0 %vm462_vm1, %v20577_v14  ;;  %v21088_v14 = vld [vmem:[%s20542_s15 + $0x40] sm:$0x77] }
 0x115   : > { %6144 = vrot.lane.b32.xlu1 %v6105_v29, %s20406_s23  ;;  %17661 = vmatmul.mubr.msk.f32.vlgmr.msra.gmra.mrb[28].mxu0 %vm455_vm2, %v20704_v6  ;;  %v20311_v6 = vld [vmem:[%s20542_s15] sm:$0x77]  ;;  %v20318_v29 = vld [vmem:[%s20542_s15 + $0x30] sm:$0x77] }
 0x116   : > { %17688 = vmatmul.mubr.msk.f32.vlgmr.msra.gmra.mrb[8].mxu1 %vm455_vm2, %v20982_v13  ;;  %v21079_v63 = vpop.permute.xlu1 %3139  ;;  %1673 = vmatprep.mubr.f32.mxu0 %v20402_v0 }
 0x117   : > { %4649 = vrot.lane.b32.xlu0 %v4601_v42, %s20405_s18  ;;  %2278 = vmatprep.mubr.f32.mxu1 %v20402_v0 }
 0x118   : > { %v21085_v51 = vpop.permute.xlu0 %3143  ;;  %17694 = vmatprep.subr.msk.mxu1 %vm462_vm1, %v20566_v11  ;;  %17667 = vmatpush1.msk.msra.mxu0 %vm462_vm1, %v20311_v6  ;;  %v4603_v11 = vcombine.high %v20860_v28, %v20860_v28 }
 0x119   : > { %6142 = vrot.lane.b32.xlu1 %v6070_v49, %s20406_s23  ;;  %17662 = vmatmul.mubr.msk.f32.gmra.mrb[30].mxu0 %vm455_vm2, %v20727_v19 }
 0x11a   : > { %17689 = vmatmul.mubr.msk.f32.gmra.mrb[10].mxu1 %vm455_vm2, %v21006_v8  ;;  %v21099_v52 = vpop.permute.xlu1 %3103  ;;  %1887 = vmatprep.mubr.f32.mxu0 %v20402_v0 }
 0x11b   : > { %6146 = vrot.lane.b32.xlu0 %v21088_v14, %s20406_s23  ;;  %17695 = vmatpush1.msk.msra.mxu1 %vm462_vm1, %v20312_v44 }
 0x11c   : > { %2426 = vmatprep.mubr.f32.mxu1 %v20402_v0  ;;  %v21109_v19 = vpop.permute.xlu0 %3105  ;;  %17674 = vmatprep.subr.msk.mxu0 %vm462_vm1, %v20587_v18  ;;  %v21127_v18 = vld [vmem:[%s20542_s15 + $0x50] sm:$0x77] }
 0x11d   : > { %6152 = vrot.lane.b32.xlu1 %v6107_v62, %s20406_s23  ;;  %17668 = vmatmul.mubr.msk.f32.vlgmr.msra.gmra.mrb[0].mxu0 %vm455_vm2, %v20982_v13 }
 0x11e   : > { %17696 = vmatmul.mubr.msk.f32.vlgmr.msra.gmra.mrb[12].mxu1 %vm455_vm2, %v20982_v13  ;;  %v21118_v28 = vpop.permute.xlu1 %3151  ;;  %1893 = vmatprep.mubr.f32.mxu0 %v20402_v0 }
 0x11f   : > { %4657 = vrot.lane.b32.xlu0 %v4603_v11, %s20405_s18  ;;  %2432 = vmatprep.mubr.f32.mxu1 %v20402_v0  ;;  %v7571_v11 = vld [vmem:[%s20542_s15 + $0x8] sm:$0x77] }
 0x120   : > { %v21124_v56 = vpop.permute.xlu0 %3149  ;;  %17702 = vmatprep.subr.msk.mxu1 %vm462_vm1, %v20584_v17  ;;  %17675 = vmatpush1.msk.msra.mxu0 %vm462_vm1, %v20313_v57  ;;  %v4605_v17 = vcombine.high %v20886_v39, %v20886_v39  ;;  %v20320_v57 = vld [vmem:[%s20542_s15 + $0x40] sm:$0x77] }
 0x121   : > { %6150 = vrot.lane.b32.xlu1 %v6072_v50, %s20406_s23  ;;  %17669 = vmatmul.mubr.msk.f32.gmra.mrb[2].mxu0 %vm455_vm2, %v21006_v8 }
 0x122   : > { %17697 = vmatmul.mubr.msk.f32.gmra.mrb[14].mxu1 %vm455_vm2, %v21006_v8  ;;  %v21138_v60 = vpop.permute.xlu1 %3113  ;;  %2041 = vmatprep.mubr.f32.mxu0 %v20402_v0 }
 0x123   : > { %6154 = vrot.lane.b32.xlu0 %v21127_v18, %s20406_s23  ;;  %17703 = vmatpush1.msk.msra.mxu1 %vm462_vm1, %v20314_v53 }
 0x124   : > { %2580 = vmatprep.mubr.f32.mxu1 %v20402_v0  ;;  %v21148_v61 = vpop.permute.xlu0 %3147  ;;  %17682 = vmatprep.subr.msk.mxu0 %vm462_vm1, %v20599_v22  ;;  %v21165_v22 = vld [vmem:[%s20542_s15 + $0x60] sm:$0x77] }
 0x125   : > { %6160 = vrot.lane.b32.xlu1 %v6109_v58, %s20406_s23  ;;  %17676 = vmatmul.mubr.msk.f32.vlgmr.msra.gmra.mrb[4].mxu0 %vm455_vm2, %v20982_v13  ;;  %v7606_v58 = vcombine.high %v7571_v11, %v7571_v11 }
 0x126   : > { %17704 = vmatmul.mubr.msk.f32.vlgmr.msra.gmra.mrb[16].mxu1 %vm455_vm2, %v20982_v13  ;;  %v21157_v39 = vpop.permute.xlu1 %3159  ;;  %2047 = vmatprep.mubr.f32.mxu0 %v20402_v0 }
 0x127   : > { %4665 = vrot.lane.b32.xlu0 %v4605_v17, %s20405_s18  ;;  %2586 = vmatprep.mubr.f32.mxu1 %v20402_v0  ;;  %v3168_v17 = vsel %vm3165_vm3, %v20952_v1, %v20933_v59 }
 0x128   : > { %v21162_v16 = vpop.permute.xlu0 %3157  ;;  %17710 = vmatprep.subr.msk.mxu1 %vm462_vm1, %v20596_v21  ;;  %17683 = vmatpush1.msk.msra.mxu0 %vm462_vm1, %v20315_v2  ;;  %v20316_v21 = vld [vmem:[%s20542_s15 + $0x58] sm:$0x77]  ;;  %v6102_v2 = vcombine.high %v21013_v35, %v21013_v35 }
 0x129   : > { %6158 = vrot.lane.b32.xlu1 %v6074_v54, %s20406_s23  ;;  %17677 = vmatmul.mubr.msk.f32.gmra.mrb[6].mxu0 %vm455_vm2, %v21006_v8  ;;  %v21257_v54 = vld [vmem:[%s20542_s15 + $0x10] sm:$0x77] }
 0x12a   : > { %17705 = vmatmul.mubr.msk.f32.gmra.mrb[18].mxu1 %vm455_vm2, %v21006_v8  ;;  %v21177_v12 = vpop.permute.xlu1 %3121  ;;  %2195 = vmatprep.mubr.f32.mxu0 %v20402_v0 }
 0x12b   : > { %6162 = vrot.lane.b32.xlu0 %v21165_v22, %s20406_s23  ;;  %17711 = vmatpush1.msk.msra.mxu1 %vm462_vm1, %v20316_v21  ;;  %v3172_v21 = vsel %vm3165_vm3, %v21010_v23, %v20987_v3 }
 0x12c   : > { %2734 = vmatprep.mubr.f32.mxu1 %v20402_v0  ;;  %v21185_v38 = vpop.permute.xlu0 %3155  ;;  %17718 = vmatprep.subr.msk.mxu1 %vm462_vm1, %v20608_v25  ;;  %v6111_v25 = vcombine.high %v6076_v20, %v6076_v20 }
 0x12d   : > { %6114 = vrot.lane.b32.xlu1 %v6063_v7, %s20406_s23  ;;  %17684 = vmatmul.mubr.msk.f32.vlgmr.msra.gmra.mrb[8].mxu0 %vm455_vm2, %v20982_v13  ;;  %v21289_v7 = vld [vmem:[%s23617_s1 + $0x20] sm:$0xff] }
 0x12e   : > { %17712 = vmatmul.mubr.msk.f32.vlgmr.msra.gmra.mrb[20].mxu1 %vm455_vm2, %v20982_v13  ;;  %v21195_v32 = vpop.permute.xlu1 %4613  ;;  %2201 = vmatprep.mubr.f32.mxu0 %v20402_v0 }
 0x12f   : > { %6116 = vrot.lane.b32.xlu0 %v6098_v15, %s20406_s23  ;;  %2740 = vmatprep.mubr.f32.mxu1 %v20402_v0  ;;  %v7573_v15 = vld [vmem:[%s20542_s15 + $0x18] sm:$0x77] }
 0x130   : > { %v21203_v40 = vpop.permute.xlu0 %3163  ;;  %17690 = vmatprep.subr.msk.mxu0 %vm462_vm1, %v20611_v26  ;;  %17719 = vmatpush1.msk.msra.mxu1 %vm462_vm1, %v20317_v41  ;;  %v6078_v26 = vld [vmem:[%s20542_s15 + $0x78] sm:$0x77]  ;;  %v7608_v41 = vcombine.high %v7573_v15, %v7573_v15 }
 0x131   : > { %6170 = vrot.lane.b32.xlu1 %v21199_v36, %s20406_s23  ;;  %17685 = vmatmul.mubr.msk.f32.gmra.mrb[10].mxu0 %vm455_vm2, %v21006_v8  ;;  %v6113_v50 = vcombine.high %v6078_v26, %v6078_v26 }
 0x132   : > { %17713 = vmatmul.mubr.msk.f32.gmra.mrb[22].mxu1 %vm455_vm2, %v21006_v8  ;;  %v21217_v49 = vpop.permute.xlu1 %3129  ;;  %17691 = vmatpush1.msk.msra.mxu0 %vm462_vm1, %v20318_v29  ;;  %v21322_v29 = vld [vmem:[%s23617_s1 + $0x28] sm:$0xff] }
 0x133   : > { %6168 = vrot.lane.b32.xlu0 %v6111_v25, %s20406_s23  ;;  %2349 = vmatprep.mubr.f32.mxu0 %v20402_v0  ;;  %v21314_v25 = vld [vmem:[%s20542_s15 + $0x20] sm:$0x77] }
 0x134   : > { %2888 = vmatprep.mubr.f32.mxu1 %v20402_v0  ;;  %18553 = vmatprep.subr.msk.mxu1 %vm462_vm1, %v20319_v5  ;;  %v21227_v42 = vpop.permute.xlu0 %4615 }
 0x135   : > { %6124 = vrot.lane.b32.xlu1 %v6100_v45, %s20406_s23  ;;  %17692 = vmatmul.mubr.msk.f32.vlgmr.msra.gmra.mrb[12].mxu0 %vm455_vm2, %v20982_v13  ;;  %v20321_v45 = vld [vmem:[%s20542_s15 + $0x50] sm:$0x77] }
 0x136   : > { %17720 = vmatmul.mubr.msk.f32.vlgmr.msra.gmra.mrb[24].mxu1 %vm455_vm2, %v20982_v13  ;;  %v21237_v6 = vpop.permute.xlu1 %4621  ;;  %2355 = vmatprep.mubr.f32.mxu0 %v20402_v0 }
 0x137   : > { %18554 = vmatpush3.msk.msra.mxu1 %vm462_vm1, %v20319_v5  ;;  %6166 = vrot.lane.b32.xlu0 %v6076_v20, %s20406_s23  ;;  %v3177_v20 = vsel %vm3165_vm3, %v20998_v24, %v21032_v43  ;;  %v6104_v5 = vcombine.high %v21051_v46, %v21051_v46  ;;  %v3181_v46 = vsel %vm3165_vm3, %v21048_v34, %v21042_v4 }
 0x138   : > { %17735 = vmatprep.subr.msk.mxu1 %vm462_vm1, %v3169_v10  ;;  %2894 = vmatprep.mubr.f32.mxu1 %v20402_v0  ;;  %v21244_v62 = vpop.permute.xlu0 %4611 }
 0x139   : > { %6176 = vrot.lane.b32.xlu1 %v6113_v50, %s20406_s23  ;;  %17693 = vmatmul.mubr.msk.f32.gmra.mrb[14].mxu0 %vm455_vm2, %v21006_v8  ;;  %v3176_v50 = vsel %vm3165_vm3, %v21020_v37, %v20998_v24  ;;  %v21364_v24 = vld [vmem:[%s20542_s15 + $0x30] sm:$0x77] }
 0x13a   : > { %17721 = vmatmul.mubr.msk.f32.gmra.mrb[26].mxu1 %vm455_vm2, %v21006_v8  ;;  %v21252_v44 = vpop.permute.xlu1 %3137  ;;  %17698 = vmatprep.subr.msk.mxu0 %vm462_vm1, %v20617_v27  ;;  %v3173_v27 = vsel %vm3165_vm3, %v20987_v3, %v20970_v9 }
 0x13b   : > { %6174 = vrot.lane.b32.xlu0 %v6078_v26, %s20406_s23  ;;  %17699 = vmatpush1.msk.msra.mxu0 %vm462_vm1, %v20320_v57  ;;  %v7575_v57 = vld [vmem:[%s20542_s15 + $0x28] sm:$0x77] }
 0x13c   : > { %2503 = vmatprep.mubr.f32.mxu0 %v20402_v0  ;;  %18555 = vmatprep.mubr.msk.f32.mxu1 %vm455_vm2, %v20982_v13  ;;  %v21268_v53 = vpop.permute.xlu0 %4623 }
 0x13d   : > { %7629 = vrot.lane.b32.xlu1 %v21257_v54, %s20407_s26  ;;  %17700 = vmatmul.mubr.msk.f32.vlgmr.msra.gmra.mrb[16].mxu0 %vm455_vm2, %v20982_v13 }
 0x13e   : > { %18556 = vmatmul.mubr.msk.f32.vlgmr.msra.gmra.mrb[28].mxu1 %vm455_vm2, %v21006_v8  ;;  %v21279_v59 = vpop.permute.xlu1 %4629  ;;  %2509 = vmatprep.mubr.f32.mxu0 %v20402_v0 }
 0x13f   : > { %17736 = vmatpush1.msk.msra.mxu1 %vm462_vm1, %v3168_v17  ;;  %7627 = vrot.lane.b32.xlu0 %v7606_v58, %s20407_s26  ;;  %v7610_v17 = vcombine.high %v7575_v57, %v7575_v57 }
 0x140   : > { %17743 = vmatprep.subr.msk.mxu1 %vm462_vm1, %v3173_v27  ;;  %3405 = vmatprep.mubr.f32.mxu1 %v20402_v0  ;;  %v21296_v35 = vpop.permute.xlu0 %4619 }
 0x141   : > { %7625 = vrot.lane.b32.xlu1 %v7571_v11, %s20407_s26  ;;  %17701 = vmatmul.mubr.msk.f32.gmra.mrb[18].mxu0 %vm455_vm2, %v21006_v8 }
 0x142   : > { %17737 = vmatmul.mubr.msk.f32.vlgmr.msra.gmra.mrb[0].mxu1 %vm455_vm2, %v21289_v7  ;;  %v21307_v3 = vpop.permute.xlu1 %3145  ;;  %17706 = vmatprep.subr.msk.mxu0 %vm462_vm1, %v20627_v31 }
 0x143   : > { %17744 = vmatpush1.msk.msra.mxu1 %vm462_vm1, %v3172_v21  ;;  %6132 = vrot.lane.b32.xlu0 %v6102_v2, %s20406_s23  ;;  %v20323_v2 = vld [vmem:[%s20542_s15 + $0x70] sm:$0x77] }
 0x144   : > { %17751 = vmatprep.subr.msk.mxu1 %vm462_vm1, %v3177_v20  ;;  %17707 = vmatpush1.msk.msra.mxu0 %vm462_vm1, %v20321_v45  ;;  %v21324_v26 = vpop.permute.xlu0 %4631  ;;  %v21410_v45 = vld [vmem:[%s20542_s15 + $0x40] sm:$0x77] }
 0x145   : > { %2657 = vmatprep.mubr.f32.mxu0 %v20402_v0  ;;  %3411 = vmatprep.mubr.f32.mxu1 %v20402_v0 }
 0x146   : > { %7637 = vrot.lane.b32.xlu1 %v21314_v25, %s20407_s26  ;;  %17708 = vmatmul.mubr.msk.f32.vlgmr.msra.gmra.mrb[20].mxu0 %vm455_vm2, %v20982_v13  ;;  %v21332_v31 = vpop.permute.xlu1 %4637 }
 0x147   : > { %17738 = vmatmul.mubr.msk.f32.gmra.mrb[2].mxu1 %vm455_vm2, %v21322_v29  ;;  %7635 = vrot.lane.b32.xlu0 %v7608_v41, %s20407_s26  ;;  %v7577_v41 = vld [vmem:[%s20542_s15 + $0x38] sm:$0x77] }
 0x148   : > { %2663 = vmatprep.mubr.f32.mxu0 %v20402_v0  ;;  %3559 = vmatprep.mubr.f32.mxu1 %v20402_v0  ;;  %v21341_v10 = vpop.permute.xlu0 %4627 }
 0x149   : > { %17714 = vmatprep.subr.msk.mxu0 %vm462_vm1, %v20624_v30  ;;  %v20322_v30 = vld [vmem:[%s20542_s15 + $0x60] sm:$0x77] }
 0x14a   : > { %7633 = vrot.lane.b32.xlu1 %v7573_v15, %s20407_s26  ;;  %17709 = vmatmul.mubr.msk.f32.gmra.mrb[22].mxu0 %vm455_vm2, %v21006_v8  ;;  %v21354_v11 = vpop.permute.xlu1 %3153  ;;  %v6106_v15 = vcombine.high %v21088_v14, %v21088_v14  ;;  %v3180_v14 = vsel %vm3165_vm3, %v21070_v48, %v21048_v34 }
 0x14b   : > { %17745 = vmatmul.mubr.msk.f32.vlgmr.msra.gmra.mrb[4].mxu1 %vm455_vm2, %v21289_v7  ;;  %6140 = vrot.lane.b32.xlu0 %v6104_v5, %s20406_s23 }
 0x14c   : > { %17752 = vmatpush1.msk.msra.mxu1 %vm462_vm1, %v3176_v50  ;;  %17715 = vmatpush1.msk.msra.mxu0 %vm462_vm1, %v20322_v30  ;;  %v21366_v58 = vpop.permute.xlu0 %4639  ;;  %v3166_v50 = vsel %vm3165_vm3, %v21099_v52, %v21109_v19  ;;  %v3171_v52 = vsel %vm3165_vm3, %v21138_v60, %v21010_v23  ;;  %v7579_v30 = vld [vmem:[%s20542_s15 + $0x48] sm:$0x77]  ;;  %v3189_v23 = vsel %vm3165_vm3, %v21124_v56, %v21118_v28 }
 0x14d   : > { %17759 = vmatprep.subr.msk.mxu1 %vm462_vm1, %v3181_v46  ;;  %2811 = vmatprep.mubr.f32.mxu0 %v20402_v0  ;;  %v7612_v46 = vcombine.high %v7577_v41, %v7577_v41 }
 0x14e   : > { %17722 = vmatprep.subr.msk.mxu0 %vm462_vm1, %v20633_v33  ;;  %3565 = vmatprep.mubr.f32.mxu1 %v20402_v0  ;;  %v21373_v27 = vpop.permute.xlu1 %4645  ;;  %v3167_v33 = vsel %vm3165_vm3, %v21109_v19, %v20952_v1  ;;  %v3185_v1 = vsel %vm3165_vm3, %v21060_v47, %v21085_v51 }
 0x14f   : > { %7645 = vrot.lane.b32.xlu1 %v21364_v24, %s20407_s26  ;;  %17716 = vmatmul.mubr.msk.f32.vlgmr.msra.gmra.mrb[24].mxu0 %vm455_vm2, %v20982_v13 }
 0x150   : > { %17723 = vmatpush1.msk.msra.mxu0 %vm462_vm1, %v20323_v2  ;;  %17746 = vmatmul.mubr.msk.f32.gmra.mrb[6].mxu1 %vm455_vm2, %v21322_v29  ;;  %v21386_v21 = vpop.permute.xlu0 %4635 }
 0x151   : > { %17731 = vmatprep.subr.msk.mxu0 %vm462_vm1, %v3167_v33  ;;  %7643 = vrot.lane.b32.xlu0 %v7610_v17, %s20407_s26  ;;  %v21457_v17 = vld [vmem:[%s20542_s15 + $0x50] sm:$0x77]  ;;  %v3170_v33 = vsel %vm3165_vm3, %v20960_v55, %v21138_v60  ;;  %v6110_v55 = vcombine.high %v21165_v22, %v21165_v22  ;;  %v3188_v22 = vsel %vm3165_vm3, %v21148_v61, %v21124_v56 }
 0x152   : > { %2817 = vmatprep.mubr.f32.mxu0 %v20402_v0  ;;  %3713 = vmatprep.mubr.f32.mxu1 %v20402_v0  ;;  %v21394_v20 = vpop.permute.xlu1 %3161 }
 0x153   : > { %7641 = vrot.lane.b32.xlu1 %v7575_v57, %s20407_s26  ;;  %17717 = vmatmul.mubr.msk.f32.gmra.mrb[26].mxu0 %vm455_vm2, %v21006_v8  ;;  %v6108_v57 = vcombine.high %v21127_v18, %v21127_v18  ;;  %v3184_v18 = vsel %vm3165_vm3, %v21079_v63, %v21060_v47 }
 0x154   : > { %17753 = vmatmul.mubr.msk.f32.vlgmr.msra.gmra.mrb[8].mxu1 %vm455_vm2, %v21289_v7  ;;  %2965 = vmatprep.mubr.f32.mxu0 %v20402_v0  ;;  %v21412_v5 = vpop.permute.xlu0 %4647 }
 0x155   : > { %17760 = vmatpush1.msk.msra.mxu1 %vm462_vm1, %v3180_v14  ;;  %6148 = vrot.lane.b32.xlu0 %v6106_v15, %s20406_s23  ;;  %v3175_v15 = vsel %vm3165_vm3, %v21177_v12, %v21020_v37  ;;  %v3193_v37 = vsel %vm3165_vm3, %v21162_v16, %v21157_v39  ;;  %v21504_v14 = vld [vmem:[%s20542_s15 + $0x60] sm:$0x77] }
 0x156   : > { %17767 = vmatprep.subr.msk.mxu1 %vm462_vm1, %v3185_v1  ;;  %3719 = vmatprep.mubr.f32.mxu1 %v20402_v0  ;;  %v21421_v34 = vpop.permute.xlu1 %4653  ;;  %v7581_v1 = vld [vmem:[%s20542_s15 + $0x58] sm:$0x77] }
 0x157   : > { %7653 = vrot.lane.b32.xlu1 %v21410_v45, %s20407_s26  ;;  %17724 = vmatmul.mubr.msk.f32.vlgmr.msra.gmra.mrb[28].mxu0 %vm455_vm2, %v20982_v13 }
 0x158   : > { %17732 = vmatpush1.msk.msra.mxu0 %vm462_vm1, %v3166_v50  ;;  %17754 = vmatmul.mubr.msk.f32.gmra.mrb[10].mxu1 %vm455_vm2, %v21322_v29  ;;  %v21433_v19 = vpop.permute.xlu0 %4643 }
 0x159   : > { %17739 = vmatprep.subr.msk.mxu0 %vm462_vm1, %v3171_v52  ;;  %7651 = vrot.lane.b32.xlu0 %v7612_v46, %s20407_s26  ;;  %v7616_v46 = vcombine.high %v7581_v1, %v7581_v1  ;;  %v3174_v52 = vsel %vm3165_vm3, %v20970_v9, %v21177_v12  ;;  %v6112_v9 = vcombine.high %v21199_v36, %v21199_v36  ;;  %v21548_v36 = vld [vmem:[%s20542_s15 + $0x70] sm:$0x77] }
 0x15a   : > { %2971 = vmatprep.mubr.f32.mxu0 %v20402_v0  ;;  %3867 = vmatprep.mubr.f32.mxu1 %v20402_v0  ;;  %v21441_v13 = vpop.permute.xlu1 %4609 }
 0x15b   : > { %7649 = vrot.lane.b32.xlu1 %v7577_v41, %s20407_s26  ;;  %17725 = vmatmul.mubr.msk.f32.gmra.mrb[30].mxu0 %vm455_vm2, %v21006_v8  ;;  %v7614_v8 = vcombine.high %v7579_v30, %v7579_v30 }
 0x15c   : > { %17761 = vmatmul.mubr.msk.f32.vlgmr.msra.gmra.mrb[12].mxu1 %vm455_vm2, %v21289_v7  ;;  %3328 = vmatprep.mubr.f32.mxu0 %v20402_v0  ;;  %v21459_v2 = vpop.permute.xlu0 %4655 }
 0x15d   : > { %17768 = vmatpush1.msk.msra.mxu1 %vm462_vm1, %v3184_v18  ;;  %6156 = vrot.lane.b32.xlu0 %v6108_v57, %s20406_s23  ;;  %v3179_v57 = vsel %vm3165_vm3, %v21217_v49, %v21070_v48  ;;  %v3192_v48 = vsel %vm3165_vm3, %v21185_v38, %v21162_v16 }
 0x15e   : > { %17775 = vmatprep.subr.msk.mxu1 %vm462_vm1, %v3189_v23  ;;  %3873 = vmatprep.mubr.f32.mxu1 %v20402_v0  ;;  %v21465_v47 = vpop.permute.xlu1 %4607  ;;  %v7583_v23 = vld [vmem:[%s20542_s15 + $0x68] sm:$0x77] }
 0x15f   : > { %7661 = vrot.lane.b32.xlu1 %v21457_v17, %s20407_s26  ;;  %17733 = vmatmul.mubr.msk.f32.vlgmr.msra.gmra.mrb[0].mxu0 %vm455_vm2, %v21289_v7 }
 0x160   : > { %17740 = vmatpush1.msk.msra.mxu0 %vm462_vm1, %v3170_v33  ;;  %17762 = vmatmul.mubr.msk.f32.gmra.mrb[14].mxu1 %vm455_vm2, %v21322_v29  ;;  %v21480_v41 = vpop.permute.xlu0 %4651  ;;  %v7570_v33 = vld [vmem:[%s20542_s15] sm:$0x77] }
 0x161   : > { %17747 = vmatprep.subr.msk.mxu0 %vm462_vm1, %v3175_v15  ;;  %7659 = vrot.lane.b32.xlu0 %v7614_v8, %s20407_s26  ;;  %v7618_v8 = vcombine.high %v7583_v23, %v7583_v23  ;;  %v3178_v15 = vsel %vm3165_vm3, %v21032_v43, %v21217_v49  ;;  %v7605_v49 = vcombine.high %v7570_v33, %v7570_v33 }
 0x162   : > { %3334 = vmatprep.mubr.f32.mxu0 %v20402_v0  ;;  %4021 = vmatprep.mubr.f32.mxu1 %v20402_v0  ;;  %v21488_v60 = vpop.permute.xlu1 %4663 }
 0x163   : > { %7657 = vrot.lane.b32.xlu1 %v7579_v30, %s20407_s26  ;;  %17734 = vmatmul.mubr.msk.f32.gmra.mrb[2].mxu0 %vm455_vm2, %v21322_v29 }
 0x164   : > { %17769 = vmatmul.mubr.msk.f32.vlgmr.msra.gmra.mrb[16].mxu1 %vm455_vm2, %v21289_v7  ;;  %3482 = vmatprep.mubr.f32.mxu0 %v20402_v0  ;;  %v21506_v50 = vpop.permute.xlu0 %4661 }
 0x165   : > { %17776 = vmatpush1.msk.msra.mxu1 %vm462_vm1, %v3188_v22  ;;  %6164 = vrot.lane.b32.xlu0 %v6110_v55, %s20406_s23  ;;  %v3183_v55 = vsel %vm3165_vm3, %v21252_v44, %v21079_v63  ;;  %v7585_v63 = vld [vmem:[%s20542_s15 + $0x78] sm:$0x77] }
 0x166   : > { %17783 = vmatprep.subr.msk.mxu1 %vm462_vm1, %v3193_v37  ;;  %4027 = vmatprep.mubr.f32.mxu1 %v20402_v0  ;;  %v21512_v56 = vpop.permute.xlu1 %4659  ;;  %v4675_v37 = vsel %vm4671_vm4, %v21195_v32, %v21227_v42 }
 0x167   : > { %7669 = vrot.lane.b32.xlu1 %v21504_v14, %s20407_s26  ;;  %17741 = vmatmul.mubr.msk.f32.vlgmr.msra.gmra.mrb[4].mxu0 %vm455_vm2, %v21289_v7 }
 0x168   : > { %17748 = vmatpush1.msk.msra.mxu0 %vm462_vm1, %v3174_v52  ;;  %17770 = vmatmul.mubr.msk.f32.gmra.mrb[18].mxu1 %vm455_vm2, %v21322_v29  ;;  %v21527_v30 = vpop.permute.xlu0 %4617  ;;  %v7607_v52 = vcombine.high %v21257_v54, %v21257_v54  ;;  %v7611_v54 = vcombine.high %v21364_v24, %v21364_v24  ;;  %v4679_v24 = vsel %vm4671_vm4, %v21237_v6, %v21268_v53 }
 0x169   : > { %17755 = vmatprep.subr.msk.mxu0 %vm462_vm1, %v3179_v57  ;;  %7667 = vrot.lane.b32.xlu0 %v7616_v46, %s20407_s26  ;;  %v3182_v46 = vsel %vm3165_vm3, %v21042_v4, %v21252_v44  ;;  %v7620_v4 = vcombine.high %v7585_v63, %v7585_v63 }
 0x16a   : > { %3488 = vmatprep.mubr.f32.mxu0 %v20402_v0  ;;  %4175 = vmatprep.mubr.f32.mxu1 %v20402_v0  ;;  %v21535_v12 = vpop.permute.xlu1 %4669 }
 0x16b   : > { %7665 = vrot.lane.b32.xlu1 %v7581_v1, %s20407_s26  ;;  %17742 = vmatmul.mubr.msk.f32.gmra.mrb[6].mxu0 %vm455_vm2, %v21322_v29 }
 0x16c   : > { %17777 = vmatmul.mubr.msk.f32.vlgmr.msra.gmra.mrb[20].mxu1 %vm455_vm2, %v21289_v7  ;;  %3636 = vmatprep.mubr.f32.mxu0 %v20402_v0  ;;  %v21550_v18 = vpop.permute.xlu0 %4667 }
 0x16d   : > { %17784 = vmatpush1.msk.msra.mxu1 %vm462_vm1, %v3192_v48  ;;  %6172 = vrot.lane.b32.xlu0 %v6112_v9, %s20406_s23  ;;  %v3187_v9 = vsel %vm3165_vm3, %v21307_v3, %v21148_v61  ;;  %v21642_v48 = vld [vmem:[%s23617_s1 + $0x30] sm:$0xff] }
 0x16e   : > { %18558 = vmatprep.subr.msk.mxu1 %vm462_vm1, %v21203_v40  ;;  %4181 = vmatprep.mubr.f32.mxu1 %v20402_v0  ;;  %v21557_v16 = vpop.permute.xlu1 %6120 }
 0x16f   : > { %7677 = vrot.lane.b32.xlu1 %v21548_v36, %s20407_s26  ;;  %17749 = vmatmul.mubr.msk.f32.vlgmr.msra.gmra.mrb[8].mxu0 %vm455_vm2, %v21289_v7 }
 0x170   : > { %17756 = vmatpush1.msk.msra.mxu0 %vm462_vm1, %v3178_v15  ;;  %17778 = vmatmul.mubr.msk.f32.gmra.mrb[22].mxu1 %vm455_vm2, %v21322_v29  ;;  %v4683_v15 = vsel %vm4671_vm4, %v21279_v59, %v21324_v26 }
 0x171   : > { %17763 = vmatprep.subr.msk.mxu0 %vm462_vm1, %v3183_v55  ;;  %7675 = vrot.lane.b32.xlu0 %v7618_v8, %s20407_s26  ;;  %v21575_v43 = vpop.permute.xlu0 %4625 }
 0x172   : > { %3642 = vmatprep.mubr.f32.mxu0 %v20402_v0  ;;  %4329 = vmatprep.mubr.f32.mxu1 %v20402_v0 }
 0x173   : > { %7673 = vrot.lane.b32.xlu1 %v7583_v23, %s20407_s26  ;;  %17750 = vmatmul.mubr.msk.f32.gmra.mrb[10].mxu0 %vm455_vm2, %v21322_v29  ;;  %v21582_v1 = vpop.permute.xlu1 %6118  ;;  %v4674_v23 = vsel %vm4671_vm4, %v21244_v62, %v21195_v32  ;;  %v7609_v32 = vcombine.high %v21314_v25, %v21314_v25  ;;  %v4678_v25 = vsel %vm4671_vm4, %v21296_v35, %v21237_v6 }
 0x174   : > { %17785 = vmatmul.mubr.msk.f32.vlgmr.msra.gmra.mrb[24].mxu1 %vm455_vm2, %v21289_v7  ;;  %3790 = vmatprep.mubr.f32.mxu0 %v20402_v0  ;;  %v7613_v6 = vcombine.high %v21410_v45, %v21410_v45 }
 0x175   : > { %18559 = vmatpush3.msk.msra.mxu1 %vm462_vm1, %v21203_v40  ;;  %7623 = vrot.lane.b32.xlu0 %v7605_v49, %s20407_s26  ;;  %v21594_v22 = vpop.permute.xlu0 %6122 }
 0x176   : > { %17800 = vmatprep.subr.msk.mxu1 %vm462_vm1, %v4675_v37  ;;  %4335 = vmatprep.mubr.f32.mxu1 %v20402_v0 }
 0x177   : > { %7681 = vrot.lane.b32.xlu1 %v7585_v63, %s20407_s26  ;;  %17757 = vmatmul.mubr.msk.f32.vlgmr.msra.gmra.mrb[12].mxu0 %vm455_vm2, %v21289_v7  ;;  %v21606_v57 = vpop.permute.xlu1 %6128  ;;  %v7615_v63 = vcombine.high %v21457_v17, %v21457_v17  ;;  %v4687_v17 = vsel %vm4671_vm4, %v21332_v31, %v21366_v58 }
 0x178   : > { %17764 = vmatpush1.msk.msra.mxu0 %vm462_vm1, %v3182_v46  ;;  %17786 = vmatmul.mubr.msk.f32.gmra.mrb[26].mxu1 %vm455_vm2, %v21322_v29  ;;  %v4682_v46 = vsel %vm4671_vm4, %v21341_v10, %v21279_v59  ;;  %v7617_v59 = vcombine.high %v21504_v14, %v21504_v14  ;;  %v4691_v14 = vsel %vm4671_vm4, %v21373_v27, %v21412_v5 }
 0x179   : > { %17771 = vmatprep.subr.msk.mxu0 %vm462_vm1, %v3187_v9  ;;  %7621 = vrot.lane.b32.xlu0 %v7570_v33, %s20407_s26  ;;  %v21616_v44 = vpop.permute.xlu0 %4633  ;;  %v3186_v33 = vsel %vm3165_vm3, %v21085_v51, %v21307_v3  ;;  %v3191_v51 = vsel %vm3165_vm3, %v21354_v11, %v21185_v38  ;;  %v21675_v3 = vld [vmem:[%s23617_s1 + $0x38] sm:$0xff]  ;;  %v3195_v9 = vsel %vm3165_vm3, %v21394_v20, %v21203_v40 }
 0x17a   : > { %3796 = vmatprep.mubr.f32.mxu0 %v20402_v0  ;;  %18560 = vmatprep.mubr.msk.f32.mxu1 %vm455_vm2, %v21289_v7 }
 0x17b   : > { %7631 = vrot.lane.b32.xlu1 %v7607_v52, %s20407_s26  ;;  %17758 = vmatmul.mubr.msk.f32.gmra.mrb[14].mxu0 %vm455_vm2, %v21322_v29  ;;  %v21626_v61 = vpop.permute.xlu1 %6126  ;;  %v3190_v52 = vsel %vm3165_vm3, %v21118_v28, %v21354_v11  ;;  %v7619_v28 = vcombine.high %v21548_v36, %v21548_v36 }
 0x17c   : > { %18561 = vmatmul.mubr.msk.f32.vlgmr.msra.gmra.mrb[28].mxu1 %vm455_vm2, %v21322_v29  ;;  %3944 = vmatprep.mubr.f32.mxu0 %v20402_v0 }
 0x17d   : > { %17801 = vmatpush1.msk.msra.mxu1 %vm462_vm1, %v4674_v23  ;;  %7683 = vrot.lane.b32.xlu0 %v7620_v4, %s20407_s26  ;;  %v21644_v8 = vpop.permute.xlu0 %6130  ;;  %v4686_v23 = vsel %vm4671_vm4, %v21386_v21, %v21332_v31 }
 0x17e   : > { %17808 = vmatprep.subr.msk.mxu1 %vm462_vm1, %v4679_v24  ;;  %4912 = vmatprep.mubr.f32.mxu1 %v20402_v0  ;;  %v3194_v24 = vsel %vm3165_vm3, %v21157_v39, %v21394_v20  ;;  %v21771_v20 = vld [vmem:[%s20542_s15 + $0x14] sm:$0x77] }
 0x17f   : > { %17765 = vmatmul.mubr.msk.f32.vlgmr.msra.gmra.mrb[16].mxu0 %vm455_vm2, %v21289_v7  ;;  %v21658_v55 = vpop.permute.xlu1 %6136  ;;  %7647 = vrot.lane.b32.xlu1 %v7611_v54, %s20407_s26  ;;  %v10488_v54 = vld [vmem:[%s20542_s15 + $0xc] sm:$0x77] }
 0x180   : > { %17772 = vmatpush1.msk.msra.mxu0 %vm462_vm1, %v3186_v33  ;;  %17802 = vmatmul.mubr.msk.f32.vlgmr.msra.gmra.mrb[0].mxu1 %vm455_vm2, %v21642_v48  ;;  %v10523_v39 = vcombine.high %v10488_v54, %v10488_v54 }
 0x181   : > { %17809 = vmatpush1.msk.msra.mxu1 %vm462_vm1, %v4678_v25  ;;  %17779 = vmatprep.subr.msk.mxu0 %vm462_vm1, %v3191_v51  ;;  %v21677_v49 = vpop.permute.xlu0 %4641  ;;  %v4695_v25 = vsel %vm4671_vm4, %v21421_v34, %v21459_v2 }
 0x182   : > { %17816 = vmatprep.subr.msk.mxu1 %vm462_vm1, %v4683_v15  ;;  %7639 = vrot.lane.b32.xlu0 %v7609_v32, %s20407_s26  ;;  %v4673_v32 = vsel %vm4671_vm4, %v21441_v13, %v21244_v62  ;;  %v4672_v62 = vsel %vm4671_vm4, %v21465_v47, %v21441_v13  ;;  %v4677_v13 = vsel %vm4671_vm4, %v21527_v30, %v21296_v35 }
 0x183   : > { %3950 = vmatprep.mubr.f32.mxu0 %v20402_v0  ;;  %4918 = vmatprep.mubr.f32.mxu1 %v20402_v0  ;;  %v21687_v38 = vpop.permute.xlu1 %6134  ;;  %v4699_v35 = vsel %vm4671_vm4, %v21506_v50, %v21488_v60 }
 0x184   : > { %17766 = vmatmul.mubr.msk.f32.gmra.mrb[18].mxu0 %vm455_vm2, %v21322_v29  ;;  %17803 = vmatmul.mubr.msk.f32.gmra.mrb[2].mxu1 %vm455_vm2, %v21675_v3 }
 0x185   : > { %4098 = vmatprep.mubr.f32.mxu0 %v20402_v0  ;;  %5066 = vmatprep.mubr.f32.mxu1 %v20402_v0  ;;  %v21695_v45 = vpop.permute.xlu0 %6138 }
 0x186   : > { %7655 = vrot.lane.b32.xlu0 %v7613_v6, %s20407_s26  ;;  %7663 = vrot.lane.b32.xlu1 %v7615_v63, %s20407_s26  ;;  %v10490_v6 = vld [vmem:[%s20542_s15 + $0x1c] sm:$0x77]  ;;  %v4690_v63 = vsel %vm4671_vm4, %v21433_v19, %v21373_v27 }
 0x187   : > { %v21702_v37 = vpop.permute.xlu1 %6144  ;;  %v10525_v47 = vcombine.high %v10490_v6, %v10490_v6 }
 0x188   : > { %17773 = vmatmul.mubr.msk.f32.vlgmr.msra.gmra.mrb[20].mxu0 %vm455_vm2, %v21289_v7  ;;  %17810 = vmatmul.mubr.msk.f32.vlgmr.msra.gmra.mrb[4].mxu1 %vm455_vm2, %v21642_v48 }
 0x189   : > { %17780 = vmatpush1.msk.msra.mxu0 %vm462_vm1, %v3190_v52  ;;  %17817 = vmatpush1.msk.msra.mxu1 %vm462_vm1, %v4682_v46  ;;  %v21719_v4 = vpop.permute.xlu0 %4649  ;;  %v4681_v46 = vsel %vm4671_vm4, %v21575_v43, %v21341_v10 }
 0x18a   : > { %17787 = vmatprep.subr.msk.mxu0 %vm462_vm1, %v3195_v9  ;;  %17824 = vmatprep.subr.msk.mxu1 %vm462_vm1, %v4687_v17  ;;  %v4676_v17 = vsel %vm4671_vm4, %v21227_v42, %v21527_v30  ;;  %v21848_v42 = vld [vmem:[%s20542_s15 + $0x24] sm:$0x77]  ;;  %v4702_v30 = vsel %vm4671_vm4, %v21550_v18, %v21535_v12  ;;  %v10492_v9 = vld [vmem:[%s20542_s15 + $0x2c] sm:$0x77]  ;;  %v21887_v12 = vld [vmem:[%s20542_s15 + $0x34] sm:$0x77] }
 0x18b   : > { %4104 = vmatprep.mubr.f32.mxu0 %v20402_v0  ;;  %5072 = vmatprep.mubr.f32.mxu1 %v20402_v0  ;;  %v21729_v11 = vpop.permute.xlu1 %6142 }
 0x18c   : > { %17774 = vmatmul.mubr.msk.f32.gmra.mrb[22].mxu0 %vm455_vm2, %v21322_v29  ;;  %17811 = vmatmul.mubr.msk.f32.gmra.mrb[6].mxu1 %vm455_vm2, %v21675_v3 }
 0x18d   : > { %4252 = vmatprep.mubr.f32.mxu0 %v20402_v0  ;;  %5220 = vmatprep.mubr.f32.mxu1 %v20402_v0  ;;  %v21737_v40 = vpop.permute.xlu0 %6146 }
 0x18e   : > { %7671 = vrot.lane.b32.xlu0 %v7617_v59, %s20407_s26  ;;  %7679 = vrot.lane.b32.xlu1 %v7619_v28, %s20407_s26  ;;  %v4698_v59 = vsel %vm4671_vm4, %v21512_v56, %v21506_v50  ;;  %v4680_v28 = vsel %vm4671_vm4, %v21268_v53, %v21575_v43  ;;  %v4685_v50 = vsel %vm4671_vm4, %v21616_v44, %v21386_v21 }
 0x18f   : > { %v21744_v36 = vpop.permute.xlu1 %6152  ;;  %v10527_v53 = vcombine.high %v10492_v9, %v10492_v9 }
 0x190   : > { %17781 = vmatmul.mubr.msk.f32.vlgmr.msra.gmra.mrb[24].mxu0 %vm455_vm2, %v21289_v7  ;;  %17818 = vmatmul.mubr.msk.f32.vlgmr.msra.gmra.mrb[8].mxu1 %vm455_vm2, %v21642_v48 }
 0x191   : > { %17788 = vmatpush1.msk.msra.mxu0 %vm462_vm1, %v3194_v24  ;;  %17825 = vmatpush1.msk.msra.mxu1 %vm462_vm1, %v4686_v23  ;;  %v21762_v33 = vpop.permute.xlu0 %4657  ;;  %v10494_v23 = vld [vmem:[%s20542_s15 + $0x3c] sm:$0x77]  ;;  %v4684_v24 = vsel %vm4671_vm4, %v21324_v26, %v21616_v44 }
 0x192   : > { %17796 = vmatprep.subr.msk.mxu0 %vm462_vm1, %v4673_v32  ;;  %17832 = vmatprep.subr.msk.mxu1 %vm462_vm1, %v4691_v14  ;;  %v4689_v32 = vsel %vm4671_vm4, %v21677_v49, %v21433_v19  ;;  %v6186_v19 = vsel %vm6178_vm5, %v21606_v57, %v21644_v8 }
 0x193   : > { %4258 = vmatprep.mubr.f32.mxu0 %v20402_v0  ;;  %5226 = vmatprep.mubr.f32.mxu1 %v20402_v0  ;;  %v21768_v31 = vpop.permute.xlu1 %6150 }
 0x194   : > { %17782 = vmatmul.mubr.msk.f32.gmra.mrb[26].mxu0 %vm455_vm2, %v21322_v29  ;;  %17819 = vmatmul.mubr.msk.f32.gmra.mrb[10].mxu1 %vm455_vm2, %v21675_v3 }
 0x195   : > { %4406 = vmatprep.mubr.f32.mxu0 %v20402_v0  ;;  %5374 = vmatprep.mubr.f32.mxu1 %v20402_v0  ;;  %v21782_v15 = vpop.permute.xlu0 %6154 }
 0x196   : > { %10545 = vrot.lane.b32.xlu1 %v21771_v20, %s20403_s16  ;;  %10543 = vrot.lane.b32.xlu0 %v10523_v39, %s20403_s16  ;;  %v10529_v39 = vcombine.high %v10494_v23, %v10494_v23 }
 0x197   : > { %v21790_v51 = vpop.permute.xlu1 %6160 }
 0x198   : > { %17789 = vmatmul.mubr.msk.f32.vlgmr.msra.gmra.mrb[28].mxu0 %vm455_vm2, %v21289_v7  ;;  %17826 = vmatmul.mubr.msk.f32.vlgmr.msra.gmra.mrb[12].mxu1 %vm455_vm2, %v21642_v48 }
 0x199   : > { %17797 = vmatpush1.msk.msra.mxu0 %vm462_vm1, %v4672_v62  ;;  %17833 = vmatpush1.msk.msra.mxu1 %vm462_vm1, %v4690_v63  ;;  %v21815_v27 = vpop.permute.xlu0 %4665  ;;  %v6181_v62 = vsel %vm6178_vm5, %v21582_v1, %v21557_v16 }
 0x19a   : > { %17804 = vmatprep.subr.msk.mxu0 %vm462_vm1, %v4677_v13  ;;  %17840 = vmatprep.subr.msk.mxu1 %vm462_vm1, %v4695_v25  ;;  %v4688_v25 = vsel %vm4671_vm4, %v21366_v58, %v21677_v49  ;;  %v21958_v58 = vld [vmem:[%s23617_s1 + $0x40] sm:$0xff]  ;;  %v6185_v49 = vsel %vm6178_vm5, %v21626_v61, %v21606_v57  ;;  %v10496_v13 = vld [vmem:[%s20542_s15 + $0x4c] sm:$0x77] }
 0x19b   : > { %4412 = vmatprep.mubr.f32.mxu0 %v20402_v0  ;;  %5380 = vmatprep.mubr.f32.mxu1 %v20402_v0  ;;  %v21809_v7 = vpop.permute.xlu1 %6158  ;;  %v21977_v57 = vld [vmem:[%s20542_s15 + $0x44] sm:$0x77] }
 0x19c   : > { %17790 = vmatmul.mubr.msk.f32.gmra.mrb[30].mxu0 %vm455_vm2, %v21322_v29  ;;  %17827 = vmatmul.mubr.msk.f32.gmra.mrb[14].mxu1 %vm455_vm2, %v21675_v3  ;;  %v4694_v29 = vsel %vm4671_vm4, %v21480_v41, %v21421_v34 }
 0x19d   : > { %4835 = vmatprep.mubr.f32.mxu0 %v20402_v0  ;;  %5528 = vmatprep.mubr.f32.mxu1 %v20402_v0  ;;  %v21841_v52 = vpop.permute.xlu0 %6162 }
 0x19e   : > { %10551 = vrot.lane.b32.xlu1 %v10525_v47, %s20403_s16  ;;  %10541 = vrot.lane.b32.xlu0 %v10488_v54, %s20403_s16  ;;  %v6182_v54 = vsel %vm6178_vm5, %v21557_v16, %v21594_v22  ;;  %v4693_v16 = vsel %vm4671_vm4, %v21719_v4, %v21480_v41  ;;  %v6190_v41 = vsel %vm6178_vm5, %v21658_v55, %v21695_v45  ;;  %v21985_v47 = vld [vmem:[%s23617_s1 + $0x48] sm:$0xff] }
 0x19f   : > { %v21839_v34 = vpop.permute.xlu1 %6114 }
 0x1a0   : > { %17798 = vmatmul.mubr.msk.f32.vlgmr.msra.gmra.mrb[0].mxu0 %vm455_vm2, %v21642_v48  ;;  %17834 = vmatmul.mubr.msk.f32.vlgmr.msra.gmra.mrb[16].mxu1 %vm455_vm2, %v21642_v48 }
 0x1a1   : > { %17805 = vmatpush1.msk.msra.mxu0 %vm462_vm1, %v4676_v17  ;;  %17841 = vmatpush1.msk.msra.mxu1 %vm462_vm1, %v4694_v29  ;;  %v21871_v14 = vpop.permute.xlu0 %6116  ;;  %v10531_v29 = vcombine.high %v10496_v13, %v10496_v13  ;;  %v4692_v17 = vsel %vm4671_vm4, %v21412_v5, %v21719_v4  ;;  %v6189_v5 = vsel %vm6178_vm5, %v21687_v38, %v21658_v55 }
 0x1a2   : > { %17812 = vmatprep.subr.msk.mxu0 %vm462_vm1, %v4681_v46  ;;  %17848 = vmatprep.subr.msk.mxu1 %vm462_vm1, %v4699_v35  ;;  %v6194_v4 = vsel %vm6178_vm5, %v21702_v37, %v21737_v40 }
 0x1a3   : > { %4841 = vmatprep.mubr.f32.mxu0 %v20402_v0  ;;  %5534 = vmatprep.mubr.f32.mxu1 %v20402_v0  ;;  %v21859_v10 = vpop.permute.xlu1 %6170 }
 0x1a4   : > { %17799 = vmatmul.mubr.msk.f32.gmra.mrb[2].mxu0 %vm455_vm2, %v21675_v3  ;;  %17835 = vmatmul.mubr.msk.f32.gmra.mrb[18].mxu1 %vm455_vm2, %v21675_v3 }
 0x1a5   : > { %4989 = vmatprep.mubr.f32.mxu0 %v20402_v0  ;;  %5682 = vmatprep.mubr.f32.mxu1 %v20402_v0  ;;  %v21897_v43 = vpop.permute.xlu0 %6168 }
 0x1a6   : > { %10549 = vrot.lane.b32.xlu1 %v10490_v6, %s20403_s16  ;;  %10553 = vrot.lane.b32.xlu0 %v21848_v42, %s20403_s16 }
 0x1a7   : > { %v21893_v21 = vpop.permute.xlu1 %6124 }
 0x1a8   : > { %17806 = vmatmul.mubr.msk.f32.vlgmr.msra.gmra.mrb[4].mxu0 %vm455_vm2, %v21642_v48  ;;  %17842 = vmatmul.mubr.msk.f32.vlgmr.msra.gmra.mrb[20].mxu1 %vm455_vm2, %v21642_v48 }
 0x1a9   : > { %17813 = vmatpush1.msk.msra.mxu0 %vm462_vm1, %v4680_v28  ;;  %17849 = vmatpush1.msk.msra.mxu1 %vm462_vm1, %v4698_v59  ;;  %v21924_v44 = vpop.permute.xlu0 %6166  ;;  %v4697_v59 = vsel %vm4671_vm4, %v21762_v33, %v21512_v56 }
 0x1aa   : > { %17820 = vmatprep.subr.msk.mxu0 %vm462_vm1, %v4685_v50  ;;  %18563 = vmatprep.subr.msk.mxu1 %vm462_vm1, %v4702_v30  ;;  %v4696_v50 = vsel %vm4671_vm4, %v21459_v2, %v21762_v33  ;;  %v6193_v2 = vsel %vm6178_vm5, %v21729_v11, %v21702_v37  ;;  %v22073_v37 = vld [vmem:[%s20542_s15 + $0x74] sm:$0x77] }
 0x1ab   : > { %4995 = vmatprep.mubr.f32.mxu0 %v20402_v0  ;;  %5688 = vmatprep.mubr.f32.mxu1 %v20402_v0  ;;  %v21920_v26 = vpop.permute.xlu1 %6176 }
 0x1ac   : > { %17807 = vmatmul.mubr.msk.f32.gmra.mrb[6].mxu0 %vm455_vm2, %v21675_v3  ;;  %17843 = vmatmul.mubr.msk.f32.gmra.mrb[22].mxu1 %vm455_vm2, %v21675_v3 }
 0x1ad   : > { %5143 = vmatprep.mubr.f32.mxu0 %v20402_v0  ;;  %5836 = vmatprep.mubr.f32.mxu1 %v20402_v0  ;;  %v21963_v63 = vpop.permute.xlu0 %6174 }
 0x1ae   : > { %10561 = vrot.lane.b32.xlu1 %v21887_v12, %s20403_s16  ;;  %10559 = vrot.lane.b32.xlu0 %v10527_v53, %s20403_s16  ;;  %v22045_v53 = vld [vmem:[%s20542_s15 + $0x64] sm:$0x77] }
 0x1af   : > { %v21948_v6 = vpop.permute.xlu1 %7629 }
 0x1b0   : > { %17814 = vmatmul.mubr.msk.f32.vlgmr.msra.gmra.mrb[8].mxu0 %vm455_vm2, %v21642_v48  ;;  %17850 = vmatmul.mubr.msk.f32.vlgmr.msra.gmra.mrb[24].mxu1 %vm455_vm2, %v21642_v48 }
 0x1b1   : > { %17821 = vmatpush1.msk.msra.mxu0 %vm462_vm1, %v4684_v24  ;;  %18564 = vmatpush3.msk.msra.mxu1 %vm462_vm1, %v4702_v30  ;;  %v21997_v46 = vpop.permute.xlu0 %7627  ;;  %v22004_v30 = vld [vmem:[%s20542_s15 + $0x54] sm:$0x77]  ;;  %v6198_v24 = vsel %vm6178_vm5, %v21744_v36, %v21782_v15 }
 0x1b2   : > { %17828 = vmatprep.subr.msk.mxu0 %vm462_vm1, %v4689_v32  ;;  %17865 = vmatprep.subr.msk.mxu1 %vm462_vm1, %v6182_v54  ;;  %v10500_v54 = vld [vmem:[%s20542_s15 + $0x6c] sm:$0x77] }
 0x1b3   : > { %5149 = vmatprep.mubr.f32.mxu0 %v20402_v0  ;;  %5842 = vmatprep.mubr.f32.mxu1 %v20402_v0  ;;  %v21989_v35 = vpop.permute.xlu1 %7625 }
 0x1b4   : > { %17815 = vmatmul.mubr.msk.f32.gmra.mrb[10].mxu0 %vm455_vm2, %v21675_v3  ;;  %17851 = vmatmul.mubr.msk.f32.gmra.mrb[26].mxu1 %vm455_vm2, %v21675_v3 }
 0x1b5   : > { %5297 = vmatprep.mubr.f32.mxu0 %v20402_v0  ;;  %18565 = vmatprep.mubr.msk.f32.mxu1 %vm455_vm2, %v21642_v48  ;;  %v22031_v28 = vpop.permute.xlu0 %6132 }
 0x1b6   : > { %10567 = vrot.lane.b32.xlu1 %v10529_v39, %s20403_s16  ;;  %10557 = vrot.lane.b32.xlu0 %v10492_v9, %s20403_s16  ;;  %v10498_v9 = vld [vmem:[%s20542_s15 + $0x5c] sm:$0x77]  ;;  %v10487_v39 = vld [vmem:[%s20542_s15 + $0x4] sm:$0x77] }
 0x1b7   : > { %v10533_v56 = vcombine.high %v10498_v9, %v10498_v9 }
 0x1b8   : > { %17822 = vmatmul.mubr.msk.f32.vlgmr.msra.gmra.mrb[12].mxu0 %vm455_vm2, %v21642_v48  ;;  %18566 = vmatmul.mubr.msk.f32.vlgmr.msra.gmra.mrb[28].mxu1 %vm455_vm2, %v21675_v3  ;;  %v22027_v55 = vpop.permute.xlu1 %7637 }
 0x1b9   : > { %17829 = vmatpush1.msk.msra.mxu0 %vm462_vm1, %v4688_v25  ;;  %17866 = vmatpush1.msk.msra.mxu1 %vm462_vm1, %v6181_v62  ;;  %v22066_v32 = vpop.permute.xlu0 %7635  ;;  %v4700_v62 = vsel %vm4671_vm4, %v21488_v60, %v21815_v27  ;;  %v6197_v60 = vsel %vm6178_vm5, %v21768_v31, %v21744_v36  ;;  %v11990_v36 = vld [vmem:[%s20542_s15 + $0xc] sm:$0x77] }
 0x1ba   : > { %17836 = vmatprep.subr.msk.mxu0 %vm462_vm1, %v4693_v16  ;;  %17873 = vmatprep.subr.msk.mxu1 %vm462_vm1, %v6186_v19  ;;  %v10522_v19 = vcombine.high %v10487_v39, %v10487_v39  ;;  %v6180_v16 = vsel %vm6178_vm5, %v21871_v14, %v21582_v1  ;;  %v10502_v1 = vld [vmem:[%s20542_s15 + $0x7c] sm:$0x7] }
 0x1bb   : > { %5303 = vmatprep.mubr.f32.mxu0 %v20402_v0  ;;  %6419 = vmatprep.mubr.f32.mxu1 %v20402_v0 }
 0x1bc   : > { %17823 = vmatmul.mubr.msk.f32.gmra.mrb[14].mxu0 %vm455_vm2, %v21675_v3  ;;  %17867 = vmatmul.mubr.msk.f32.vlgmr.msra.gmra.mrb[0].mxu1 %vm455_vm2, %v21958_v58  ;;  %v22058_v33 = vpop.permute.xlu1 %7633 }
 0x1bd   : > { %17874 = vmatpush1.msk.msra.mxu1 %vm462_vm1, %v6185_v49  ;;  %5451 = vmatprep.mubr.f32.mxu0 %v20402_v0  ;;  %v6202_v49 = vsel %vm6178_vm5, %v21790_v51, %v21841_v52 }
 0x1be   : > { %17881 = vmatprep.subr.msk.mxu1 %vm462_vm1, %v6190_v41  ;;  %6425 = vmatprep.mubr.f32.mxu1 %v20402_v0  ;;  %v6179_v41 = vsel %vm6178_vm5, %v21839_v34, %v21871_v14  ;;  %v22133_v34 = vld [vmem:[%s20542_s15 + $0x14] sm:$0x77]  ;;  %v6184_v14 = vsel %vm6178_vm5, %v21893_v21, %v21626_v61  ;;  %v11992_v61 = vld [vmem:[%s20542_s15 + $0x1c] sm:$0x77] }
 0x1bf   : > { %10565 = vrot.lane.b32.xlu1 %v10494_v23, %s20403_s16  ;;  %10569 = vrot.lane.b32.xlu0 %v21977_v57, %s20403_s16  ;;  %v4701_v23 = vsel %vm4671_vm4, %v21815_v27, %v21550_v18  ;;  %v10535_v18 = vcombine.high %v10500_v54, %v10500_v54  ;;  %v22100_v27 = vpop.permute.xlu0 %6140 }
 0x1c0   : > { %17830 = vmatmul.mubr.msk.f32.vlgmr.msra.gmra.mrb[16].mxu0 %vm455_vm2, %v21642_v48  ;;  %17868 = vmatmul.mubr.msk.f32.gmra.mrb[2].mxu1 %vm455_vm2, %v21985_v47 }
 0x1c1   : > { %17837 = vmatpush1.msk.msra.mxu0 %vm462_vm1, %v4692_v17  ;;  %5457 = vmatprep.mubr.f32.mxu0 %v20402_v0  ;;  %v22090_v25 = vpop.permute.xlu1 %7645 }
 0x1c2   : > { %17844 = vmatprep.subr.msk.mxu0 %vm462_vm1, %v4697_v59  ;;  %6573 = vmatprep.mubr.f32.mxu1 %v20402_v0  ;;  %v6206_v59 = vsel %vm6178_vm5, %v21897_v43, %v21859_v10 }
 0x1c3   : > { %10577 = vrot.lane.b32.xlu1 %v22004_v30, %s20403_s16  ;;  %10575 = vrot.lane.b32.xlu0 %v10531_v29, %s20403_s16  ;;  %v12025_v29 = vcombine.high %v11990_v36, %v11990_v36  ;;  %v22126_v17 = vpop.permute.xlu0 %7643 }
 0x1c4   : > { %17831 = vmatmul.mubr.msk.f32.gmra.mrb[18].mxu0 %vm455_vm2, %v21675_v3  ;;  %17875 = vmatmul.mubr.msk.f32.vlgmr.msra.gmra.mrb[4].mxu1 %vm455_vm2, %v21958_v58 }
 0x1c5   : > { %17882 = vmatpush1.msk.msra.mxu1 %vm462_vm1, %v6189_v5  ;;  %5605 = vmatprep.mubr.f32.mxu0 %v20402_v0  ;;  %v6183_v5 = vsel %vm6178_vm5, %v21594_v22, %v21893_v21  ;;  %v6205_v22 = vsel %vm6178_vm5, %v21924_v44, %v21897_v43  ;;  %v11994_v43 = vld [vmem:[%s20542_s15 + $0x2c] sm:$0x77] }
 0x1c6   : > { %17889 = vmatprep.subr.msk.mxu1 %vm462_vm1, %v6194_v4  ;;  %6579 = vmatprep.mubr.f32.mxu1 %v20402_v0  ;;  %v22176_v4 = vld [vmem:[%s20542_s15 + $0x24] sm:$0x77] }
 0x1c7   : > { %10583 = vrot.lane.b32.xlu1 %v10533_v56, %s20403_s16  ;;  %10573 = vrot.lane.b32.xlu0 %v10496_v13, %s20403_s16  ;;  %v22122_v13 = vpop.permute.xlu1 %7641  ;;  %v6188_v56 = vsel %vm6178_vm5, %v22031_v28, %v21687_v38 }
 0x1c8   : > { %17838 = vmatmul.mubr.msk.f32.vlgmr.msra.gmra.mrb[20].mxu0 %vm455_vm2, %v21642_v48  ;;  %17876 = vmatmul.mubr.msk.f32.gmra.mrb[6].mxu1 %vm455_vm2, %v21985_v47 }
 0x1c9   : > { %17845 = vmatpush1.msk.msra.mxu0 %vm462_vm1, %v4696_v50  ;;  %5611 = vmatprep.mubr.f32.mxu0 %v20402_v0  ;;  %v10526_v50 = vcombine.high %v21848_v42, %v21848_v42  ;;  %v12029_v42 = vcombine.high %v11994_v43, %v11994_v43 }
 0x1ca   : > { %17852 = vmatprep.subr.msk.mxu0 %vm462_vm1, %v4701_v23  ;;  %6727 = vmatprep.mubr.f32.mxu1 %v20402_v0  ;;  %v22219_v23 = vld [vmem:[%s20542_s15 + $0x34] sm:$0x77] }
 0x1cb   : > { %10581 = vrot.lane.b32.xlu1 %v10498_v9, %s20403_s16  ;;  %10585 = vrot.lane.b32.xlu0 %v22045_v53, %s20403_s16  ;;  %v6201_v9 = vsel %vm6178_vm5, %v21809_v7, %v21790_v51  ;;  %v22158_v51 = vpop.permute.xlu1 %7653 }
 0x1cc   : > { %17839 = vmatmul.mubr.msk.f32.gmra.mrb[22].mxu0 %vm455_vm2, %v21675_v3  ;;  %17883 = vmatmul.mubr.msk.f32.vlgmr.msra.gmra.mrb[8].mxu1 %vm455_vm2, %v21958_v58 }
 0x1cd   : > { %17890 = vmatpush1.msk.msra.mxu1 %vm462_vm1, %v6193_v2  ;;  %5759 = vmatprep.mubr.f32.mxu0 %v20402_v0  ;;  %v6192_v2 = vsel %vm6178_vm5, %v22100_v27, %v21729_v11  ;;  %v11996_v11 = vld [vmem:[%s20542_s15 + $0x3c] sm:$0x77] }
 0x1ce   : > { %17897 = vmatprep.subr.msk.mxu1 %vm462_vm1, %v6198_v24  ;;  %6733 = vmatprep.mubr.f32.mxu1 %v20402_v0 }
 0x1cf   : > { %10593 = vrot.lane.b32.xlu1 %v22073_v37, %s20403_s16  ;;  %10591 = vrot.lane.b32.xlu0 %v10535_v18, %s20403_s16  ;;  %v22188_v21 = vpop.permute.xlu1 %7649  ;;  %v7689_v18 = vsel %vm7685_vm6, %v21997_v46, %v21948_v6 }
 0x1d0   : > { %17846 = vmatmul.mubr.msk.f32.vlgmr.msra.gmra.mrb[24].mxu0 %vm455_vm2, %v21642_v48  ;;  %17884 = vmatmul.mubr.msk.f32.gmra.mrb[10].mxu1 %vm455_vm2, %v21985_v47 }
 0x1d1   : > { %17853 = vmatpush1.msk.msra.mxu0 %vm462_vm1, %v4700_v62  ;;  %5765 = vmatprep.mubr.f32.mxu0 %v20402_v0 }
 0x1d2   : > { %17861 = vmatprep.subr.msk.mxu0 %vm462_vm1, %v6180_v16  ;;  %6881 = vmatprep.mubr.f32.mxu1 %v20402_v0  ;;  %v22263_v16 = vld [vmem:[%s20542_s15 + $0x44] sm:$0x77] }
 0x1d3   : > { %10539 = vrot.lane.b32.xlu1 %v10522_v19, %s20403_s16  ;;  %10589 = vrot.lane.b32.xlu0 %v10500_v54, %s20403_s16  ;;  %v6209_v54 = vsel %vm6178_vm5, %v21963_v63, %v21920_v26  ;;  %v6187_v26 = vsel %vm6178_vm5, %v21644_v8, %v22031_v28  ;;  %v22224_v24 = vpop.permute.xlu1 %7661  ;;  %v10528_v28 = vcombine.high %v21887_v12, %v21887_v12 }
 0x1d4   : > { %17847 = vmatmul.mubr.msk.f32.gmra.mrb[26].mxu0 %vm455_vm2, %v21675_v3  ;;  %17891 = vmatmul.mubr.msk.f32.vlgmr.msra.gmra.mrb[12].mxu1 %vm455_vm2, %v21958_v58  ;;  %v6191_v19 = vsel %vm6178_vm5, %v21695_v45, %v22100_v27  ;;  %v10530_v45 = vcombine.high %v21977_v57, %v21977_v57  ;;  %v7693_v27 = vsel %vm7685_vm6, %v22066_v32, %v22027_v55 }
 0x1d5   : > { %17898 = vmatpush1.msk.msra.mxu1 %vm462_vm1, %v6197_v60  ;;  %5913 = vmatprep.mubr.f32.mxu0 %v20402_v0 }
 0x1d6   : > { %17905 = vmatprep.subr.msk.mxu1 %vm462_vm1, %v6202_v49  ;;  %6887 = vmatprep.mubr.f32.mxu1 %v20402_v0  ;;  %v22295_v49 = vld [vmem:[%s23617_s1 + $0x50] sm:$0xff] }
 0x1d7   : > { %10537 = vrot.lane.b32.xlu1 %v10487_v39, %s20403_s16  ;;  %10597 = vrot.lane.b32.xlu0 %v10502_v1, %s20403_s16  ;;  %v22249_v12 = vpop.permute.xlu1 %7657  ;;  %v12031_v39 = vcombine.high %v11996_v11, %v11996_v11 }
 0x1d8   : > { %17854 = vmatmul.mubr.msk.f32.vlgmr.msra.gmra.mrb[28].mxu0 %vm455_vm2, %v21642_v48  ;;  %17892 = vmatmul.mubr.msk.f32.gmra.mrb[14].mxu1 %vm455_vm2, %v21985_v47  ;;  %v10524_v48 = vcombine.high %v21771_v20, %v21771_v20  ;;  %v22162_v20 = vpop.permute.xlu0 %6148 }
 0x1d9   : > { %17862 = vmatpush1.msk.msra.mxu0 %vm462_vm1, %v6179_v41  ;;  %5919 = vmatprep.mubr.f32.mxu0 %v20402_v0  ;;  %v6196_v60 = vsel %vm6178_vm5, %v22162_v20, %v21768_v31  ;;  %v7688_v31 = vsel %vm7685_vm6, %v21989_v35, %v21997_v46  ;;  %v7692_v46 = vsel %vm7685_vm6, %v22058_v33, %v22066_v32 }
 0x1da   : > { %17869 = vmatprep.subr.msk.mxu0 %vm462_vm1, %v6184_v14  ;;  %7035 = vmatprep.mubr.f32.mxu1 %v20402_v0  ;;  %v6195_v41 = vsel %vm6178_vm5, %v21737_v40, %v22162_v20  ;;  %v10532_v14 = vcombine.high %v22004_v30, %v22004_v30  ;;  %v7696_v30 = vsel %vm7685_vm6, %v22122_v13, %v22126_v17 }
 0x1db   : > { %12047 = vrot.lane.b32.xlu1 %v22133_v34, %s20404_s17  ;;  %12045 = vrot.lane.b32.xlu0 %v12025_v29, %s20404_s17  ;;  %v22288_v57 = vpop.permute.xlu1 %7669  ;;  %v22322_v29 = vld [vmem:[%s23617_s1 + $0x58] sm:$0xff] }
 0x1dc   : > { %17855 = vmatmul.mubr.msk.f32.gmra.mrb[30].mxu0 %vm455_vm2, %v21675_v3  ;;  %17899 = vmatmul.mubr.msk.f32.vlgmr.msra.gmra.mrb[16].mxu1 %vm455_vm2, %v21958_v58  ;;  %v12027_v3 = vcombine.high %v11992_v61, %v11992_v61  ;;  %v22198_v38 = vpop.permute.xlu0 %7651 }
 0x1dd   : > { %17906 = vmatpush1.msk.msra.mxu1 %vm462_vm1, %v6201_v9  ;;  %6342 = vmatprep.mubr.f32.mxu0 %v20402_v0  ;;  %v10534_v9 = vcombine.high %v22045_v53, %v22045_v53  ;;  %v7701_v53 = vsel %vm7685_vm6, %v22198_v38, %v22158_v51 }
 0x1de   : > { %17913 = vmatprep.subr.msk.mxu1 %vm462_vm1, %v6206_v59  ;;  %7041 = vmatprep.mubr.f32.mxu1 %v20402_v0  ;;  %v20408_v59 = vmov 0  }
 0x1df   : > { %10547 = vrot.lane.b32.xlu1 %v10524_v48, %s20403_s16  ;;  %12043 = vrot.lane.b32.xlu0 %v11990_v36, %s20404_s17  ;;  %v7697_v36 = vsel %vm7685_vm6, %v22126_v17, %v22090_v25  ;;  %v11989_v48 = vld [vmem:[%s20542_s15 + $0x4] sm:$0x77] }
 0x1e0   : > { %17863 = vmatmul.mubr.msk.f32.vlgmr.msra.gmra.mrb[0].mxu0 %vm455_vm2, %v21958_v58  ;;  %17900 = vmatmul.mubr.msk.f32.gmra.mrb[18].mxu1 %vm455_vm2, %v21985_v47  ;;  %v22228_v8 = vpop.permute.xlu0 %6156 }
 0x1e1   : > { %17870 = vmatpush1.msk.msra.mxu0 %vm462_vm1, %v6183_v5  ;;  %6348 = vmatprep.mubr.f32.mxu0 %v20402_v0  ;;  %v6200_v32 = vsel %vm6178_vm5, %v22228_v8, %v21809_v7  ;;  %v22332_v7 = vpop.permute.xlu1 %7665  ;;  %v10536_v5 = vcombine.high %v22073_v37, %v22073_v37 }
 0x1e2   : > { %17877 = vmatprep.subr.msk.mxu0 %vm462_vm1, %v6188_v56  ;;  %7189 = vmatprep.mubr.f32.mxu1 %v20402_v0 }
 0x1e3   : > { %12055 = vrot.lane.b32.xlu1 %v22176_v4, %s20404_s17  ;;  %12053 = vrot.lane.b32.xlu0 %v12027_v3, %s20404_s17 }
 0x1e4   : > { %17864 = vmatmul.mubr.msk.f32.gmra.mrb[2].mxu0 %vm455_vm2, %v21985_v47  ;;  %17907 = vmatmul.mubr.msk.f32.vlgmr.msra.gmra.mrb[20].mxu1 %vm455_vm2, %v21958_v58  ;;  %v22256_v62 = vpop.permute.xlu0 %7659 }
 0x1e5   : > { %17914 = vmatpush1.msk.msra.mxu1 %vm462_vm1, %v6205_v22  ;;  %6496 = vmatprep.mubr.f32.mxu0 %v20402_v0  ;;  %v22360_v3 = vpop.permute.xlu1 %7677  ;;  %v7705_v56 = vsel %vm7685_vm6, %v22256_v62, %v22224_v24 }
 0x1e6   : > { %18568 = vmatprep.subr.msk.mxu1 %vm462_vm1, %v6209_v54  ;;  %7195 = vmatprep.mubr.f32.mxu1 %v20402_v0 }
 0x1e7   : > { %10555 = vrot.lane.b32.xlu1 %v10526_v50, %s20403_s16  ;;  %12051 = vrot.lane.b32.xlu0 %v11992_v61, %s20404_s17  ;;  %v6199_v61 = vsel %vm6178_vm5, %v21782_v15, %v22228_v8  ;;  %v12024_v15 = vcombine.high %v11989_v48, %v11989_v48  ;;  %v12028_v8 = vcombine.high %v22176_v4, %v22176_v4 }
 0x1e8   : > { %17871 = vmatmul.mubr.msk.f32.vlgmr.msra.gmra.mrb[4].mxu0 %vm455_vm2, %v21958_v58  ;;  %17908 = vmatmul.mubr.msk.f32.gmra.mrb[22].mxu1 %vm455_vm2, %v21985_v47  ;;  %v6165_v1 = vpop.permute.xlu0 %6164 }
 0x1e9   : > { %17878 = vmatpush1.msk.msra.mxu0 %vm462_vm1, %v6187_v26  ;;  %6502 = vmatprep.mubr.f32.mxu0 %v20402_v0  ;;  %v6204_v17 = vsel %vm6178_vm5, %v6165_v1, %v21924_v44  ;;  %v7700_v44 = vsel %vm7685_vm6, %v22188_v21, %v22198_v38  ;;  %v22386_v22 = vpop.permute.xlu1 %7673  ;;  %v6203_v50 = vsel %vm6178_vm5, %v21841_v52, %v6165_v1  ;;  %v22506_v1 = vld [vmem:[%s20542_s15 + $0x54] sm:$0x77] }
 0x1ea   : > { %17885 = vmatprep.subr.msk.mxu0 %vm462_vm1, %v6192_v2  ;;  %7343 = vmatprep.mubr.f32.mxu1 %v20402_v0  ;;  %v12026_v38 = vcombine.high %v22133_v34, %v22133_v34  ;;  %v7704_v34 = vsel %vm7685_vm6, %v22249_v12, %v22256_v62 }
 0x1eb   : > { %12063 = vrot.lane.b32.xlu1 %v22219_v23, %s20404_s17  ;;  %12061 = vrot.lane.b32.xlu0 %v12029_v42, %s20404_s17 }
 0x1ec   : > { %17872 = vmatmul.mubr.msk.f32.gmra.mrb[6].mxu0 %vm455_vm2, %v21985_v47  ;;  %17915 = vmatmul.mubr.msk.f32.vlgmr.msra.gmra.mrb[24].mxu1 %vm455_vm2, %v21958_v58  ;;  %v22324_v40 = vpop.permute.xlu0 %7667 }
 0x1ed   : > { %18569 = vmatpush3.msk.msra.mxu1 %vm462_vm1, %v6209_v54  ;;  %6650 = vmatprep.mubr.f32.mxu0 %v20402_v0 }
 0x1ee   : > { %17930 = vmatprep.subr.msk.mxu1 %vm462_vm1, %v7689_v18  ;;  %7349 = vmatprep.mubr.f32.mxu1 %v20402_v0 }
 0x1ef   : > { %10563 = vrot.lane.b32.xlu1 %v10528_v28, %s20403_s16  ;;  %12059 = vrot.lane.b32.xlu0 %v11994_v43, %s20404_s17  ;;  %v7709_v43 = vsel %vm7685_vm6, %v22324_v40, %v22288_v57 }
 0x1f0   : > { %17879 = vmatmul.mubr.msk.f32.vlgmr.msra.gmra.mrb[8].mxu0 %vm455_vm2, %v21958_v58  ;;  %17916 = vmatmul.mubr.msk.f32.gmra.mrb[26].mxu1 %vm455_vm2, %v21985_v47  ;;  %v6173_v20 = vpop.permute.xlu0 %6172 }
 0x1f1   : > { %17886 = vmatpush1.msk.msra.mxu0 %vm462_vm1, %v6191_v19  ;;  %6656 = vmatprep.mubr.f32.mxu0 %v20402_v0  ;;  %v6208_v54 = vsel %vm6178_vm5, %v6173_v20, %v21963_v63  ;;  %v22408_v63 = vpop.permute.xlu1 %7681  ;;  %v6207_v42 = vsel %vm6178_vm5, %v21859_v10, %v6173_v20  ;;  %v12030_v10 = vcombine.high %v22219_v23, %v22219_v23 }
 0x1f2   : > { %17893 = vmatprep.subr.msk.mxu0 %vm462_vm1, %v6196_v60  ;;  %18570 = vmatprep.mubr.msk.f32.mxu1 %vm455_vm2, %v21958_v58  ;;  %v12032_v19 = vcombine.high %v22263_v16, %v22263_v16 }
 0x1f3   : > { %12069 = vrot.lane.b32.xlu0 %v12031_v39, %s20404_s17  ;;  %12071 = vrot.lane.b32.xlu1 %v22263_v16, %s20404_s17 }
 0x1f4   : > { %17880 = vmatmul.mubr.msk.f32.gmra.mrb[10].mxu0 %vm455_vm2, %v21985_v47  ;;  %18571 = vmatmul.mubr.msk.f32.vlgmr.msra.gmra.mrb[28].mxu1 %vm455_vm2, %v21985_v47  ;;  %v22379_v37 = vpop.permute.xlu0 %7675 }
 0x1f5   : > { %17931 = vmatpush1.msk.msra.mxu1 %vm462_vm1, %v7688_v31  ;;  %6804 = vmatprep.mubr.f32.mxu0 %v20402_v0  ;;  %v7632_v28 = vpop.permute.xlu1 %7631  ;;  %v7713_v23 = vsel %vm7685_vm6, %v22379_v37, %v22360_v3 }
 0x1f6   : > { %17938 = vmatprep.subr.msk.mxu1 %vm462_vm1, %v7693_v27  ;;  %7926 = vmatprep.mubr.f32.mxu1 %v20402_v0  ;;  %v7691_v39 = vsel %vm7685_vm6, %v7632_v28, %v22058_v33  ;;  %v7712_v33 = vsel %vm7685_vm6, %v22386_v22, %v22379_v37  ;;  %v22593_v37 = vld [vmem:[%s23617_s1 + $0x68] sm:$0xff] }
 0x1f7   : > { %12067 = vrot.lane.b32.xlu0 %v11996_v11, %s20404_s17  ;;  %10571 = vrot.lane.b32.xlu1 %v10530_v45, %s20403_s16  ;;  %v7690_v45 = vsel %vm7685_vm6, %v21948_v6, %v7632_v28 }
 0x1f8   : > { %17887 = vmatmul.mubr.msk.f32.vlgmr.msra.gmra.mrb[12].mxu0 %vm455_vm2, %v21958_v58  ;;  %17932 = vmatmul.mubr.msk.f32.vlgmr.msra.gmra.mrb[0].mxu1 %vm455_vm2, %v22295_v49  ;;  %v7624_v52 = vpop.permute.xlu0 %7623 }
 0x1f9   : > { %17894 = vmatpush1.msk.msra.mxu0 %vm462_vm1, %v6195_v41  ;;  %17939 = vmatpush1.msk.msra.mxu1 %vm462_vm1, %v7692_v46  ;;  %v7687_v26 = vsel %vm7685_vm6, %v7624_v52, %v21989_v35  ;;  %v7708_v35 = vsel %vm7685_vm6, %v22332_v7, %v22324_v40  ;;  %v22453_v18 = vpop.permute.xlu1 %7647 }
 0x1fa   : > { %17901 = vmatprep.subr.msk.mxu0 %vm462_vm1, %v6200_v32  ;;  %17946 = vmatprep.subr.msk.mxu1 %vm462_vm1, %v7697_v36  ;;  %v12000_v32 = vld [vmem:[%s20542_s15 + $0x5c] sm:$0x77] }
 0x1fb   : > { %6810 = vmatprep.mubr.f32.mxu0 %v20402_v0  ;;  %7932 = vmatprep.mubr.f32.mxu1 %v20402_v0 }
 0x1fc   : > { %17888 = vmatmul.mubr.msk.f32.gmra.mrb[14].mxu0 %vm455_vm2, %v21985_v47  ;;  %17933 = vmatmul.mubr.msk.f32.gmra.mrb[2].mxu1 %vm455_vm2, %v22322_v29  ;;  %v7622_v2 = vpop.permute.xlu0 %7621 }
 0x1fd   : > { %6958 = vmatprep.mubr.f32.mxu0 %v20402_v0  ;;  %8080 = vmatprep.mubr.f32.mxu1 %v20402_v0  ;;  %v7686_v4 = vsel %vm7685_vm6, %v7622_v2, %v7624_v52  ;;  %v22467_v62 = vpop.permute.xlu1 %7663  ;;  %v9084_v52 = vld [vmem:[%s20542_s15 + $0x3c] sm:$0x77] }
 0x1fe   : > { %10579 = vrot.lane.b32.xlu0 %v10532_v14, %s20403_s16  ;;  %10587 = vrot.lane.b32.xlu1 %v10534_v9, %s20403_s16  ;;  %v7699_v14 = vsel %vm7685_vm6, %v22453_v18, %v22188_v21  ;;  %v9080_v21 = vld [vmem:[%s20542_s15 + $0x1c] sm:$0x77]  ;;  %v7706_v2 = vsel %vm7685_vm6, %v22224_v24, %v22467_v62 }
 0x1ff   : > { %19723 = vset.pattern.permute.xlu1 %v20408_v59  ;;  %19724 = vset.pattern.permute.xlu0 %v20408_v59 }
 0x200   : > { %17895 = vmatmul.mubr.msk.f32.vlgmr.msra.gmra.mrb[16].mxu0 %vm455_vm2, %v21958_v58  ;;  %17940 = vmatmul.mubr.msk.f32.vlgmr.msra.gmra.mrb[4].mxu1 %vm455_vm2, %v22295_v49  ;;  %v7684_v11 = vpop.permute.xlu0 %7683 }
 0x201   : > { %17902 = vmatpush1.msk.msra.mxu0 %vm462_vm1, %v6199_v61  ;;  %17947 = vmatpush1.msk.msra.mxu1 %vm462_vm1, %v7696_v30  ;;  %v22485_v60 = vpop.permute.xlu1 %7679  ;;  %v12035_v30 = vcombine.high %v12000_v32, %v12000_v32  ;;  %v7698_v61 = vsel %vm7685_vm6, %v22090_v25, %v22453_v18  ;;  %v22574_v25 = vld [vmem:[%s23617_s1 + $0x60] sm:$0xff] }
 0x202   : > { %17909 = vmatprep.subr.msk.mxu0 %vm462_vm1, %v6204_v17  ;;  %17954 = vmatprep.subr.msk.mxu1 %vm462_vm1, %v7701_v53  ;;  %v22541_v53 = vld [vmem:[%s20542_s15 + $0x64] sm:$0x77]  ;;  %v9082_v17 = vld [vmem:[%s20542_s15 + $0x2c] sm:$0x77] }
 0x203   : > { %6964 = vmatprep.mubr.f32.mxu0 %v20402_v0  ;;  %8086 = vmatprep.mubr.f32.mxu1 %v20402_v0 }
 0x204   : > { %17896 = vmatmul.mubr.msk.f32.gmra.mrb[18].mxu0 %vm455_vm2, %v21985_v47  ;;  %17941 = vmatmul.mubr.msk.f32.gmra.mrb[6].mxu1 %vm455_vm2, %v22322_v29  ;;  %v7640_v16 = vpop.permute.xlu0 %7639 }
 0x205   : > { %7112 = vmatprep.mubr.f32.mxu0 %v20402_v0  ;;  %8234 = vmatprep.mubr.f32.mxu1 %v20402_v0  ;;  %v7695_v27 = vsel %vm7685_vm6, %v7640_v16, %v22122_v13  ;;  %v9078_v13 = vld [vmem:[%s20542_s15 + $0xc] sm:$0x77]  ;;  %v7694_v40 = vsel %vm7685_vm6, %v22027_v55, %v7640_v16 }
 0x206   : > { %10595 = vrot.lane.b32.xlu0 %v10536_v5, %s20403_s16  ;;  %12041 = vrot.lane.b32.xlu1 %v12024_v15, %s20404_s17  ;;  %v9113_v41 = vcombine.high %v9078_v13, %v9078_v13  ;;  %v9117_v15 = vcombine.high %v9082_v17, %v9082_v17 }
 0x208   : > { %17903 = vmatmul.mubr.msk.f32.vlgmr.msra.gmra.mrb[20].mxu0 %vm455_vm2, %v21958_v58  ;;  %17948 = vmatmul.mubr.msk.f32.vlgmr.msra.gmra.mrb[8].mxu1 %vm455_vm2, %v22295_v49  ;;  %v22497_v31 = vpop.permute.xlu0 %7655  ;;  %v22503_v46 = vpop.permute.xlu1 %10545 }
 0x209   : > { %17910 = vmatpush1.msk.msra.mxu0 %vm462_vm1, %v6203_v50  ;;  %17955 = vmatpush1.msk.msra.mxu1 %vm462_vm1, %v7700_v44  ;;  %v7703_v5 = vsel %vm7685_vm6, %v22497_v31, %v22249_v12  ;;  %v13491_v12 = vld [vmem:[%s23618_s2] sm:$0xff]  ;;  %v12002_v44 = vld [vmem:[%s20542_s15 + $0x6c] sm:$0x77] }
 0x20a   : > { %17917 = vmatprep.subr.msk.mxu0 %vm462_vm1, %v6208_v54  ;;  %17962 = vmatprep.subr.msk.mxu1 %vm462_vm1, %v7705_v56  ;;  %v12037_v54 = vcombine.high %v12002_v44, %v12002_v44 }
 0x20b   : > { %7118 = vmatprep.mubr.f32.mxu0 %v20402_v0  ;;  %8240 = vmatprep.mubr.f32.mxu1 %v20402_v0 }
 0x20c   : > { %17904 = vmatmul.mubr.msk.f32.gmra.mrb[22].mxu0 %vm455_vm2, %v21985_v47  ;;  %17949 = vmatmul.mubr.msk.f32.gmra.mrb[10].mxu1 %vm455_vm2, %v22322_v29  ;;  %v22515_v36 = vpop.permute.xlu0 %7671 }
 0x20d   : > { %7266 = vmatprep.mubr.f32.mxu0 %v20402_v0  ;;  %8388 = vmatprep.mubr.f32.mxu1 %v20402_v0  ;;  %v7711_v28 = vsel %vm7685_vm6, %v22515_v36, %v22386_v22  ;;  %v12036_v22 = vcombine.high %v22541_v53, %v22541_v53 }
 0x20e   : > { %12049 = vrot.lane.b32.xlu1 %v12026_v38, %s20404_s17  ;;  %12039 = vrot.lane.b32.xlu0 %v11989_v48, %s20404_s17  ;;  %v9115_v48 = vcombine.high %v9080_v21, %v9080_v21  ;;  %v7702_v38 = vsel %vm7685_vm6, %v22158_v51, %v22497_v31 }
 0x210   : > { %17911 = vmatmul.mubr.msk.f32.vlgmr.msra.gmra.mrb[24].mxu0 %vm455_vm2, %v21958_v58  ;;  %17956 = vmatmul.mubr.msk.f32.vlgmr.msra.gmra.mrb[12].mxu1 %vm455_vm2, %v22295_v49  ;;  %v22532_v9 = vpop.permute.xlu1 %10551  ;;  %v22536_v55 = vpop.permute.xlu0 %10543 }
 0x211   : > { %17918 = vmatpush1.msk.msra.mxu0 %vm462_vm1, %v6207_v42  ;;  %17963 = vmatpush1.msk.msra.mxu1 %vm462_vm1, %v7704_v34  ;;  %v13492_v34 = vld [vmem:[%s23618_s2 + $0x8] sm:$0xff]  ;;  %v9119_v42 = vcombine.high %v9084_v52, %v9084_v52 }
 0x212   : > { %17926 = vmatprep.subr.msk.mxu0 %vm462_vm1, %v7687_v26  ;;  %17970 = vmatprep.subr.msk.mxu1 %vm462_vm1, %v7709_v43  ;;  %v7707_v43 = vsel %vm7685_vm6, %v22467_v62, %v22332_v7  ;;  %v12003_v26 = vld [vmem:[%s20542_s15 + $0x74] sm:$0x77]  ;;  %v9088_v62 = vld [vmem:[%s20542_s15 + $0x5c] sm:$0x77] }
 0x213   : > { %7272 = vmatprep.mubr.f32.mxu0 %v20402_v0  ;;  %8394 = vmatprep.mubr.f32.mxu1 %v20402_v0 }
 0x214   : > { %17912 = vmatmul.mubr.msk.f32.gmra.mrb[26].mxu0 %vm455_vm2, %v21985_v47  ;;  %17957 = vmatmul.mubr.msk.f32.gmra.mrb[14].mxu1 %vm455_vm2, %v22322_v29  ;;  %v22563_v20 = vpop.permute.xlu0 %10541 }
 0x215   : > { %7420 = vmatprep.mubr.f32.mxu0 %v20402_v0  ;;  %8542 = vmatprep.mubr.f32.mxu1 %v20402_v0 }
 0x216   : > { %12057 = vrot.lane.b32.xlu0 %v12028_v8, %s20404_s17  ;;  %12065 = vrot.lane.b32.xlu1 %v12030_v10, %s20404_s17  ;;  %v9086_v8 = vld [vmem:[%s20542_s15 + $0x4c] sm:$0x77]  ;;  %v12004_v10 = vld [vmem:[%s20542_s15 + $0x7c] sm:$0x7] }
 0x218   : > { %17919 = vmatmul.mubr.msk.f32.vlgmr.msra.gmra.mrb[28].mxu0 %vm455_vm2, %v21958_v58  ;;  %17964 = vmatmul.mubr.msk.f32.vlgmr.msra.gmra.mrb[16].mxu1 %vm455_vm2, %v22295_v49  ;;  %v11998_v58 = vld [vmem:[%s20542_s15 + $0x4c] sm:$0x77]  ;;  %v22554_v59 = vpop.permute.xlu1 %10549  ;;  %v22598_v50 = vpop.permute.xlu0 %10553 }
 0x219   : > { %17927 = vmatpush1.msk.msra.mxu0 %vm462_vm1, %v7686_v4  ;;  %17971 = vmatpush1.msk.msra.mxu1 %vm462_vm1, %v7708_v35  ;;  %v12033_v6 = vcombine.high %v11998_v58, %v11998_v58  ;;  %v12034_v4 = vcombine.high %v22506_v1, %v22506_v1 }
 0x21a   : > { %17934 = vmatprep.subr.msk.mxu0 %vm462_vm1, %v7691_v39  ;;  %17978 = vmatprep.subr.msk.mxu1 %vm462_vm1, %v7713_v23  ;;  %v9121_v23 = vcombine.high %v9086_v8, %v9086_v8  ;;  %v7710_v39 = vsel %vm7685_vm6, %v22288_v57, %v22515_v36  ;;  %v9123_v57 = vcombine.high %v9088_v62, %v9088_v62 }
 0x21b   : > { %7426 = vmatprep.mubr.f32.mxu0 %v20402_v0  ;;  %8548 = vmatprep.mubr.f32.mxu1 %v20402_v0 }
 0x21c   : > { %17920 = vmatmul.mubr.msk.f32.gmra.mrb[30].mxu0 %vm455_vm2, %v21985_v47  ;;  %17965 = vmatmul.mubr.msk.f32.gmra.mrb[18].mxu1 %vm455_vm2, %v22322_v29  ;;  %v7716_v47 = vsel %vm7685_vm6, %v22408_v63, %v7684_v11  ;;  %v12038_v11 = vcombine.high %v12003_v26, %v12003_v26 }
 0x21d   : > { %7849 = vmatprep.mubr.f32.mxu0 %v20402_v0  ;;  %8696 = vmatprep.mubr.f32.mxu1 %v20402_v0 }
 0x21e   : > { %12075 = vrot.lane.b32.xlu1 %v11998_v58, %s20404_s17  ;;  %12073 = vrot.lane.b32.xlu0 %v12032_v19, %s20404_s17  ;;  %v7715_v58 = vsel %vm7685_vm6, %v22485_v60, %v22408_v63 }
 0x220   : > { %17928 = vmatmul.mubr.msk.f32.vlgmr.msra.gmra.mrb[0].mxu0 %vm455_vm2, %v22295_v49  ;;  %17972 = vmatmul.mubr.msk.f32.vlgmr.msra.gmra.mrb[20].mxu1 %vm455_vm2, %v22295_v49  ;;  %v22595_v56 = vpop.permute.xlu1 %10561  ;;  %v22627_v7 = vpop.permute.xlu0 %10559 }
 0x221   : > { %17935 = vmatpush1.msk.msra.mxu0 %vm462_vm1, %v7690_v45  ;;  %17979 = vmatpush1.msk.msra.mxu1 %vm462_vm1, %v7712_v33  ;;  %v9077_v33 = vld [vmem:[%s20542_s15 + $0x4] sm:$0x77]  ;;  %v7714_v45 = vsel %vm7685_vm6, %v22360_v3, %v22485_v60  ;;  %v9079_v60 = vld [vmem:[%s20542_s15 + $0x14] sm:$0x77] }
 0x222   : > { %17942 = vmatprep.subr.msk.mxu0 %vm462_vm1, %v7695_v27  ;;  %18573 = vmatprep.subr.msk.mxu1 %vm462_vm1, %v7716_v47  ;;  %v9090_v27 = vld [vmem:[%s20542_s15 + $0x6c] sm:$0x77] }
 0x223   : > { %7855 = vmatprep.mubr.f32.mxu0 %v20402_v0  ;;  %8702 = vmatprep.mubr.f32.mxu1 %v20402_v0 }
 0x224   : > { %17929 = vmatmul.mubr.msk.f32.gmra.mrb[2].mxu0 %vm455_vm2, %v22322_v29  ;;  %17973 = vmatmul.mubr.msk.f32.gmra.mrb[22].mxu1 %vm455_vm2, %v22322_v29 }
 0x225   : > { %8003 = vmatprep.mubr.f32.mxu0 %v20402_v0  ;;  %8850 = vmatprep.mubr.f32.mxu1 %v20402_v0 }
 0x226   : > { %12079 = vrot.lane.b32.xlu1 %v22506_v1, %s20404_s17  ;;  %12077 = vrot.lane.b32.xlu0 %v12033_v6, %s20404_s17  ;;  %v9125_v6 = vcombine.high %v9090_v27, %v9090_v27  ;;  %v9114_v1 = vcombine.high %v9079_v60, %v9079_v60 }
 0x228   : > { %17936 = vmatmul.mubr.msk.f32.vlgmr.msra.gmra.mrb[4].mxu0 %vm455_vm2, %v22295_v49  ;;  %17980 = vmatmul.mubr.msk.f32.vlgmr.msra.gmra.mrb[24].mxu1 %vm455_vm2, %v22295_v49  ;;  %v22620_v51 = vpop.permute.xlu1 %10567  ;;  %v22653_v24 = vpop.permute.xlu0 %10557 }
 0x229   : > { %17943 = vmatpush1.msk.msra.mxu0 %vm462_vm1, %v7694_v40  ;;  %18574 = vmatpush3.msk.msra.mxu1 %vm462_vm1, %v7716_v47  ;;  %v9112_v47 = vcombine.high %v9077_v33, %v9077_v33 }
 0x22a   : > { %17950 = vmatprep.subr.msk.mxu0 %vm462_vm1, %v7699_v14  ;;  %8009 = vmatprep.mubr.f32.mxu0 %v20402_v0 }
 0x22b   : > { %8856 = vmatprep.mubr.f32.mxu1 %v20402_v0  ;;  %17995 = vmatprep.subr.msk.mxu1 %vm462_vm1, %v9113_v41  ;;  %v9081_v41 = vld [vmem:[%s20542_s15 + $0x24] sm:$0x77] }
 0x22c   : > { %17937 = vmatmul.mubr.msk.f32.gmra.mrb[6].mxu0 %vm455_vm2, %v22322_v29  ;;  %17981 = vmatmul.mubr.msk.f32.gmra.mrb[26].mxu1 %vm455_vm2, %v22322_v29  ;;  %v9116_v40 = vcombine.high %v9081_v41, %v9081_v41 }
 0x22d   : > { %8157 = vmatprep.mubr.f32.mxu0 %v20402_v0  ;;  %18575 = vmatprep.mubr.msk.f32.mxu1 %vm455_vm2, %v22295_v49 }
 0x22e   : > { %12087 = vrot.lane.b32.xlu1 %v22541_v53, %s20404_s17  ;;  %12085 = vrot.lane.b32.xlu0 %v12035_v30, %s20404_s17  ;;  %v9083_v30 = vld [vmem:[%s20542_s15 + $0x34] sm:$0x77] }
 0x230   : > { %17944 = vmatmul.mubr.msk.f32.vlgmr.msra.gmra.mrb[8].mxu0 %vm455_vm2, %v22295_v49  ;;  %18576 = vmatmul.mubr.msk.f32.vlgmr.msra.gmra.mrb[28].mxu1 %vm455_vm2, %v22322_v29 }
 0x231   : > { %17951 = vmatpush1.msk.msra.mxu0 %vm462_vm1, %v7698_v61  ;;  %8163 = vmatprep.mubr.f32.mxu0 %v20402_v0  ;;  %v22649_v35 = vpop.permute.xlu1 %10565  ;;  %v22679_v19 = vpop.permute.xlu0 %10569  ;;  %v10601_v61 = vsel %vm424_vm0, %v22563_v20, %v22536_v55 }
 0x232   : > { %17958 = vmatprep.subr.msk.mxu0 %vm462_vm1, %v7703_v5  ;;  %17996 = vmatpush1.msk.msra.mxu1 %vm462_vm1, %v9078_v13 }
 0x233   : > { %9336 = vmatprep.mubr.f32.mxu1 %v20402_v0  ;;  %18003 = vmatprep.subr.msk.mxu1 %vm462_vm1, %v9115_v48  ;;  %v9118_v48 = vcombine.high %v9083_v30, %v9083_v30 }
 0x234   : > { %17945 = vmatmul.mubr.msk.f32.gmra.mrb[10].mxu0 %vm455_vm2, %v22322_v29  ;;  %17997 = vmatmul.mubr.msk.f32.vlgmr.msra.gmra.mrb[0].mxu1 %vm455_vm2, %v22574_v25 }
 0x235   : > { %8311 = vmatprep.mubr.f32.mxu0 %v20402_v0  ;;  %9342 = vmatprep.mubr.f32.mxu1 %v20402_v0  ;;  %v22668_v18 = vpop.permute.xlu1 %10577  ;;  %v22700_v16 = vpop.permute.xlu0 %10575 }
 0x236   : > { %18004 = vmatpush1.msk.msra.mxu1 %vm462_vm1, %v9080_v21  ;;  %13495 = vperm.xlu1 %19723, %v13491_v12   ;;  %v9085_v12 = vld [vmem:[%s20542_s15 + $0x44] sm:$0x77] }
 0x237   : > { %18011 = vmatprep.subr.msk.mxu1 %vm462_vm1, %v9117_v15  ;;  %12083 = vrot.lane.b32.xlu0 %v12000_v32, %s20404_s17 }
 0x238   : > { %17952 = vmatmul.mubr.msk.f32.vlgmr.msra.gmra.mrb[12].mxu0 %vm455_vm2, %v22295_v49  ;;  %17998 = vmatmul.mubr.msk.f32.gmra.mrb[2].mxu1 %vm455_vm2, %v22593_v37 }
 0x239   : > { %17959 = vmatpush1.msk.msra.mxu0 %vm462_vm1, %v7702_v38  ;;  %8317 = vmatprep.mubr.f32.mxu0 %v20402_v0  ;;  %v22698_v63 = vpop.permute.xlu1 %10583  ;;  %v22722_v3 = vpop.permute.xlu0 %10573  ;;  %v10610_v38 = vsel %vm424_vm0, %v22627_v7, %v22595_v56 }
 0x23a   : > { %17966 = vmatprep.subr.msk.mxu0 %vm462_vm1, %v7707_v43  ;;  %9490 = vmatprep.mubr.f32.mxu1 %v20402_v0  ;;  %v9087_v43 = vld [vmem:[%s20542_s15 + $0x54] sm:$0x77] }
 0x23b   : > { %13500 = vperm.xlu0 %19724, %v13492_v34   ;;  %12093 = vrot.lane.b32.xlu1 %v12037_v54, %s20404_s17  ;;  %v9120_v54 = vcombine.high %v9085_v12, %v9085_v12 }
 0x23c   : > { %17953 = vmatmul.mubr.msk.f32.gmra.mrb[14].mxu0 %vm455_vm2, %v22322_v29  ;;  %18005 = vmatmul.mubr.msk.f32.vlgmr.msra.gmra.mrb[4].mxu1 %vm455_vm2, %v22574_v25 }
 0x23d   : > { %8465 = vmatprep.mubr.f32.mxu0 %v20402_v0  ;;  %9496 = vmatprep.mubr.f32.mxu1 %v20402_v0  ;;  %v22716_v31 = vpop.permute.xlu1 %10581  ;;  %v22737_v36 = vpop.permute.xlu0 %10585 }
 0x23e   : > { %18012 = vmatpush1.msk.msra.mxu1 %vm462_vm1, %v9082_v17  ;;  %v10606_v17 = vsel %vm424_vm0, %v22532_v9, %v22598_v50 }
 0x23f   : > { %18019 = vmatprep.subr.msk.mxu1 %vm462_vm1, %v9119_v42  ;;  %12095 = vrot.lane.b32.xlu1 %v12003_v26, %s20404_s17  ;;  %v10609_v42 = vsel %vm424_vm0, %v22653_v24, %v22627_v7  ;;  %v9089_v7 = vld [vmem:[%s20542_s15 + $0x64] sm:$0x77] }
 0x240   : > { %17960 = vmatmul.mubr.msk.f32.vlgmr.msra.gmra.mrb[16].mxu0 %vm455_vm2, %v22295_v49  ;;  %18006 = vmatmul.mubr.msk.f32.gmra.mrb[6].mxu1 %vm455_vm2, %v22593_v37 }
 0x241   : > { %17967 = vmatpush1.msk.msra.mxu0 %vm462_vm1, %v7706_v2  ;;  %8471 = vmatprep.mubr.f32.mxu0 %v20402_v0  ;;  %v22735_v13 = vpop.permute.xlu1 %10593  ;;  %v22753_v14 = vpop.permute.xlu0 %10591  ;;  %v9122_v2 = vcombine.high %v9087_v43, %v9087_v43 }
 0x242   : > { %17974 = vmatprep.subr.msk.mxu0 %vm462_vm1, %v7711_v28  ;;  %9644 = vmatprep.mubr.f32.mxu1 %v20402_v0 }
 0x243   : > { %12091 = vrot.lane.b32.xlu0 %v12002_v44, %s20404_s17  ;;  %12099 = vrot.lane.b32.xlu1 %v12004_v10, %s20404_s17  ;;  %v10605_v44 = vsel %vm424_vm0, %v22554_v59, %v22532_v9  ;;  %v22829_v9 = vld [vmem:[%s23617_s1 + $0x78] sm:$0xff] }
 0x244   : > { %17961 = vmatmul.mubr.msk.f32.gmra.mrb[18].mxu0 %vm455_vm2, %v22322_v29  ;;  %18013 = vmatmul.mubr.msk.f32.vlgmr.msra.gmra.mrb[8].mxu1 %vm455_vm2, %v22574_v25 }
 0x245   : > { %8619 = vmatprep.mubr.f32.mxu0 %v20402_v0  ;;  %9650 = vmatprep.mubr.f32.mxu1 %v20402_v0  ;;  %v22750_v32 = vpop.permute.xlu1 %10539  ;;  %v22775_v21 = vpop.permute.xlu0 %10589 }
 0x246   : > { %18020 = vmatpush1.msk.msra.mxu1 %vm462_vm1, %v9084_v52 }
 0x247   : > { %18027 = vmatprep.subr.msk.mxu1 %vm462_vm1, %v9121_v23  ;;  %12081 = vrot.lane.b32.xlu0 %v12034_v4, %s20404_s17  ;;  %v10613_v4 = vsel %vm424_vm0, %v22649_v35, %v22620_v51 }
 0x248   : > { %17968 = vmatmul.mubr.msk.f32.vlgmr.msra.gmra.mrb[20].mxu0 %vm455_vm2, %v22295_v49  ;;  %18014 = vmatmul.mubr.msk.f32.gmra.mrb[10].mxu1 %vm455_vm2, %v22593_v37 }
 0x249   : > { %17975 = vmatpush1.msk.msra.mxu0 %vm462_vm1, %v7710_v39  ;;  %8625 = vmatprep.mubr.f32.mxu0 %v20402_v0  ;;  %v22771_v53 = vpop.permute.xlu1 %10537  ;;  %v22796_v15 = vpop.permute.xlu0 %10597 }
 0x24a   : > { %17982 = vmatprep.subr.msk.mxu0 %vm462_vm1, %v7715_v58  ;;  %9798 = vmatprep.mubr.f32.mxu1 %v20402_v0  ;;  %v10617_v58 = vsel %vm424_vm0, %v22722_v3, %v22700_v16 }
 0x24b   : > { %12089 = vrot.lane.b32.xlu1 %v12036_v22, %s20404_s17  ;;  %12097 = vrot.lane.b32.xlu0 %v12038_v11, %s20404_s17  ;;  %v9124_v22 = vcombine.high %v9089_v7, %v9089_v7  ;;  %v10618_v11 = vsel %vm424_vm0, %v22700_v16, %v22668_v18  ;;  %v10621_v16 = vsel %vm424_vm0, %v22716_v31, %v22698_v63 }
 0x24c   : > { %17969 = vmatmul.mubr.msk.f32.gmra.mrb[22].mxu0 %vm455_vm2, %v22322_v29  ;;  %18021 = vmatmul.mubr.msk.f32.vlgmr.msra.gmra.mrb[12].mxu1 %vm455_vm2, %v22574_v25 }
 0x24d   : > { %8773 = vmatprep.mubr.f32.mxu0 %v20402_v0  ;;  %9804 = vmatprep.mubr.f32.mxu1 %v20402_v0  ;;  %v22793_v5 = vpop.permute.xlu1 %12047  ;;  %v22831_v34 = vpop.permute.xlu0 %12045 }
 0x24e   : > { %18028 = vmatpush1.msk.msra.mxu1 %vm462_vm1, %v9086_v8  ;;  %v10614_v8 = vsel %vm424_vm0, %v22620_v51, %v22679_v19 }
 0x24f   : > { %18035 = vmatprep.subr.msk.mxu1 %vm462_vm1, %v9123_v57 }
 0x250   : > { %17976 = vmatmul.mubr.msk.f32.vlgmr.msra.gmra.mrb[24].mxu0 %vm455_vm2, %v22295_v49  ;;  %18022 = vmatmul.mubr.msk.f32.gmra.mrb[14].mxu1 %vm455_vm2, %v22593_v37 }
 0x251   : > { %17983 = vmatpush1.msk.msra.mxu0 %vm462_vm1, %v7714_v45  ;;  %8779 = vmatprep.mubr.f32.mxu0 %v20402_v0  ;;  %v22822_v52 = vpop.permute.xlu1 %10547  ;;  %v22852_v10 = vpop.permute.xlu0 %12043 }
 0x252   : > { %9952 = vmatprep.mubr.f32.mxu1 %v20402_v0  ;;  %17991 = vmatprep.subr.msk.mxu0 %vm462_vm1, %v9112_v47 }
 0x254   : > { %17977 = vmatmul.mubr.msk.f32.gmra.mrb[26].mxu0 %vm455_vm2, %v22322_v29  ;;  %18029 = vmatmul.mubr.msk.f32.vlgmr.msra.gmra.mrb[16].mxu1 %vm455_vm2, %v22574_v25 }
 0x255   : > { %8927 = vmatprep.mubr.f32.mxu0 %v20402_v0  ;;  %9958 = vmatprep.mubr.f32.mxu1 %v20402_v0  ;;  %v22847_v26 = vpop.permute.xlu1 %12055  ;;  %v22876_v23 = vpop.permute.xlu0 %12053 }
 0x256   : > { %18036 = vmatpush1.msk.msra.mxu1 %vm462_vm1, %v9088_v62  ;;  %v9091_v62 = vld [vmem:[%s20542_s15 + $0x74] sm:$0x77] }
 0x257   : > { %18043 = vmatprep.subr.msk.mxu1 %vm462_vm1, %v9125_v6  ;;  %v9126_v57 = vcombine.high %v9091_v62, %v9091_v62  ;;  %v10626_v6 = vsel %vm424_vm0, %v22753_v14, %v22735_v13 }
 0x258   : > { %17984 = vmatmul.mubr.msk.f32.vlgmr.msra.gmra.mrb[28].mxu0 %vm455_vm2, %v22295_v49  ;;  %18030 = vmatmul.mubr.msk.f32.gmra.mrb[18].mxu1 %vm455_vm2, %v22593_v37  ;;  %v9092_v49 = vld [vmem:[%s20542_s15 + $0x7c] sm:$0x7] }
 0x259   : > { %8933 = vmatprep.mubr.f32.mxu0 %v20402_v0  ;;  %10106 = vmatprep.mubr.f32.mxu1 %v20402_v0  ;;  %v22869_v28 = vpop.permute.xlu1 %10555  ;;  %v22893_v39 = vpop.permute.xlu0 %12051 }
 0x25a   : > { %17992 = vmatpush1.msk.msra.mxu0 %vm462_vm1, %v9077_v33  ;;  %v10622_v33 = vsel %vm424_vm0, %v22698_v63, %v22737_v36 }
 0x25b   : > { %17999 = vmatprep.subr.msk.mxu0 %vm462_vm1, %v9114_v1  ;;  %v10600_v1 = vsel %vm424_vm0, %v22750_v32, %v22563_v20  ;;  %v10625_v20 = vsel %vm424_vm0, %v22775_v21, %v22753_v14  ;;  %v10603_v14 = vsel %vm424_vm0, %v22503_v46, %v22822_v52 }
 0x25c   : > { %17985 = vmatmul.mubr.msk.f32.gmra.mrb[30].mxu0 %vm455_vm2, %v22322_v29  ;;  %18037 = vmatmul.mubr.msk.f32.vlgmr.msra.gmra.mrb[20].mxu1 %vm455_vm2, %v22574_v25  ;;  %v10602_v29 = vsel %vm424_vm0, %v22536_v55, %v22503_v46  ;;  %v22808_v55 = vld [vmem:[%s23617_s1 + $0x70] sm:$0xff] }
 0x25d   : > { %9259 = vmatprep.mubr.f32.mxu0 %v20402_v0  ;;  %10112 = vmatprep.mubr.f32.mxu1 %v20402_v0  ;;  %v22889_v51 = vpop.permute.xlu1 %12063  ;;  %v22916_v45 = vpop.permute.xlu0 %12061 }
 0x25e   : > { %18044 = vmatpush1.msk.msra.mxu1 %vm462_vm1, %v9090_v27 }
 0x25f   : > { %18578 = vmatprep.subr.msk.mxu1 %vm462_vm1, %v9092_v49 }
 0x260   : > { %17993 = vmatmul.mubr.msk.f32.vlgmr.msra.gmra.mrb[0].mxu0 %vm455_vm2, %v22574_v25  ;;  %18038 = vmatmul.mubr.msk.f32.gmra.mrb[22].mxu1 %vm455_vm2, %v22593_v37 }
 0x261   : > { %9265 = vmatprep.mubr.f32.mxu0 %v20402_v0  ;;  %10260 = vmatprep.mubr.f32.mxu1 %v20402_v0  ;;  %v22912_v47 = vpop.permute.xlu1 %10563 }
 0x262   : > { %18000 = vmatpush1.msk.msra.mxu0 %vm462_vm1, %v9079_v60  ;;  %v22936_v60 = vpop.permute.xlu0 %12059 }
 0x263   : > { %18007 = vmatprep.subr.msk.mxu0 %vm462_vm1, %v9116_v40  ;;  %v10604_v40 = vsel %vm424_vm0, %v22822_v52, %v22554_v59  ;;  %v23074_v52 = vld [vmem:[%s23617_s1 + $0x88] sm:$0xff] }
 0x264   : > { %17994 = vmatmul.mubr.msk.f32.gmra.mrb[2].mxu0 %vm455_vm2, %v22593_v37  ;;  %18045 = vmatmul.mubr.msk.f32.vlgmr.msra.gmra.mrb[24].mxu1 %vm455_vm2, %v22574_v25 }
 0x265   : > { %9413 = vmatprep.mubr.f32.mxu0 %v20402_v0  ;;  %10266 = vmatprep.mubr.f32.mxu1 %v20402_v0  ;;  %v22931_v27 = vpop.permute.xlu1 %12071 }
 0x266   : > { %18579 = vmatpush3.msk.msra.mxu1 %vm462_vm1, %v9092_v49  ;;  %v10599_v49 = vsel %vm424_vm0, %v22771_v53, %v22750_v32  ;;  %v12104_v32 = vsel %vm3165_vm3, %v22831_v34, %v22793_v5 }
 0x267   : > { %18060 = vmatprep.subr.msk.mxu1 %vm462_vm1, %v10602_v29 }
 0x268   : > { %18001 = vmatmul.mubr.msk.f32.vlgmr.msra.gmra.mrb[4].mxu0 %vm455_vm2, %v22574_v25  ;;  %18046 = vmatmul.mubr.msk.f32.gmra.mrb[26].mxu1 %vm455_vm2, %v22593_v37 }
 0x269   : > { %9419 = vmatprep.mubr.f32.mxu0 %v20402_v0  ;;  %18580 = vmatprep.mubr.msk.f32.mxu1 %vm455_vm2, %v22574_v25  ;;  %v22955_v63 = vpop.permute.xlu1 %10571 }
 0x26a   : > { %18008 = vmatpush1.msk.msra.mxu0 %vm462_vm1, %v9081_v41  ;;  %v22965_v41 = vpop.permute.xlu0 %12069 }
 0x26b   : > { %18015 = vmatprep.subr.msk.mxu0 %vm462_vm1, %v9118_v48  ;;  %v12108_v48 = vsel %vm3165_vm3, %v22876_v23, %v22847_v26 }
 0x26c   : > { %18002 = vmatmul.mubr.msk.f32.gmra.mrb[6].mxu0 %vm455_vm2, %v22593_v37  ;;  %18581 = vmatmul.mubr.msk.f32.vlgmr.msra.gmra.mrb[28].mxu1 %vm455_vm2, %v22593_v37 }
 0x26d   : > { %9567 = vmatprep.mubr.f32.mxu0 %v20402_v0  ;;  %18061 = vmatpush1.msk.msra.mxu1 %vm462_vm1, %v10601_v61 }
 0x26e   : > { %10838 = vmatprep.mubr.f32.mxu1 %v20402_v0  ;;  %18068 = vmatprep.subr.msk.mxu1 %vm462_vm1, %v10606_v17  ;;  %v10607_v17 = vsel %vm424_vm0, %v22598_v50, %v22869_v28  ;;  %v12107_v50 = vsel %vm3165_vm3, %v22893_v39, %v22876_v23 }
 0x270   : > { %18009 = vmatmul.mubr.msk.f32.vlgmr.msra.gmra.mrb[8].mxu0 %vm455_vm2, %v22574_v25  ;;  %18062 = vmatmul.mubr.msk.f32.vlgmr.msra.gmra.mrb[0].mxu1 %vm455_vm2, %v22808_v55  ;;  %v22974_v29 = vpop.permute.xlu1 %10587 }
 0x271   : > { %9573 = vmatprep.mubr.f32.mxu0 %v20402_v0  ;;  %10844 = vmatprep.mubr.f32.mxu1 %v20402_v0 }
 0x272   : > { %18069 = vmatpush1.msk.msra.mxu1 %vm462_vm1, %v10605_v44  ;;  %18016 = vmatpush1.msk.msra.mxu0 %vm462_vm1, %v9083_v30  ;;  %v23049_v44 = vld [vmem:[%s23617_s1 + $0x80] sm:$0xff] }
 0x273   : > { %18023 = vmatprep.subr.msk.mxu0 %vm462_vm1, %v9120_v54  ;;  %18076 = vmatprep.subr.msk.mxu1 %vm462_vm1, %v10610_v38 }
 0x274   : > { %18010 = vmatmul.mubr.msk.f32.gmra.mrb[10].mxu0 %vm455_vm2, %v22593_v37  ;;  %18063 = vmatmul.mubr.msk.f32.gmra.mrb[2].mxu1 %vm455_vm2, %v22829_v9 }
 0x275   : > { %9721 = vmatprep.mubr.f32.mxu0 %v20402_v0  ;;  %10992 = vmatprep.mubr.f32.mxu1 %v20402_v0 }
 0x278   : > { %18017 = vmatmul.mubr.msk.f32.vlgmr.msra.gmra.mrb[12].mxu0 %vm455_vm2, %v22574_v25  ;;  %18070 = vmatmul.mubr.msk.f32.vlgmr.msra.gmra.mrb[4].mxu1 %vm455_vm2, %v22808_v55  ;;  %v22989_v59 = vpop.permute.xlu1 %12041 }
 0x279   : > { %9727 = vmatprep.mubr.f32.mxu0 %v20402_v0  ;;  %10998 = vmatprep.mubr.f32.mxu1 %v20402_v0 }
 0x27a   : > { %18024 = vmatpush1.msk.msra.mxu0 %vm462_vm1, %v9085_v12  ;;  %18077 = vmatpush1.msk.msra.mxu1 %vm462_vm1, %v10609_v42  ;;  %v10612_v12 = vsel %vm424_vm0, %v22912_v47, %v22649_v35  ;;  %v12112_v35 = vsel %vm3165_vm3, %v22916_v45, %v22889_v51  ;;  %v10616_v42 = vsel %vm424_vm0, %v22955_v63, %v22722_v3 }
 0x27b   : > { %18084 = vmatprep.subr.msk.mxu1 %vm462_vm1, %v10614_v8  ;;  %18031 = vmatprep.subr.msk.mxu0 %vm462_vm1, %v9122_v2  ;;  %v12116_v8 = vsel %vm3165_vm3, %v22965_v41, %v22931_v27 }
 0x27c   : > { %18018 = vmatmul.mubr.msk.f32.gmra.mrb[14].mxu0 %vm455_vm2, %v22593_v37  ;;  %18071 = vmatmul.mubr.msk.f32.gmra.mrb[6].mxu1 %vm455_vm2, %v22829_v9 }
 0x27d   : > { %9875 = vmatprep.mubr.f32.mxu0 %v20402_v0  ;;  %11146 = vmatprep.mubr.f32.mxu1 %v20402_v0 }
 0x280   : > { %18025 = vmatmul.mubr.msk.f32.vlgmr.msra.gmra.mrb[16].mxu0 %vm455_vm2, %v22574_v25  ;;  %18078 = vmatmul.mubr.msk.f32.vlgmr.msra.gmra.mrb[8].mxu1 %vm455_vm2, %v22808_v55  ;;  %v23013_v46 = vpop.permute.xlu1 %12049 }
 0x281   : > { %18085 = vmatpush1.msk.msra.mxu1 %vm462_vm1, %v10613_v4  ;;  %9881 = vmatprep.mubr.f32.mxu0 %v20402_v0 }
 0x282   : > { %11152 = vmatprep.mubr.f32.mxu1 %v20402_v0  ;;  %18032 = vmatpush1.msk.msra.mxu0 %vm462_vm1, %v9087_v43 }
 0x283   : > { %18092 = vmatprep.subr.msk.mxu1 %vm462_vm1, %v10618_v11  ;;  %18039 = vmatprep.subr.msk.mxu0 %vm462_vm1, %v9124_v22 }
 0x284   : > { %18026 = vmatmul.mubr.msk.f32.gmra.mrb[18].mxu0 %vm455_vm2, %v22593_v37  ;;  %18079 = vmatmul.mubr.msk.f32.gmra.mrb[10].mxu1 %vm455_vm2, %v22829_v9 }
 0x285   : > { %10029 = vmatprep.mubr.f32.mxu0 %v20402_v0  ;;  %11300 = vmatprep.mubr.f32.mxu1 %v20402_v0 }
 0x288   : > { %18033 = vmatmul.mubr.msk.f32.vlgmr.msra.gmra.mrb[20].mxu0 %vm455_vm2, %v22574_v25  ;;  %18086 = vmatmul.mubr.msk.f32.vlgmr.msra.gmra.mrb[12].mxu1 %vm455_vm2, %v22808_v55  ;;  %v23032_v61 = vpop.permute.xlu1 %12065 }
 0x289   : > { %10035 = vmatprep.mubr.f32.mxu0 %v20402_v0  ;;  %11306 = vmatprep.mubr.f32.mxu1 %v20402_v0 }
 0x28a   : > { %18093 = vmatpush1.msk.msra.mxu1 %vm462_vm1, %v10617_v58  ;;  %18040 = vmatpush1.msk.msra.mxu0 %vm462_vm1, %v9089_v7  ;;  %v10624_v58 = vsel %vm424_vm0, %v22974_v29, %v22775_v21 }
 0x28b   : > { %18100 = vmatprep.subr.msk.mxu1 %vm462_vm1, %v10622_v33  ;;  %18047 = vmatprep.subr.msk.mxu0 %vm462_vm1, %v9126_v57 }
 0x28c   : > { %18034 = vmatmul.mubr.msk.f32.gmra.mrb[22].mxu0 %vm455_vm2, %v22593_v37  ;;  %18087 = vmatmul.mubr.msk.f32.gmra.mrb[14].mxu1 %vm455_vm2, %v22829_v9 }
 0x28d   : > { %10183 = vmatprep.mubr.f32.mxu0 %v20402_v0  ;;  %11454 = vmatprep.mubr.f32.mxu1 %v20402_v0 }
 0x290   : > { %18041 = vmatmul.mubr.msk.f32.vlgmr.msra.gmra.mrb[24].mxu0 %vm455_vm2, %v22574_v25  ;;  %18094 = vmatmul.mubr.msk.f32.vlgmr.msra.gmra.mrb[16].mxu1 %vm455_vm2, %v22808_v55  ;;  %v23063_v38 = vpop.permute.xlu1 %12075 }
 0x291   : > { %18048 = vmatpush1.msk.msra.mxu0 %vm462_vm1, %v9091_v62  ;;  %18101 = vmatpush1.msk.msra.mxu1 %vm462_vm1, %v10621_v16 }
 0x292   : > { %18056 = vmatprep.subr.msk.mxu0 %vm462_vm1, %v10600_v1  ;;  %10189 = vmatprep.mubr.f32.mxu0 %v20402_v0 }
 0x293   : > { %11460 = vmatprep.mubr.f32.mxu1 %v20402_v0  ;;  %18108 = vmatprep.subr.msk.mxu1 %vm462_vm1, %v10626_v6 }
 0x294   : > { %18042 = vmatmul.mubr.msk.f32.gmra.mrb[26].mxu0 %vm455_vm2, %v22593_v37  ;;  %18095 = vmatmul.mubr.msk.f32.gmra.mrb[18].mxu1 %vm455_vm2, %v22829_v9 }
 0x295   : > { %10337 = vmatprep.mubr.f32.mxu0 %v20402_v0  ;;  %11608 = vmatprep.mubr.f32.mxu1 %v20402_v0 }
 0x298   : > { %18049 = vmatmul.mubr.msk.f32.vlgmr.msra.gmra.mrb[28].mxu0 %vm455_vm2, %v22574_v25  ;;  %18102 = vmatmul.mubr.msk.f32.vlgmr.msra.gmra.mrb[20].mxu1 %vm455_vm2, %v22808_v55  ;;  %v22983_v25 = vpop.permute.xlu0 %12067  ;;  %v23092_v2 = vpop.permute.xlu1 %12079 }
 0x299   : > { %18057 = vmatpush1.msk.msra.mxu0 %vm462_vm1, %v10599_v49  ;;  %18109 = vmatpush1.msk.msra.mxu1 %vm462_vm1, %v10625_v20  ;;  %v12115_v22 = vsel %vm3165_vm3, %v22983_v25, %v22965_v41  ;;  %v12102_v20 = vsel %vm3165_vm3, %v22989_v59, %v22852_v10  ;;  %v12106_v41 = vsel %vm3165_vm3, %v23013_v46, %v22893_v39 }
 0x29a   : > { %18064 = vmatprep.subr.msk.mxu0 %vm462_vm1, %v10604_v40  ;;  %10343 = vmatprep.mubr.f32.mxu0 %v20402_v0  ;;  %v12114_v39 = vsel %vm3165_vm3, %v23032_v61, %v22983_v25 }
 0x29b   : > { %11614 = vmatprep.mubr.f32.mxu1 %v20402_v0  ;;  %18583 = vmatprep.subr.msk.mxu1 %vm462_vm1, %v22796_v15 }
 0x29c   : > { %18050 = vmatmul.mubr.msk.f32.gmra.mrb[30].mxu0 %vm455_vm2, %v22593_v37  ;;  %18103 = vmatmul.mubr.msk.f32.gmra.mrb[22].mxu1 %vm455_vm2, %v22829_v9  ;;  %v10608_v37 = vsel %vm424_vm0, %v22869_v28, %v22653_v24  ;;  %v23009_v30 = vpop.permute.xlu0 %10579  ;;  %v12103_v24 = vsel %vm3165_vm3, %v22852_v10, %v22831_v34  ;;  %v10611_v34 = vsel %vm424_vm0, %v22595_v56, %v22912_v47 }
 0x29d   : > { %10761 = vmatprep.mubr.f32.mxu0 %v20402_v0  ;;  %11762 = vmatprep.mubr.f32.mxu1 %v20402_v0  ;;  %v12111_v56 = vsel %vm3165_vm3, %v22936_v60, %v22916_v45  ;;  %v10615_v28 = vsel %vm424_vm0, %v22679_v19, %v22955_v63  ;;  %v10620_v23 = vsel %vm424_vm0, %v23009_v30, %v22716_v31 }
 0x29e   : > { %v10619_v62 = vsel %vm424_vm0, %v22668_v18, %v23009_v30  ;;  %v10623_v47 = vsel %vm424_vm0, %v22737_v36, %v22974_v29 }
 0x2a0   : > { %18058 = vmatmul.mubr.msk.f32.vlgmr.msra.gmra.mrb[0].mxu0 %vm455_vm2, %v22808_v55  ;;  %18110 = vmatmul.mubr.msk.f32.vlgmr.msra.gmra.mrb[24].mxu1 %vm455_vm2, %v22808_v55  ;;  %v23027_v53 = vpop.permute.xlu0 %10595  ;;  %v23112_v7 = vpop.permute.xlu1 %12087 }
 0x2a1   : > { %18065 = vmatpush1.msk.msra.mxu0 %vm462_vm1, %v10603_v14  ;;  %18584 = vmatpush3.msk.msra.mxu1 %vm462_vm1, %v22796_v15  ;;  %v10628_v45 = vsel %vm424_vm0, %v23027_v53, %v22796_v15  ;;  %v10627_v1 = vsel %vm424_vm0, %v22735_v13, %v23027_v53 }
 0x2a2   : > { %18072 = vmatprep.subr.msk.mxu0 %vm462_vm1, %v10608_v37  ;;  %18125 = vmatprep.subr.msk.mxu1 %vm462_vm1, %v12104_v32 }
 0x2a3   : > { %10767 = vmatprep.mubr.f32.mxu0 %v20402_v0  ;;  %11768 = vmatprep.mubr.f32.mxu1 %v20402_v0 }
 0x2a4   : > { %18059 = vmatmul.mubr.msk.f32.gmra.mrb[2].mxu0 %vm455_vm2, %v22829_v9  ;;  %18111 = vmatmul.mubr.msk.f32.gmra.mrb[26].mxu1 %vm455_vm2, %v22829_v9  ;;  %v23054_v54 = vpop.permute.xlu0 %12039 }
 0x2a5   : > { %10915 = vmatprep.mubr.f32.mxu0 %v20402_v0  ;;  %18585 = vmatprep.mubr.msk.f32.mxu1 %vm455_vm2, %v22808_v55  ;;  %v12101_v10 = vsel %vm3165_vm3, %v23054_v54, %v22989_v59 }
 0x2a8   : > { %18066 = vmatmul.mubr.msk.f32.vlgmr.msra.gmra.mrb[4].mxu0 %vm455_vm2, %v22808_v55  ;;  %18586 = vmatmul.mubr.msk.f32.vlgmr.msra.gmra.mrb[28].mxu1 %vm455_vm2, %v22829_v9  ;;  %v23081_v43 = vpop.permute.xlu0 %12057 }
 0x2a9   : > { %18073 = vmatpush1.msk.msra.mxu0 %vm462_vm1, %v10607_v17  ;;  %18126 = vmatpush1.msk.msra.mxu1 %vm462_vm1, %v12103_v24  ;;  %v19862_v24 = vld [vmem:[#allocation2 + $0x4] ss:$124 sps:$4 sm:$0xff]  }
 0x2aa   : > { %18080 = vmatprep.subr.msk.mxu0 %vm462_vm1, %v10612_v12  ;;  %18133 = vmatprep.subr.msk.mxu1 %vm462_vm1, %v12108_v48 }
 0x2ab   : > { %10921 = vmatprep.mubr.f32.mxu0 %v20402_v0  ;;  %12340 = vmatprep.mubr.f32.mxu1 %v20402_v0 }
 0x2ac   : > { %18067 = vmatmul.mubr.msk.f32.gmra.mrb[6].mxu0 %vm455_vm2, %v22829_v9  ;;  %18127 = vmatmul.mubr.msk.f32.vlgmr.msra.gmra.mrb[0].mxu1 %vm455_vm2, %v23049_v44  ;;  %v23106_v3 = vpop.permute.xlu0 %12073 }
 0x2ad   : > { %18134 = vmatpush1.msk.msra.mxu1 %vm462_vm1, %v12107_v50  ;;  %11069 = vmatprep.mubr.f32.mxu0 %v20402_v0 }
 0x2ae   : > { %12346 = vmatprep.mubr.f32.mxu1 %v20402_v0  ;;  %18141 = vmatprep.subr.msk.mxu1 %vm462_vm1, %v12112_v35 }
 0x2b0   : > { %18074 = vmatmul.mubr.msk.f32.vlgmr.msra.gmra.mrb[8].mxu0 %vm455_vm2, %v22808_v55  ;;  %18128 = vmatmul.mubr.msk.f32.gmra.mrb[2].mxu1 %vm455_vm2, %v23074_v52  ;;  %v12078_v4 = vpop.permute.xlu0 %12077 }
 0x2b1   : > { %18081 = vmatpush1.msk.msra.mxu0 %vm462_vm1, %v10611_v34  ;;  %11075 = vmatprep.mubr.f32.mxu0 %v20402_v0  ;;  %v12120_v19 = vsel %vm3165_vm3, %v12078_v4, %v23092_v2  ;;  %v12119_v18 = vsel %vm3165_vm3, %v23063_v38, %v12078_v4 }
 0x2b2   : > { %18088 = vmatprep.subr.msk.mxu0 %vm462_vm1, %v10616_v42  ;;  %12494 = vmatprep.mubr.f32.mxu1 %v20402_v0 }
 0x2b4   : > { %18075 = vmatmul.mubr.msk.f32.gmra.mrb[10].mxu0 %vm455_vm2, %v22829_v9  ;;  %18135 = vmatmul.mubr.msk.f32.vlgmr.msra.gmra.mrb[4].mxu1 %vm455_vm2, %v23049_v44  ;;  %v12086_v11 = vpop.permute.xlu0 %12085 }
 0x2b5   : > { %18142 = vmatpush1.msk.msra.mxu1 %vm462_vm1, %v12111_v56  ;;  %11223 = vmatprep.mubr.f32.mxu0 %v20402_v0  ;;  %v23139_v31 = vpop.permute.xlu1 %13495  ;;  %v12124_v21 = vsel %vm3165_vm3, %v12086_v11, %v23112_v7 }
 0x2b6   : > { %12500 = vmatprep.mubr.f32.mxu1 %v20402_v0  ;;  %18149 = vmatprep.subr.msk.mxu1 %vm462_vm1, %v12116_v8 }
 0x2b8   : > { %18082 = vmatmul.mubr.msk.f32.vlgmr.msra.gmra.mrb[12].mxu0 %vm455_vm2, %v22808_v55  ;;  %18136 = vmatmul.mubr.msk.f32.gmra.mrb[6].mxu1 %vm455_vm2, %v23074_v52  ;;  %v23165_v33 = vpop.permute.xlu0 %12083 }
 0x2b9   : > { %18089 = vmatpush1.msk.msra.mxu0 %vm462_vm1, %v10615_v28  ;;  %11229 = vmatprep.mubr.f32.mxu0 %v20402_v0  ;;  %v12094_v57 = vpop.permute.xlu1 %12093  ;;  %v12123_v6 = vsel %vm3165_vm3, %v23165_v33, %v12086_v11 }
 0x2ba   : > { %18096 = vmatprep.subr.msk.mxu0 %vm462_vm1, %v10620_v23  ;;  %12648 = vmatprep.mubr.f32.mxu1 %v20402_v0 }
 0x2bc   : > { %18083 = vmatmul.mubr.msk.f32.gmra.mrb[14].mxu0 %vm455_vm2, %v22829_v9  ;;  %18143 = vmatmul.mubr.msk.f32.vlgmr.msra.gmra.mrb[8].mxu1 %vm455_vm2, %v23049_v44  ;;  %v23187_v36 = vpop.permute.xlu0 %13500 }
 0x2bd   : > { %18150 = vmatpush1.msk.msra.mxu1 %vm462_vm1, %v12115_v22  ;;  %11377 = vmatprep.mubr.f32.mxu0 %v20402_v0  ;;  %v23183_v16 = vpop.permute.xlu1 %12095 }
 0x2be   : > { %12654 = vmatprep.mubr.f32.mxu1 %v20402_v0  ;;  %18157 = vmatprep.subr.msk.mxu1 %vm462_vm1, %v12120_v19  ;;  %v12128_v15 = vsel %vm3165_vm3, %v12094_v57, %v23183_v16 }
 0x2c0   : > { %18090 = vmatmul.mubr.msk.f32.vlgmr.msra.gmra.mrb[16].mxu0 %vm455_vm2, %v22808_v55  ;;  %18144 = vmatmul.mubr.msk.f32.gmra.mrb[10].mxu1 %vm455_vm2, %v23074_v52  ;;  %v23208_v63 = vpop.permute.xlu0 %12091 }
 0x2c1   : > { %18097 = vmatpush1.msk.msra.mxu0 %vm462_vm1, %v10619_v62  ;;  %11383 = vmatprep.mubr.f32.mxu0 %v20402_v0  ;;  %v12127_v13 = vsel %vm3165_vm3, %v23208_v63, %v12094_v57  ;;  %v23223_v49 = vpop.permute.xlu1 %12099 }
 0x2c2   : > { %18104 = vmatprep.subr.msk.mxu0 %vm462_vm1, %v10624_v58  ;;  %12802 = vmatprep.mubr.f32.mxu1 %v20402_v0 }
 0x2c4   : > { %18091 = vmatmul.mubr.msk.f32.gmra.mrb[18].mxu0 %vm455_vm2, %v22829_v9  ;;  %18151 = vmatmul.mubr.msk.f32.vlgmr.msra.gmra.mrb[12].mxu1 %vm455_vm2, %v23049_v44  ;;  %v12082_v40 = vpop.permute.xlu0 %12081 }
 0x2c5   : > { %11531 = vmatprep.mubr.f32.mxu0 %v20402_v0  ;;  %12808 = vmatprep.mubr.f32.mxu1 %v20402_v0  ;;  %v12122_v29 = vsel %vm3165_vm3, %v12082_v40, %v23165_v33  ;;  %v12090_v25 = vpop.permute.xlu1 %12089  ;;  %v12121_v59 = vsel %vm3165_vm3, %v23092_v2, %v12082_v40 }
 0x2c6   : > { %18158 = vmatpush1.msk.msra.mxu1 %vm462_vm1, %v12119_v18  ;;  %v12125_v14 = vsel %vm3165_vm3, %v23112_v7, %v12090_v25 }
 0x2c7   : > { %18165 = vmatprep.subr.msk.mxu1 %vm462_vm1, %v12124_v21 }
 0x2c8   : > { %18098 = vmatmul.mubr.msk.f32.vlgmr.msra.gmra.mrb[20].mxu0 %vm455_vm2, %v22808_v55  ;;  %18152 = vmatmul.mubr.msk.f32.gmra.mrb[14].mxu1 %vm455_vm2, %v23074_v52  ;;  %v12098_v32 = vpop.permute.xlu0 %12097 }
 0x2c9   : > { %18105 = vmatpush1.msk.msra.mxu0 %vm462_vm1, %v10623_v47  ;;  %11537 = vmatprep.mubr.f32.mxu0 %v20402_v0  ;;  %v12130_v37 = vsel %vm3165_vm3, %v12098_v32, %v23223_v49  ;;  %v12129_v30 = vsel %vm3165_vm3, %v23183_v16, %v12098_v32 }
 0x2ca   : > { %18112 = vmatprep.subr.msk.mxu0 %vm462_vm1, %v10628_v45  ;;  %12956 = vmatprep.mubr.f32.mxu1 %v20402_v0 }
 0x2cc   : > { %18099 = vmatmul.mubr.msk.f32.gmra.mrb[22].mxu0 %vm455_vm2, %v22829_v9  ;;  %18159 = vmatmul.mubr.msk.f32.vlgmr.msra.gmra.mrb[16].mxu1 %vm455_vm2, %v23049_v44 }
 0x2cd   : > { %11685 = vmatprep.mubr.f32.mxu0 %v20402_v0  ;;  %12962 = vmatprep.mubr.f32.mxu1 %v20402_v0 }
 0x2ce   : > { %18166 = vmatpush1.msk.msra.mxu1 %vm462_vm1, %v12123_v6 }
 0x2cf   : > { %18173 = vmatprep.subr.msk.mxu1 %vm462_vm1, %v12128_v15 }
 0x2d0   : > { %18106 = vmatmul.mubr.msk.f32.vlgmr.msra.gmra.mrb[24].mxu0 %vm455_vm2, %v22808_v55  ;;  %18160 = vmatmul.mubr.msk.f32.gmra.mrb[18].mxu1 %vm455_vm2, %v23074_v52 }
 0x2d1   : > { %18113 = vmatpush1.msk.msra.mxu0 %vm462_vm1, %v10627_v1  ;;  %11691 = vmatprep.mubr.f32.mxu0 %v20402_v0 }
 0x2d2   : > { %18121 = vmatprep.subr.msk.mxu0 %vm462_vm1, %v12102_v20  ;;  %13110 = vmatprep.mubr.f32.mxu1 %v20402_v0 }
 0x2d4   : > { %18107 = vmatmul.mubr.msk.f32.gmra.mrb[26].mxu0 %vm455_vm2, %v22829_v9  ;;  %18167 = vmatmul.mubr.msk.f32.vlgmr.msra.gmra.mrb[20].mxu1 %vm455_vm2, %v23049_v44 }
 0x2d5   : > { %11839 = vmatprep.mubr.f32.mxu0 %v20402_v0  ;;  %13116 = vmatprep.mubr.f32.mxu1 %v20402_v0 }
 0x2d6   : > { %18174 = vmatpush1.msk.msra.mxu1 %vm462_vm1, %v12127_v13 }
 0x2d7   : > { %18588 = vmatprep.subr.msk.mxu1 %vm462_vm1, %v23223_v49 }
 0x2d8   : > { %18114 = vmatmul.mubr.msk.f32.vlgmr.msra.gmra.mrb[28].mxu0 %vm455_vm2, %v22808_v55  ;;  %18168 = vmatmul.mubr.msk.f32.gmra.mrb[22].mxu1 %vm455_vm2, %v23074_v52  ;;  %v12105_v55 = vsel %vm3165_vm3, %v22793_v5, %v23013_v46  ;;  %v12109_v5 = vsel %vm3165_vm3, %v22847_v26, %v23081_v43  ;;  %v12118_v26 = vsel %vm3165_vm3, %v23106_v3, %v23063_v38  ;;  %v19850_v46 = vld [vmem:[#allocation2 + $0x3c] ss:$124 sps:$4 sm:$0xff]  }
 0x2d9   : > { %18122 = vmatpush1.msk.msra.mxu0 %vm462_vm1, %v12101_v10  ;;  %11845 = vmatprep.mubr.f32.mxu0 %v20402_v0 }
 0x2da   : > { %18129 = vmatprep.subr.msk.mxu0 %vm462_vm1, %v12106_v41  ;;  %13264 = vmatprep.mubr.f32.mxu1 %v20402_v0 }
 0x2dc   : > { %18115 = vmatmul.mubr.msk.f32.gmra.mrb[30].mxu0 %vm455_vm2, %v22829_v9  ;;  %18175 = vmatmul.mubr.msk.f32.vlgmr.msra.gmra.mrb[24].mxu1 %vm455_vm2, %v23049_v44  ;;  %v12110_v9 = vsel %vm3165_vm3, %v23081_v43, %v22936_v60  ;;  %v12113_v60 = vsel %vm3165_vm3, %v22889_v51, %v23032_v61  ;;  %v12117_v51 = vsel %vm3165_vm3, %v22931_v27, %v23106_v3 }
 0x2dd   : > { %12263 = vmatprep.mubr.f32.mxu0 %v20402_v0  ;;  %13270 = vmatprep.mubr.f32.mxu1 %v20402_v0  ;;  %v12126_v27 = vsel %vm3165_vm3, %v12090_v25, %v23208_v63 }
 0x2de   : > { %18589 = vmatpush3.msk.msra.mxu1 %vm462_vm1, %v23223_v49 }
 0x2e0   : > { %18123 = vmatmul.mubr.msk.f32.vlgmr.msra.gmra.mrb[0].mxu0 %vm455_vm2, %v23049_v44  ;;  %18176 = vmatmul.mubr.msk.f32.gmra.mrb[26].mxu1 %vm455_vm2, %v23074_v52 }
 0x2e1   : > { %18130 = vmatpush1.msk.msra.mxu0 %vm462_vm1, %v12105_v55  ;;  %12269 = vmatprep.mubr.f32.mxu0 %v20402_v0 }
 0x2e2   : > { %18137 = vmatprep.subr.msk.mxu0 %vm462_vm1, %v12110_v9  ;;  %18590 = vmatprep.mubr.msk.f32.mxu1 %vm455_vm2, %v23049_v44 }
 0x2e4   : > { %18124 = vmatmul.mubr.msk.f32.gmra.mrb[2].mxu0 %vm455_vm2, %v23074_v52  ;;  %18591 = vmatmul.mubr.msk.f32.vlgmr.msra.gmra.mrb[28].mxu1 %vm455_vm2, %v23074_v52 }
 0x2e5   : > { %12417 = vmatprep.mubr.f32.mxu0 %v20402_v0  ;;  %16384 = vmatprep.mubr.bf16.mxu1 %v19850_v46 }
 0x2e8   : > { %18131 = vmatmul.mubr.msk.f32.vlgmr.msra.gmra.mrb[4].mxu0 %vm455_vm2, %v23049_v44 }
 0x2e9   : > { %18138 = vmatpush1.msk.msra.mxu0 %vm462_vm1, %v12109_v5  ;;  %12423 = vmatprep.mubr.f32.mxu0 %v20402_v0 }
 0x2ea   : > { %18145 = vmatprep.subr.msk.mxu0 %vm462_vm1, %v12114_v39 }
 0x2ec   : > { %18132 = vmatmul.mubr.msk.f32.gmra.mrb[6].mxu0 %vm455_vm2, %v23074_v52 }
 0x2ed   : > { %12571 = vmatprep.mubr.f32.mxu0 %v20402_v0 }
 0x2f0   : > { %18139 = vmatmul.mubr.msk.f32.vlgmr.msra.gmra.mrb[8].mxu0 %vm455_vm2, %v23049_v44 }
 0x2f1   : > { %18146 = vmatpush1.msk.msra.mxu0 %vm462_vm1, %v12113_v60  ;;  %12577 = vmatprep.mubr.f32.mxu0 %v20402_v0 }
 0x2f2   : > { %18153 = vmatprep.subr.msk.mxu0 %vm462_vm1, %v12118_v26 }
 0x2f4   : > { %18140 = vmatmul.mubr.msk.f32.gmra.mrb[10].mxu0 %vm455_vm2, %v23074_v52 }
 0x2f5   : > { %12725 = vmatprep.mubr.f32.mxu0 %v20402_v0 }
 0x2f8   : > { %18147 = vmatmul.mubr.msk.f32.vlgmr.msra.gmra.mrb[12].mxu0 %vm455_vm2, %v23049_v44 }
 0x2f9   : > { %18154 = vmatpush1.msk.msra.mxu0 %vm462_vm1, %v12117_v51  ;;  %12731 = vmatprep.mubr.f32.mxu0 %v20402_v0 }
 0x2fa   : > { %18161 = vmatprep.subr.msk.mxu0 %vm462_vm1, %v12122_v29 }
 0x2fc   : > { %18148 = vmatmul.mubr.msk.f32.gmra.mrb[14].mxu0 %vm455_vm2, %v23074_v52 }
 0x2fd   : > { %12879 = vmatprep.mubr.f32.mxu0 %v20402_v0 }
 0x300   : > { %18155 = vmatmul.mubr.msk.f32.vlgmr.msra.gmra.mrb[16].mxu0 %vm455_vm2, %v23049_v44 }
 0x301   : > { %12885 = vmatprep.mubr.f32.mxu0 %v20402_v0  ;;  %18162 = vmatpush1.msk.msra.mxu0 %vm462_vm1, %v12121_v59 }
 0x302   : > { %18169 = vmatprep.subr.msk.mxu0 %vm462_vm1, %v12126_v27 }
 0x304   : > { %18156 = vmatmul.mubr.msk.f32.gmra.mrb[18].mxu0 %vm455_vm2, %v23074_v52 }
 0x305   : > { %13033 = vmatprep.mubr.f32.mxu0 %v20402_v0 }
 0x308   : > { %18163 = vmatmul.mubr.msk.f32.vlgmr.msra.gmra.mrb[20].mxu0 %vm455_vm2, %v23049_v44 }
 0x309   : > { %13039 = vmatprep.mubr.f32.mxu0 %v20402_v0  ;;  %18170 = vmatpush1.msk.msra.mxu0 %vm462_vm1, %v12125_v14 }
 0x30a   : > { %18177 = vmatprep.subr.msk.mxu0 %vm462_vm1, %v12130_v37 }
 0x30c   : > { %18164 = vmatmul.mubr.msk.f32.gmra.mrb[22].mxu0 %vm455_vm2, %v23074_v52 }
 0x30d   : > { %13187 = vmatprep.mubr.f32.mxu0 %v20402_v0 }
 0x310   : > { %18171 = vmatmul.mubr.msk.f32.vlgmr.msra.gmra.mrb[24].mxu0 %vm455_vm2, %v23049_v44 }
 0x311   : > { %13193 = vmatprep.mubr.f32.mxu0 %v20402_v0  ;;  %18178 = vmatpush1.msk.msra.mxu0 %vm462_vm1, %v12129_v30 }
 0x314   : > { %18172 = vmatmul.mubr.msk.f32.gmra.mrb[26].mxu0 %vm455_vm2, %v23074_v52 }
 0x315   : > { %13341 = vmatprep.mubr.f32.mxu0 %v20402_v0 }
 0x318   : > { %18179 = vmatmul.mubr.msk.f32.vlgmr.msra.gmra.mrb[28].mxu0 %vm455_vm2, %v23049_v44 }
 0x319   : > { %13347 = vmatprep.mubr.f32.mxu0 %v20402_v0 }
 0x31c   : > { %18180 = vmatmul.mubr.msk.f32.gmra.mrb[30].mxu0 %vm455_vm2, %v23074_v52 }
 0x31d   : > { %15593 = vmatprep.mubr.bf16.mxu0 %v19862_v24 }
 0x37f   : > { %v12342_v53 = vpop.f32.mrb[0].mxu1 }
 0x380   : > { %v12344_v48 = vpop.f32.mrb[1].mxu1  ;;  %v13505_v61 = vadd.f32 %v23139_v31, %v12342_v53 }
 0x381   : > { %v13506_v17 = vadd.f32 %v23139_v31, %v12344_v48 }
 0x382   : > { %v13567_v0 = vmax.f32 %v13505_v61, 0.0 }
 0x383   : > { %v12348_v12 = vpop.f32.mrb[2].mxu1  ;;  %v13568_v38 = vmax.f32 %v13506_v17, 0.0 }
 0x384   : > { %v13536_v50 = vadd.f32 %v23187_v36, %v12348_v12  ;;  %v12350_v54 = vpop.f32.mrb[3].mxu1 }
 0x385   : > { %v13537_v44 = vadd.f32 %v23187_v36, %v12350_v54 }
 0x386   : > { %v13598_v35 = vmax.f32 %v13536_v50, 0.0 }
 0x387   : > { %v13599_v52 = vmax.f32 %v13537_v44, 0.0  ;;  %v12496_v34 = vpop.f32.mrb[4].mxu1  ;;  %v19848_v44 = vld [vmem:[#allocation2 + $0x38] ss:$124 sps:$4 sm:$0xff]  }
 0x388   : > { %v23355_v43 = vpack.c.bf16 %v13598_v35, %v13567_v0  ;;  %v12498_v42 = vpop.f32.mrb[5].mxu1  ;;  %v13509_v56 = vadd.f32 %v23139_v31, %v12496_v34 }
 0x389   : > { %v23357_v2 = vpack.c.bf16 %v13599_v52, %v13568_v38  ;;  %v13510_v8 = vadd.f32 %v23139_v31, %v12498_v42  ;;  %v19851_v38 = vld [vmem:[#allocation2 + $0x134] ss:$124 sps:$4 sm:$0xff]  }
 0x38a   : > { %v13571_v23 = vmax.f32 %v13509_v56, 0.0 }
 0x38b   : > { %v12502_v3 = vpop.f32.mrb[6].mxu1  ;;  %v13572_v19 = vmax.f32 %v13510_v8, 0.0 }
 0x38c   : > { %v13540_v7 = vadd.f32 %v23187_v36, %v12502_v3  ;;  %v12504_v28 = vpop.f32.mrb[7].mxu1 }
 0x38d   : > { %v13541_v4 = vadd.f32 %v23187_v36, %v12504_v28 }
 0x38e   : > { %v13602_v22 = vmax.f32 %v13540_v7, 0.0 }
 0x38f   : > { %v13603_v11 = vmax.f32 %v13541_v4, 0.0  ;;  %v12650_v62 = vpop.f32.mrb[8].mxu1 }
 0x390   : > { %v23363_v58 = vpack.c.bf16 %v13602_v22, %v13571_v23  ;;  %v12652_v18 = vpop.f32.mrb[9].mxu1  ;;  %v13513_v21 = vadd.f32 %v23139_v31, %v12650_v62 }
 0x391   : > { %v23365_v57 = vpack.c.bf16 %v13603_v11, %v13572_v19  ;;  %v13514_v33 = vadd.f32 %v23139_v31, %v12652_v18  ;;  %v19853_v11 = vld [vmem:[#allocation2 + $0x130] ss:$124 sps:$4 sm:$0xff]  }
 0x392   : > { %v13575_v15 = vmax.f32 %v13513_v21, 0.0  ;;  %v19854_v21 = vld [vmem:[#allocation2 + $0x22c] ss:$124 sps:$4 sm:$0xff]  }
 0x393   : > { %v12656_v47 = vpop.f32.mrb[10].mxu1  ;;  %v13576_v63 = vmax.f32 %v13514_v33, 0.0 }
 0x394   : > { %v13544_v45 = vadd.f32 %v23187_v36, %v12656_v47  ;;  %v12658_v16 = vpop.f32.mrb[11].mxu1 }
 0x395   : > { %v13545_v6 = vadd.f32 %v23187_v36, %v12658_v16 }
 0x396   : > { %v13606_v1 = vmax.f32 %v13544_v45, 0.0 }
 0x397   : > { %v13607_v20 = vmax.f32 %v13545_v6, 0.0  ;;  %v12804_v13 = vpop.f32.mrb[12].mxu1 }
 0x398   : > { %v23371_v49 = vpack.c.bf16 %v13606_v1, %v13575_v15  ;;  %v12806_v10 = vpop.f32.mrb[13].mxu1  ;;  %v13517_v55 = vadd.f32 %v23139_v31, %v12804_v13 }
 0x399   : > { %v23373_v41 = vpack.c.bf16 %v13607_v20, %v13576_v63  ;;  %v13518_v9 = vadd.f32 %v23139_v31, %v12806_v10 }
 0x39a   : > { %v13579_v40 = vmax.f32 %v13517_v55, 0.0 }
 0x39b   : > { %v12810_v5 = vpop.f32.mrb[14].mxu1  ;;  %v13580_v51 = vmax.f32 %v13518_v9, 0.0 }
 0x39c   : > { %v13548_v39 = vadd.f32 %v23187_v36, %v12810_v5  ;;  %v12812_v26 = vpop.f32.mrb[15].mxu1 }
 0x39d   : > { %v13549_v60 = vadd.f32 %v23187_v36, %v12812_v26 }
 0x39e   : > { %v13610_v29 = vmax.f32 %v13548_v39, 0.0 }
 0x39f   : > { %v13611_v25 = vmax.f32 %v13549_v60, 0.0  ;;  %v12958_v59 = vpop.f32.mrb[16].mxu1 }
 0x3a0   : > { %v13641_v27 = vpack.c.bf16 %v13610_v29, %v13579_v40  ;;  %v12960_v32 = vpop.f32.mrb[17].mxu1  ;;  %v13521_v37 = vadd.f32 %v23139_v31, %v12958_v59  ;;  %v19856_v40 = vld [vmem:[#allocation2 + $0x228] ss:$124 sps:$4 sm:$0xff]  }
 0x3a1   : > { %v13642_v14 = vpack.c.bf16 %v13611_v25, %v13580_v51  ;;  %v13522_v30 = vadd.f32 %v23139_v31, %v12960_v32  ;;  %v19857_v32 = vld [vmem:[#allocation2 + $0x324] ss:$124 sps:$4 sm:$0xff]  }
 0x3a2   : > { %v13583_v61 = vmax.f32 %v13521_v37, 0.0 }
 0x3a3   : > { %v12964_v46 = vpop.f32.mrb[18].mxu1  ;;  %16352 = vmatprep.subr.bf16.mxu1 %v13642_v14  ;;  %v13584_v12 = vmax.f32 %v13522_v30, 0.0 }
 0x3a4   : > { %v13552_v24 = vadd.f32 %v23187_v36, %v12964_v46  ;;  %v12966_v53 = vpop.f32.mrb[19].mxu1  ;;  %16353 = vmatpush1.bf16.xpose.msra.mxu1 %v13641_v27 }
 0x3a5   : > { %v13553_v48 = vadd.f32 %v23187_v36, %v12966_v53 }
 0x3a6   : > { %v13614_v17 = vmax.f32 %v13552_v24, 0.0 }
 0x3a7   : > { %v13615_v50 = vmax.f32 %v13553_v48, 0.0  ;;  %v13112_v54 = vpop.f32.mrb[20].mxu1 }
 0x3a8   : > { %v23383_v0 = vpack.c.bf16 %v13614_v17, %v13583_v61  ;;  %v13114_v35 = vpop.f32.mrb[21].mxu1  ;;  %v13525_v34 = vadd.f32 %v23139_v31, %v13112_v54 }
 0x3a9   : > { %v23385_v52 = vpack.c.bf16 %v13615_v50, %v13584_v12  ;;  %v13526_v42 = vadd.f32 %v23139_v31, %v13114_v35 }
 0x3aa   : > { %v13587_v28 = vmax.f32 %v13525_v34, 0.0 }
 0x3ab   : > { %v13118_v56 = vpop.f32.mrb[22].mxu1  ;;  %16385 = vmatmul.mubr.bf16.vlgmr.msra.gmra.mrb[32].mxu1 %v19848_v44  ;;  %v13588_v23 = vmax.f32 %v13526_v42, 0.0 }
 0x3ac   : > { %v13556_v8 = vadd.f32 %v23187_v36, %v13118_v56  ;;  %v13120_v3 = vpop.f32.mrb[23].mxu1  ;;  %16392 = vmatprep.mubr.bf16.mxu1 %v19851_v38  ;;  %v19859_v56 = vld [vmem:[#allocation2 + $0x320] ss:$124 sps:$4 sm:$0xff]  }
 0x3ad   : > { %v13557_v7 = vadd.f32 %v23187_v36, %v13120_v3 }
 0x3ae   : > { %v13618_v4 = vmax.f32 %v13556_v8, 0.0 }
 0x3af   : > { %v13619_v22 = vmax.f32 %v13557_v7, 0.0  ;;  %v13266_v19 = vpop.f32.mrb[24].mxu1  ;;  %v19863_v7 = vld [vmem:[#allocation2 + $0x41c] ss:$124 sps:$4 sm:$0xff]  }
 0x3b0   : > { %v23391_v62 = vpack.c.bf16 %v13618_v4, %v13587_v28  ;;  %v13268_v18 = vpop.f32.mrb[25].mxu1  ;;  %v13529_v47 = vadd.f32 %v23139_v31, %v13266_v19 }
 0x3b1   : > { %v23393_v33 = vpack.c.bf16 %v13619_v22, %v13588_v23  ;;  %v13530_v45 = vadd.f32 %v23139_v31, %v13268_v18  ;;  %v19860_v18 = vld [vmem:[#allocation2] ss:$124 sps:$4 sm:$0xff]  }
 0x3b2   : > { %v13591_v13 = vmax.f32 %v13529_v47, 0.0 }
 0x3b3   : > { %v12265_v16 = vpop.f32.mrb[0].mxu0  ;;  %v13272_v6 = vpop.f32.mrb[26].mxu1  ;;  %16393 = vmatmul.mubr.bf16.gmra.mrb[36].mxu1 %v19853_v11  ;;  %v13592_v9 = vmax.f32 %v13530_v45, 0.0  ;;  %v19866_v45 = vld [vmem:[#allocation2 + $0xfc] ss:$124 sps:$4 sm:$0xff]  }
 0x3b4   : > { %v13560_v15 = vadd.f32 %v23187_v36, %v13272_v6  ;;  %v12267_v1 = vpop.f32.mrb[1].mxu0  ;;  %v13274_v63 = vpop.f32.mrb[27].mxu1  ;;  %16400 = vmatprep.mubr.bf16.mxu1 %v19854_v21  ;;  %v13503_v10 = vadd.f32 %v23139_v31, %v12265_v16 }
 0x3b5   : > { %v13561_v20 = vadd.f32 %v23187_v36, %v13274_v63  ;;  %v13504_v5 = vadd.f32 %v23139_v31, %v12267_v1 }
 0x3b6   : > { %v13622_v55 = vmax.f32 %v13560_v15, 0.0  ;;  %v13565_v46 = vmax.f32 %v13503_v10, 0.0 }
 0x3b7   : > { %v13623_v39 = vmax.f32 %v13561_v20, 0.0  ;;  %v12271_v26 = vpop.f32.mrb[2].mxu0  ;;  %v18592_v60 = vpop.f32.mrb[28].mxu1  ;;  %v13566_v48 = vmax.f32 %v13504_v5, 0.0 }
 0x3b8   : > { %v23401_v29 = vpack.c.bf16 %v13622_v55, %v13591_v13  ;;  %v13534_v51 = vadd.f32 %v23187_v36, %v12271_v26  ;;  %v13564_v25 = vadd.f32 %v18592_v60, %v23187_v36  ;;  %v12273_v59 = vpop.f32.mrb[3].mxu0  ;;  %v13420_v27 = vpop.f32.mrb[29].mxu1  ;;  %v19869_v13 = vld [vmem:[#allocation2 + $0x514] ss:$124 sps:$4 sm:$0xff]  }
 0x3b9   : > { %v23405_v14 = vpack.c.bf16 %v13623_v39, %v13592_v9  ;;  %v13535_v37 = vadd.f32 %v23187_v36, %v12273_v59  ;;  %v13533_v30 = vadd.f32 %v23139_v31, %v13420_v27  ;;  %v19868_v60 = vld [vmem:[#allocation2 + $0xf8] ss:$124 sps:$4 sm:$0xff]  }
 0x3ba   : > { %v13596_v24 = vmax.f32 %v13534_v51, 0.0  ;;  %v13626_v53 = vmax.f32 %v13564_v25, 0.0  ;;  %v19872_v25 = vld [vmem:[#allocation2 + $0x1f4] ss:$124 sps:$4 sm:$0xff]  }
 0x3bb   : > { %v13597_v61 = vmax.f32 %v13535_v37, 0.0  ;;  %v13595_v17 = vmax.f32 %v13533_v30, 0.0  ;;  %v12419_v12 = vpop.f32.mrb[4].mxu0  ;;  %16401 = vmatmul.mubr.bf16.gmra.mrb[40].mxu1 %v19856_v40  ;;  %v19871_v37 = vld [vmem:[#allocation2 + $0x510] ss:$124 sps:$4 sm:$0xff]  }
 0x3bc   : > { %v13627_v50 = vpack.c.bf16 %v13596_v24, %v13565_v46  ;;  %v12421_v54 = vpop.f32.mrb[5].mxu0  ;;  %16408 = vmatprep.mubr.bf16.mxu1 %v19857_v32  ;;  %v13507_v38 = vadd.f32 %v23139_v31, %v12419_v12  ;;  %v19875_v24 = vld [vmem:[#allocation2 + $0x60c] ss:$124 sps:$4 sm:$0xff]  }
 0x3bd   : > { %v13628_v44 = vpack.c.bf16 %v13597_v61, %v13566_v48  ;;  %v23409_v35 = vpack.c.bf16 %v13626_v53, %v13595_v17  ;;  %v13508_v34 = vadd.f32 %v23139_v31, %v12421_v54  ;;  %v19874_v54 = vld [vmem:[#allocation2 + $0x1f0] ss:$124 sps:$4 sm:$0xff]  }
 0x3be   : > { %v13569_v4 = vmax.f32 %v13507_v38, 0.0 }
 0x3bf   : > { %v12425_v42 = vpop.f32.mrb[6].mxu0  ;;  %15561 = vmatprep.subr.bf16.mxu0 %v13628_v44  ;;  %v13570_v22 = vmax.f32 %v13508_v34, 0.0  ;;  %v19878_v34 = vld [vmem:[#allocation2 + $0x2ec] ss:$124 sps:$4 sm:$0xff]  }
 0x3c0   : > { %v13538_v8 = vadd.f32 %v23187_v36, %v12425_v42  ;;  %v12427_v3 = vpop.f32.mrb[7].mxu0  ;;  %15562 = vmatpush1.bf16.xpose.msra.mxu0 %v13627_v50 }
 0x3c1   : > { %v13539_v28 = vadd.f32 %v23187_v36, %v12427_v3  ;;  %15674 = vmatprep.subr.bf16.mxu0 %v23357_v2  ;;  %v19865_v2 = vld [vmem:[#allocation2 + $0x418] ss:$124 sps:$4 sm:$0xff]  }
 0x3c2   : > { %v13600_v23 = vmax.f32 %v13538_v8, 0.0 }
 0x3c3   : > { %v13601_v19 = vmax.f32 %v13539_v28, 0.0  ;;  %v12573_v11 = vpop.f32.mrb[8].mxu0  ;;  %16409 = vmatmul.mubr.bf16.gmra.mrb[44].mxu1 %v19859_v56 }
 0x3c4   : > { %v23416_v21 = vpack.c.bf16 %v13600_v23, %v13569_v4  ;;  %v12575_v47 = vpop.f32.mrb[9].mxu0  ;;  %16416 = vmatprep.mubr.bf16.mxu1 %v19863_v7  ;;  %v13511_v6 = vadd.f32 %v23139_v31, %v12573_v11  ;;  %v19877_v7 = vld [vmem:[#allocation2 + $0x608] ss:$124 sps:$4 sm:$0xff]  }
 0x3c5   : > { %v13632_v16 = vpack.c.bf16 %v13601_v19, %v13570_v22  ;;  %v13512_v15 = vadd.f32 %v23139_v31, %v12575_v47  ;;  %v19881_v23 = vld [vmem:[#allocation2 + $0x704] ss:$124 sps:$4 sm:$0xff]  }
 0x3c6   : > { %v13573_v55 = vmax.f32 %v13511_v6, 0.0 }
 0x3c7   : > { %v12579_v1 = vpop.f32.mrb[10].mxu0  ;;  %15594 = vmatmul.mubr.bf16.vlgmr.msra.gmra.mrb[32].mxu0 %v19860_v18  ;;  %v13574_v5 = vmax.f32 %v13512_v15, 0.0 }
 0x3c8   : > { %v13542_v63 = vadd.f32 %v23187_v36, %v12579_v1  ;;  %v12581_v20 = vpop.f32.mrb[11].mxu0  ;;  %15675 = vmatpush1.bf16.xpose.msra.mxu0 %v23355_v43  ;;  %15601 = vmatprep.mubr.bf16.mxu0 %v19866_v45  ;;  %v19884_v1 = vld [vmem:[#allocation2 + $0x3e4] ss:$124 sps:$4 sm:$0xff]  }
 0x3c9   : > { %v13543_v10 = vadd.f32 %v23187_v36, %v12581_v20  ;;  %15787 = vmatprep.subr.bf16.mxu0 %v13632_v16  ;;  %v19880_v16 = vld [vmem:[#allocation2 + $0x2e8] ss:$124 sps:$4 sm:$0xff]  }
 0x3ca   : > { %v13604_v9 = vmax.f32 %v13542_v63, 0.0 }
 0x3cb   : > { %v13605_v39 = vmax.f32 %v13543_v10, 0.0  ;;  %v12727_v26 = vpop.f32.mrb[12].mxu0  ;;  %16417 = vmatmul.mubr.bf16.gmra.mrb[48].mxu1 %v19865_v2  ;;  %v19883_v10 = vld [vmem:[#allocation2 + $0x700] ss:$124 sps:$4 sm:$0xff]  }
 0x3cc   : > { %v23423_v40 = vpack.c.bf16 %v13604_v9, %v13573_v55  ;;  %v12729_v51 = vpop.f32.mrb[13].mxu0  ;;  %16424 = vmatprep.mubr.bf16.mxu1 %v19869_v13  ;;  %v13515_v43 = vadd.f32 %v23139_v31, %v12727_v26 }
 0x3cd   : > { %v23425_v59 = vpack.c.bf16 %v13605_v39, %v13574_v5  ;;  %v13516_v27 = vadd.f32 %v23139_v31, %v12729_v51  ;;  %v19887_v5 = vld [vmem:[#allocation2 + $0x7fc] ss:$124 sps:$4 sm:$0xff]  }
 0x3ce   : > { %v13577_v48 = vmax.f32 %v13515_v43, 0.0 }
 0x3cf   : > { %v12733_v32 = vpop.f32.mrb[14].mxu0  ;;  %15602 = vmatmul.mubr.bf16.gmra.mrb[36].mxu0 %v19868_v60  ;;  %v13578_v17 = vmax.f32 %v13516_v27, 0.0  ;;  %v19886_v27 = vld [vmem:[#allocation2 + $0x3e0] ss:$124 sps:$4 sm:$0xff]  }
 0x3d0   : > { %v13546_v30 = vadd.f32 %v23187_v36, %v12733_v32  ;;  %v12735_v46 = vpop.f32.mrb[15].mxu0  ;;  %15609 = vmatprep.mubr.bf16.mxu0 %v19872_v25 }
 0x3d1   : > { %v13547_v53 = vadd.f32 %v23187_v36, %v12735_v46 }
 0x3d2   : > { %v13608_v61 = vmax.f32 %v13546_v30, 0.0  ;;  %v19890_v30 = vld [vmem:[#allocation2 + $0x4dc] ss:$124 sps:$4 sm:$0xff]  }
 0x3d3   : > { %v13609_v12 = vmax.f32 %v13547_v53, 0.0  ;;  %v12881_v50 = vpop.f32.mrb[16].mxu0  ;;  %16425 = vmatmul.mubr.bf16.gmra.mrb[52].mxu1 %v19871_v37 }
 0x3d4   : > { %v23431_v44 = vpack.c.bf16 %v13608_v61, %v13577_v48  ;;  %v12883_v38 = vpop.f32.mrb[17].mxu0  ;;  %16432 = vmatprep.mubr.bf16.mxu1 %v19875_v24  ;;  %v13519_v56 = vadd.f32 %v23139_v31, %v12881_v50 }
 0x3d5   : > { %v23433_v42 = vpack.c.bf16 %v13609_v12, %v13578_v17  ;;  %v13520_v8 = vadd.f32 %v23139_v31, %v12883_v38  ;;  %v19893_v12 = vld [vmem:[#allocation2 + $0x8f4] ss:$124 sps:$4 sm:$0xff]  }
 0x3d6   : > { %v13581_v19 = vmax.f32 %v13519_v56, 0.0 }
 0x3d7   : > { %v12887_v3 = vpop.f32.mrb[18].mxu0  ;;  %15610 = vmatmul.mubr.bf16.gmra.mrb[40].mxu0 %v19874_v54  ;;  %v13582_v18 = vmax.f32 %v13520_v8, 0.0 }
 0x3d8   : > { %v13550_v28 = vadd.f32 %v23187_v36, %v12887_v3  ;;  %v12889_v4 = vpop.f32.mrb[19].mxu0  ;;  %15617 = vmatprep.mubr.bf16.mxu0 %v19878_v34  ;;  %v19892_v3 = vld [vmem:[#allocation2 + $0x4d8] ss:$124 sps:$4 sm:$0xff]  }
 0x3d9   : > { %v13551_v22 = vadd.f32 %v23187_v36, %v12889_v4  ;;  %v19896_v4 = vld [vmem:[#allocation2 + $0x5d4] ss:$124 sps:$4 sm:$0xff]  }
 0x3da   : > { %v13612_v11 = vmax.f32 %v13550_v28, 0.0 }
 0x3db   : > { %v13613_v47 = vmax.f32 %v13551_v22, 0.0  ;;  %v13035_v45 = vpop.f32.mrb[20].mxu0  ;;  %16433 = vmatmul.mubr.bf16.gmra.mrb[56].mxu1 %v19877_v7 }
 0x3dc   : > { %v13643_v6 = vpack.c.bf16 %v13612_v11, %v13581_v19  ;;  %v13037_v15 = vpop.f32.mrb[21].mxu0  ;;  %16440 = vmatprep.mubr.bf16.mxu1 %v19881_v23  ;;  %v13523_v63 = vadd.f32 %v23139_v31, %v13035_v45 }
 0x3dd   : > { %v13644_v2 = vpack.c.bf16 %v13613_v47, %v13582_v18  ;;  %v13524_v20 = vadd.f32 %v23139_v31, %v13037_v15  ;;  %v19895_v18 = vld [vmem:[#allocation2 + $0x8f0] ss:$124 sps:$4 sm:$0xff]  }
 0x3de   : > { %v13585_v26 = vmax.f32 %v13523_v63, 0.0 }
 0x3df   : > { %v13041_v13 = vpop.f32.mrb[22].mxu0  ;;  %15618 = vmatmul.mubr.bf16.gmra.mrb[44].mxu0 %v19880_v16  ;;  %16465 = vmatprep.subr.bf16.mxu1 %v13644_v2  ;;  %v13586_v51 = vmax.f32 %v13524_v20, 0.0  ;;  %v19901_v16 = vld [vmem:[#allocation2 + $0x44] ss:$124 sps:$4 sm:$0xff]   ;;  %v19898_v20 = vld [vmem:[#allocation2 + $0x5d0] ss:$124 sps:$4 sm:$0xff]  }
 0x3e0   : > { %v13554_v55 = vadd.f32 %v23187_v36, %v13041_v13  ;;  %v13043_v9 = vpop.f32.mrb[23].mxu0  ;;  %16466 = vmatpush1.bf16.xpose.msra.mxu1 %v13643_v6  ;;  %15625 = vmatprep.mubr.bf16.mxu0 %v19884_v1 }
 0x3e1   : > { %v13555_v39 = vadd.f32 %v23187_v36, %v13043_v9  ;;  %16578 = vmatprep.subr.bf16.mxu1 %v23385_v52  ;;  %v19889_v52 = vld [vmem:[#allocation2 + $0x7f8] ss:$124 sps:$4 sm:$0xff]  }
 0x3e2   : > { %v13616_v60 = vmax.f32 %v13554_v55, 0.0  ;;  %v19899_v55 = vld [vmem:[#allocation2 + $0x40] ss:$124 sps:$4 sm:$0xff]  }
 0x3e3   : > { %v13617_v25 = vmax.f32 %v13555_v39, 0.0  ;;  %v13189_v43 = vpop.f32.mrb[24].mxu0  ;;  %16441 = vmatmul.mubr.bf16.gmra.mrb[60].mxu1 %v19883_v10  ;;  %v19905_v9 = vld [vmem:[#allocation2 + $0x13c] ss:$124 sps:$4 sm:$0xff]  }
 0x3e4   : > { %v23444_v32 = vpack.c.bf16 %v13616_v60, %v13585_v26  ;;  %v13191_v37 = vpop.f32.mrb[25].mxu0  ;;  %16448 = vmatprep.mubr.bf16.mxu1 %v19887_v5  ;;  %v13527_v24 = vadd.f32 %v23139_v31, %v13189_v43  ;;  %v19904_v5 = vld [vmem:[#allocation2 + $0x6c8] ss:$124 sps:$4 sm:$0xff]   ;;  %v19907_v39 = vld [vmem:[#allocation2 + $0x138] ss:$124 sps:$4 sm:$0xff]  }
 0x3e5   : > { %v13648_v46 = vpack.c.bf16 %v13617_v25, %v13586_v51  ;;  %v13528_v53 = vadd.f32 %v23139_v31, %v13191_v37  ;;  %v19911_v26 = vld [vmem:[#allocation2 + $0x234] ss:$124 sps:$4 sm:$0xff]   ;;  %v19910_v60 = vld [vmem:[#allocation2 + $0x7c0] ss:$124 sps:$4 sm:$0xff]   ;;  %v19917_v43 = vld [vmem:[#allocation2 + $0x32c] ss:$124 sps:$4 sm:$0xff]  }
 0x3e6   : > { %v13589_v54 = vmax.f32 %v13527_v24, 0.0  ;;  %v19914_v51 = vld [vmem:[#allocation2 + $0x8bc] ss:$124 sps:$4 sm:$0xff]   ;;  %v19913_v25 = vld [vmem:[#allocation2 + $0x230] ss:$124 sps:$4 sm:$0xff]  }
 0x3e7   : > { %v13195_v48 = vpop.f32.mrb[26].mxu0  ;;  %15626 = vmatmul.mubr.bf16.gmra.mrb[48].mxu0 %v19886_v27  ;;  %v13590_v34 = vmax.f32 %v13528_v53, 0.0  ;;  %v19916_v27 = vld [vmem:[#allocation2 + $0x8b8] ss:$124 sps:$4 sm:$0xff]   ;;  %v19922_v37 = vld [vmem:[#allocation2 + $0xc] ss:$124 sps:$4 sm:$0xff]  }
 0x3e8   : > { %v13558_v61 = vadd.f32 %v23187_v36, %v13195_v48  ;;  %v13197_v17 = vpop.f32.mrb[27].mxu0  ;;  %15633 = vmatprep.mubr.bf16.mxu0 %v19890_v30  ;;  %v19923_v30 = vld [vmem:[#allocation2 + $0x424] ss:$124 sps:$4 sm:$0xff]   ;;  %v19929_v48 = vld [vmem:[#allocation2 + $0x51c] ss:$124 sps:$4 sm:$0xff]  }
 0x3e9   : > { %v13559_v50 = vadd.f32 %v23187_v36, %v13197_v17  ;;  %v19926_v24 = vld [vmem:[#allocation2 + $0x104] ss:$124 sps:$4 sm:$0xff]   ;;  %v19931_v17 = vld [vmem:[#allocation2 + $0x518] ss:$124 sps:$4 sm:$0xff]  }
 0x3ea   : > { %v13620_v38 = vmax.f32 %v13558_v61, 0.0  ;;  %v19925_v53 = vld [vmem:[#allocation2 + $0x420] ss:$124 sps:$4 sm:$0xff]  }
 0x3eb   : > { %v13621_v56 = vmax.f32 %v13559_v50, 0.0  ;;  %v13343_v8 = vpop.f32.mrb[28].mxu0  ;;  %16449 = vmatmul.mubr.bf16.gmra.mrb[64].mxu1 %v19889_v52  ;;  %v19928_v52 = vld [vmem:[#allocation2 + $0x100] ss:$124 sps:$4 sm:$0xff]   ;;  %v19934_v50 = vld [vmem:[#allocation2 + $0x1f8] ss:$124 sps:$4 sm:$0xff]  }
 0x3ec   : > { %v23450_v7 = vpack.c.bf16 %v13620_v38, %v13589_v54  ;;  %v13345_v28 = vpop.f32.mrb[29].mxu0  ;;  %16456 = vmatprep.mubr.bf16.mxu1 %v19893_v12  ;;  %v13531_v22 = vadd.f32 %v23139_v31, %v13343_v8  ;;  %v19932_v61 = vld [vmem:[#allocation2 + $0x1fc] ss:$124 sps:$4 sm:$0xff]   ;;  %v19935_v12 = vld [vmem:[#allocation2 + $0x614] ss:$124 sps:$4 sm:$0xff]  }
 0x3ed   : > { %v23452_v23 = vpack.c.bf16 %v13621_v56, %v13590_v34  ;;  %v13532_v19 = vadd.f32 %v23139_v31, %v13345_v28  ;;  %v19902_v31 = vld [vmem:[#allocation2 + $0x6cc] ss:$124 sps:$4 sm:$0xff]   ;;  %v19938_v54 = vld [vmem:[#allocation2 + $0x2f4] ss:$124 sps:$4 sm:$0xff]   ;;  %v19947_v8 = vld [vmem:[#allocation2 + $0x804] ss:$124 sps:$4 sm:$0xff]  }
 0x3ee   : > { %v13593_v15 = vmax.f32 %v13531_v22, 0.0  ;;  %v19937_v38 = vld [vmem:[#allocation2 + $0x610] ss:$124 sps:$4 sm:$0xff]   ;;  %v19943_v56 = vld [vmem:[#allocation2 + $0x708] ss:$124 sps:$4 sm:$0xff]  }
 0x3ef   : > { %v13349_v11 = vpop.f32.mrb[30].mxu0  ;;  %15634 = vmatmul.mubr.bf16.gmra.mrb[52].mxu0 %v19892_v3  ;;  %v13594_v2 = vmax.f32 %v13532_v19, 0.0  ;;  %v19940_v34 = vld [vmem:[#allocation2 + $0x2f0] ss:$124 sps:$4 sm:$0xff]   ;;  %v19946_v3 = vld [vmem:[#allocation2 + $0x3e8] ss:$124 sps:$4 sm:$0xff]  }
 0x3f0   : > { %v13562_v47 = vadd.f32 %v23187_v36, %v13349_v11  ;;  %v13351_v45 = vpop.f32.mrb[31].mxu0  ;;  %15641 = vmatprep.mubr.bf16.mxu0 %v19896_v4  ;;  %v19950_v28 = vld [vmem:[#allocation2 + $0x4e4] ss:$124 sps:$4 sm:$0xff]   ;;  %v19953_v22 = vld [vmem:[#allocation2 + $0x8fc] ss:$124 sps:$4 sm:$0xff]  }
 0x3f1   : > { %v13563_v6 = vadd.f32 %v23187_v36, %v13351_v45  ;;  %v19908_v36 = vld [vmem:[#allocation2 + $0x7c4] ss:$124 sps:$4 sm:$0xff]   ;;  %v19956_v11 = vld [vmem:[#allocation2 + $0x5dc] ss:$124 sps:$4 sm:$0xff]  }
 0x3f2   : > { %v13624_v1 = vmax.f32 %v13562_v47, 0.0  ;;  %v19949_v4 = vld [vmem:[#allocation2 + $0x800] ss:$124 sps:$4 sm:$0xff]   ;;  %v19961_v47 = vld [vmem:[#allocation2 + $0x4c] ss:$124 sps:$4 sm:$0xff]  }
 0x3f3   : > { %v13625_v63 = vmax.f32 %v13563_v6, 0.0  ;;  %16457 = vmatmul.mubr.bf16.gmra.mrb[68].mxu1 %v19895_v18  ;;  %v19952_v19 = vld [vmem:[#allocation2 + $0x4e0] ss:$124 sps:$4 sm:$0xff]   ;;  %v19955_v18 = vld [vmem:[#allocation2 + $0x8f8] ss:$124 sps:$4 sm:$0xff]  }
 0x3f4   : > { %v23458_v13 = vpack.c.bf16 %v13624_v1, %v13593_v15  ;;  %16497 = vmatprep.mubr.bf16.mxu1 %v19901_v16  ;;  %v19958_v45 = vld [vmem:[#allocation2 + $0x5d8] ss:$124 sps:$4 sm:$0xff]   ;;  %v19959_v6 = vld [vmem:[#allocation2 + $0x48] ss:$124 sps:$4 sm:$0xff]   ;;  %v19964_v1 = vld [vmem:[#allocation2 + $0x6d0] ss:$124 sps:$4 sm:$0xff]  }
 0x3f5   : > { %v23460_v10 = vpack.c.bf16 %v13625_v63, %v13594_v2  ;;  %v19962_v16 = vld [vmem:[#allocation2 + $0x6d4] ss:$124 sps:$4 sm:$0xff]   ;;  %v19965_v15 = vld [vmem:[#allocation2 + $0x144] ss:$124 sps:$4 sm:$0xff]   ;;  %v19968_v2 = vld [vmem:[#allocation2 + $0x7cc] ss:$124 sps:$4 sm:$0xff]  }
 0x3f6   : > { %v19967_v63 = vld [vmem:[#allocation2 + $0x140] ss:$124 sps:$4 sm:$0xff]  }
 0x3f7   : > { %15642 = vmatmul.mubr.bf16.gmra.mrb[56].mxu0 %v19898_v20  ;;  %v19971_v20 = vld [vmem:[#allocation2 + $0x23c] ss:$124 sps:$4 sm:$0xff]  }
 0x3f8   : > { %15649 = vmatprep.mubr.bf16.mxu0 %v19902_v31  ;;  %v19970_v31 = vld [vmem:[#allocation2 + $0x7c8] ss:$124 sps:$4 sm:$0xff]  }
 0x3fb   : > { %16498 = vmatmul.mubr.bf16.vlgmr.msra.gmra.mrb[32].mxu1 %v19899_v55  ;;  %v19974_v55 = vld [vmem:[#allocation2 + $0x8c4] ss:$124 sps:$4 sm:$0xff]  }
 0x3fc   : > { %16579 = vmatpush1.bf16.xpose.msra.mxu1 %v23383_v0  ;;  %16505 = vmatprep.mubr.bf16.mxu1 %v19905_v9  ;;  %v19919_v0 = vld [vmem:[#allocation2 + $0x328] ss:$124 sps:$4 sm:$0xff]   ;;  %v19973_v9 = vld [vmem:[#allocation2 + $0x238] ss:$124 sps:$4 sm:$0xff]  }
 0x3fd   : > { %16691 = vmatprep.subr.bf16.mxu1 %v13648_v46  ;;  %v19920_v46 = vld [vmem:[#allocation2 + $0x8] ss:$124 sps:$4 sm:$0xff]  }
 0x3ff   : > { %15650 = vmatmul.mubr.bf16.gmra.mrb[60].mxu0 %v19904_v5  ;;  %v19977_v5 = vld [vmem:[#allocation2 + $0x334] ss:$124 sps:$4 sm:$0xff]  }
 0x400   : > { %15657 = vmatprep.mubr.bf16.mxu0 %v19908_v36  ;;  %v19976_v36 = vld [vmem:[#allocation2 + $0x8c0] ss:$124 sps:$4 sm:$0xff]  }
 0x403   : > { %16506 = vmatmul.mubr.bf16.gmra.mrb[36].mxu1 %v19907_v39  ;;  %v19979_v39 = vld [vmem:[#allocation2 + $0x330] ss:$124 sps:$4 sm:$0xff]  }
 0x404   : > { %16513 = vmatprep.mubr.bf16.mxu1 %v19911_v26  ;;  %v19980_v26 = vld [vmem:[#allocation2 + $0x10] ss:$124 sps:$4 sm:$0xff]  }
 0x407   : > { %15658 = vmatmul.mubr.bf16.gmra.mrb[64].mxu0 %v19910_v60  ;;  %v19986_v60 = vld [vmem:[#allocation2 + $0x10c] ss:$124 sps:$4 sm:$0xff]  }
 0x408   : > { %15665 = vmatprep.mubr.bf16.mxu0 %v19914_v51  ;;  %v19985_v51 = vld [vmem:[#allocation2 + $0x428] ss:$124 sps:$4 sm:$0xff]  }
 0x40b   : > { %16514 = vmatmul.mubr.bf16.gmra.mrb[40].mxu1 %v19913_v25  ;;  %v19989_v25 = vld [vmem:[#allocation2 + $0x524] ss:$124 sps:$4 sm:$0xff]  }
 0x40c   : > { %16521 = vmatprep.mubr.bf16.mxu1 %v19917_v43  ;;  %v19988_v43 = vld [vmem:[#allocation2 + $0x108] ss:$124 sps:$4 sm:$0xff]  }
 0x40f   : > { %15666 = vmatmul.mubr.bf16.gmra.mrb[68].mxu0 %v19916_v27  ;;  %v19992_v27 = vld [vmem:[#allocation2 + $0x204] ss:$124 sps:$4 sm:$0xff]  }
 0x410   : > { %15706 = vmatprep.mubr.bf16.mxu0 %v19922_v37  ;;  %v19991_v37 = vld [vmem:[#allocation2 + $0x520] ss:$124 sps:$4 sm:$0xff]  }
 0x413   : > { %16522 = vmatmul.mubr.bf16.gmra.mrb[44].mxu1 %v19919_v0  ;;  %v19995_v0 = vld [vmem:[#allocation2 + $0x61c] ss:$124 sps:$4 sm:$0xff]  }
 0x414   : > { %16529 = vmatprep.mubr.bf16.mxu1 %v19923_v30  ;;  %v19994_v30 = vld [vmem:[#allocation2 + $0x200] ss:$124 sps:$4 sm:$0xff]  }
 0x417   : > { %15707 = vmatmul.mubr.bf16.vlgmr.msra.gmra.mrb[32].mxu0 %v19920_v46  ;;  %v19998_v46 = vld [vmem:[#allocation2 + $0x2fc] ss:$124 sps:$4 sm:$0xff]  }
 0x418   : > { %15788 = vmatpush1.bf16.xpose.msra.mxu0 %v23416_v21  ;;  %15714 = vmatprep.mubr.bf16.mxu0 %v19926_v24  ;;  %v19941_v21 = vld [vmem:[#allocation2 + $0x70c] ss:$124 sps:$4 sm:$0xff]   ;;  %v19997_v24 = vld [vmem:[#allocation2 + $0x618] ss:$124 sps:$4 sm:$0xff]  }
 0x419   : > { %15900 = vmatprep.subr.bf16.mxu0 %v23365_v57  ;;  %v19944_v57 = vld [vmem:[#allocation2 + $0x3ec] ss:$124 sps:$4 sm:$0xff]  }
 0x41b   : > { %16530 = vmatmul.mubr.bf16.gmra.mrb[48].mxu1 %v19925_v53  ;;  %v20000_v53 = vld [vmem:[#allocation2 + $0x2f8] ss:$124 sps:$4 sm:$0xff]  }
 0x41c   : > { %16537 = vmatprep.mubr.bf16.mxu1 %v19929_v48  ;;  %v20003_v48 = vld [vmem:[#allocation2 + $0x710] ss:$124 sps:$4 sm:$0xff]  }
 0x41f   : > { %15715 = vmatmul.mubr.bf16.gmra.mrb[36].mxu0 %v19928_v52  ;;  %v20007_v52 = vld [vmem:[#allocation2 + $0x80c] ss:$124 sps:$4 sm:$0xff]  }
 0x420   : > { %15722 = vmatprep.mubr.bf16.mxu0 %v19932_v61  ;;  %v20006_v61 = vld [vmem:[#allocation2 + $0x3f0] ss:$124 sps:$4 sm:$0xff]  }
 0x423   : > { %16538 = vmatmul.mubr.bf16.gmra.mrb[52].mxu1 %v19931_v17  ;;  %v20010_v17 = vld [vmem:[#allocation2 + $0x4ec] ss:$124 sps:$4 sm:$0xff]  }
 0x424   : > { %16545 = vmatprep.mubr.bf16.mxu1 %v19935_v12  ;;  %v20009_v12 = vld [vmem:[#allocation2 + $0x808] ss:$124 sps:$4 sm:$0xff]  }
 0x427   : > { %15723 = vmatmul.mubr.bf16.gmra.mrb[40].mxu0 %v19934_v50  ;;  %v20013_v50 = vld [vmem:[#allocation2 + $0x904] ss:$124 sps:$4 sm:$0xff]  }
 0x428   : > { %15730 = vmatprep.mubr.bf16.mxu0 %v19938_v54  ;;  %v20012_v54 = vld [vmem:[#allocation2 + $0x4e8] ss:$124 sps:$4 sm:$0xff]  }
 0x42b   : > { %16546 = vmatmul.mubr.bf16.gmra.mrb[56].mxu1 %v19937_v38  ;;  %v20016_v38 = vld [vmem:[#allocation2 + $0x5e4] ss:$124 sps:$4 sm:$0xff]  }
 0x42c   : > { %16553 = vmatprep.mubr.bf16.mxu1 %v19941_v21  ;;  %v20015_v21 = vld [vmem:[#allocation2 + $0x900] ss:$124 sps:$4 sm:$0xff]  }
 0x42f   : > { %15731 = vmatmul.mubr.bf16.gmra.mrb[44].mxu0 %v19940_v34  ;;  %v20021_v34 = vld [vmem:[#allocation2 + $0x54] ss:$124 sps:$4 sm:$0xff]  }
 0x430   : > { %15738 = vmatprep.mubr.bf16.mxu0 %v19944_v57  ;;  %v20018_v57 = vld [vmem:[#allocation2 + $0x5e0] ss:$124 sps:$4 sm:$0xff]  }
 0x433   : > { %16554 = vmatmul.mubr.bf16.gmra.mrb[60].mxu1 %v19943_v56  ;;  %v20022_v56 = vld [vmem:[#allocation2 + $0x6dc] ss:$124 sps:$4 sm:$0xff]  }
 0x434   : > { %16561 = vmatprep.mubr.bf16.mxu1 %v19947_v8  ;;  %v20019_v8 = vld [vmem:[#allocation2 + $0x50] ss:$124 sps:$4 sm:$0xff]  }
 0x437   : > { %15739 = vmatmul.mubr.bf16.gmra.mrb[48].mxu0 %v19946_v3  ;;  %v20025_v3 = vld [vmem:[#allocation2 + $0x14c] ss:$124 sps:$4 sm:$0xff]  }
 0x438   : > { %15746 = vmatprep.mubr.bf16.mxu0 %v19950_v28  ;;  %v20024_v28 = vld [vmem:[#allocation2 + $0x6d8] ss:$124 sps:$4 sm:$0xff]  }
 0x43b   : > { %16562 = vmatmul.mubr.bf16.gmra.mrb[64].mxu1 %v19949_v4  ;;  %v20028_v4 = vld [vmem:[#allocation2 + $0x7d4] ss:$124 sps:$4 sm:$0xff]  }
 0x43c   : > { %16569 = vmatprep.mubr.bf16.mxu1 %v19953_v22  ;;  %v20027_v22 = vld [vmem:[#allocation2 + $0x148] ss:$124 sps:$4 sm:$0xff]  }
 0x43f   : > { %15747 = vmatmul.mubr.bf16.gmra.mrb[52].mxu0 %v19952_v19  ;;  %v20031_v19 = vld [vmem:[#allocation2 + $0x244] ss:$124 sps:$4 sm:$0xff]  }
 0x440   : > { %15754 = vmatprep.mubr.bf16.mxu0 %v19956_v11  ;;  %v20030_v11 = vld [vmem:[#allocation2 + $0x7d0] ss:$124 sps:$4 sm:$0xff]  }
 0x443   : > { %16570 = vmatmul.mubr.bf16.gmra.mrb[68].mxu1 %v19955_v18  ;;  %v20034_v18 = vld [vmem:[#allocation2 + $0x8cc] ss:$124 sps:$4 sm:$0xff]  }
 0x444   : > { %16610 = vmatprep.mubr.bf16.mxu1 %v19961_v47  ;;  %v20033_v47 = vld [vmem:[#allocation2 + $0x240] ss:$124 sps:$4 sm:$0xff]  }
 0x447   : > { %15755 = vmatmul.mubr.bf16.gmra.mrb[56].mxu0 %v19958_v45  ;;  %v20037_v45 = vld [vmem:[#allocation2 + $0x33c] ss:$124 sps:$4 sm:$0xff]  }
 0x448   : > { %15762 = vmatprep.mubr.bf16.mxu0 %v19962_v16  ;;  %v20036_v16 = vld [vmem:[#allocation2 + $0x8c8] ss:$124 sps:$4 sm:$0xff]  }
 0x44b   : > { %16611 = vmatmul.mubr.bf16.vlgmr.msra.gmra.mrb[32].mxu1 %v19959_v6  ;;  %v20039_v6 = vld [vmem:[#allocation2 + $0x338] ss:$124 sps:$4 sm:$0xff]  }
 0x44c   : > { %16692 = vmatpush1.bf16.xpose.msra.mxu1 %v23444_v32  ;;  %16618 = vmatprep.mubr.bf16.mxu1 %v19965_v15  ;;  %v19982_v32 = vld [vmem:[#allocation2 + $0x14] ss:$124 sps:$4 sm:$0xff]  }
 0x44d   : > { %16804 = vmatprep.subr.bf16.mxu1 %v23393_v33  ;;  %v19983_v33 = vld [vmem:[#allocation2 + $0x42c] ss:$124 sps:$4 sm:$0xff]   ;;  %v20040_v15 = vld [vmem:[#allocation2 + $0x18] ss:$124 sps:$4 sm:$0xff]  }
 0x44f   : > { %15763 = vmatmul.mubr.bf16.gmra.mrb[60].mxu0 %v19964_v1  ;;  %v20046_v1 = vld [vmem:[#allocation2 + $0x114] ss:$124 sps:$4 sm:$0xff]  }
 0x450   : > { %15770 = vmatprep.mubr.bf16.mxu0 %v19968_v2  ;;  %v20045_v2 = vld [vmem:[#allocation2 + $0x430] ss:$124 sps:$4 sm:$0xff]  }
 0x453   : > { %16619 = vmatmul.mubr.bf16.gmra.mrb[36].mxu1 %v19967_v63  ;;  %v20049_v63 = vld [vmem:[#allocation2 + $0x52c] ss:$124 sps:$4 sm:$0xff]  }
 0x454   : > { %16626 = vmatprep.mubr.bf16.mxu1 %v19971_v20  ;;  %v20048_v20 = vld [vmem:[#allocation2 + $0x110] ss:$124 sps:$4 sm:$0xff]  }
 0x457   : > { %15771 = vmatmul.mubr.bf16.gmra.mrb[64].mxu0 %v19970_v31  ;;  %v20052_v31 = vld [vmem:[#allocation2 + $0x20c] ss:$124 sps:$4 sm:$0xff]  }
 0x458   : > { %15778 = vmatprep.mubr.bf16.mxu0 %v19974_v55  ;;  %v20051_v55 = vld [vmem:[#allocation2 + $0x528] ss:$124 sps:$4 sm:$0xff]  }
 0x45b   : > { %16627 = vmatmul.mubr.bf16.gmra.mrb[40].mxu1 %v19973_v9  ;;  %v20055_v9 = vld [vmem:[#allocation2 + $0x624] ss:$124 sps:$4 sm:$0xff]  }
 0x45c   : > { %16634 = vmatprep.mubr.bf16.mxu1 %v19977_v5  ;;  %v20054_v5 = vld [vmem:[#allocation2 + $0x208] ss:$124 sps:$4 sm:$0xff]  }
 0x45f   : > { %15779 = vmatmul.mubr.bf16.gmra.mrb[68].mxu0 %v19976_v36  ;;  %v20058_v36 = vld [vmem:[#allocation2 + $0x304] ss:$124 sps:$4 sm:$0xff]  }
 0x460   : > { %15819 = vmatprep.mubr.bf16.mxu0 %v19982_v32  ;;  %v20057_v32 = vld [vmem:[#allocation2 + $0x620] ss:$124 sps:$4 sm:$0xff]  }
 0x463   : > { %16635 = vmatmul.mubr.bf16.gmra.mrb[44].mxu1 %v19979_v39  ;;  %v20060_v39 = vld [vmem:[#allocation2 + $0x300] ss:$124 sps:$4 sm:$0xff]  }
 0x464   : > { %16642 = vmatprep.mubr.bf16.mxu1 %v19983_v33  ;;  %v20063_v33 = vld [vmem:[#allocation2 + $0x718] ss:$124 sps:$4 sm:$0xff]  }
 0x467   : > { %15820 = vmatmul.mubr.bf16.vlgmr.msra.gmra.mrb[32].mxu0 %v19980_v26  ;;  %v20067_v26 = vld [vmem:[#allocation2 + $0x814] ss:$124 sps:$4 sm:$0xff]  }
 0x468   : > { %15901 = vmatpush1.bf16.xpose.msra.mxu0 %v23363_v58  ;;  %15827 = vmatprep.mubr.bf16.mxu0 %v19986_v60  ;;  %v20001_v58 = vld [vmem:[#allocation2 + $0x714] ss:$124 sps:$4 sm:$0xff]  }
 0x469   : > { %16013 = vmatprep.subr.bf16.mxu0 %v23425_v59  ;;  %v20004_v59 = vld [vmem:[#allocation2 + $0x3f4] ss:$124 sps:$4 sm:$0xff]  }
 0x46a   : > { %v20066_v60 = vld [vmem:[#allocation2 + $0x3f8] ss:$124 sps:$4 sm:$0xff]  }
 0x46b   : > { %16643 = vmatmul.mubr.bf16.gmra.mrb[48].mxu1 %v19985_v51  ;;  %v20070_v51 = vld [vmem:[#allocation2 + $0x4f4] ss:$124 sps:$4 sm:$0xff]  }
 0x46c   : > { %16650 = vmatprep.mubr.bf16.mxu1 %v19989_v25  ;;  %v20069_v25 = vld [vmem:[#allocation2 + $0x810] ss:$124 sps:$4 sm:$0xff]  }
 0x46f   : > { %15828 = vmatmul.mubr.bf16.gmra.mrb[36].mxu0 %v19988_v43  ;;  %v20073_v43 = vld [vmem:[#allocation2 + $0x90c] ss:$124 sps:$4 sm:$0xff]  }
 0x470   : > { %15835 = vmatprep.mubr.bf16.mxu0 %v19992_v27  ;;  %v20072_v27 = vld [vmem:[#allocation2 + $0x4f0] ss:$124 sps:$4 sm:$0xff]  }
 0x473   : > { %16651 = vmatmul.mubr.bf16.gmra.mrb[52].mxu1 %v19991_v37  ;;  %v20076_v37 = vld [vmem:[#allocation2 + $0x5ec] ss:$124 sps:$4 sm:$0xff]  }
 0x474   : > { %16658 = vmatprep.mubr.bf16.mxu1 %v19995_v0  ;;  %v20075_v0 = vld [vmem:[#allocation2 + $0x908] ss:$124 sps:$4 sm:$0xff]  }
 0x477   : > { %15836 = vmatmul.mubr.bf16.gmra.mrb[40].mxu0 %v19994_v30  ;;  %v20081_v30 = vld [vmem:[#allocation2 + $0x5c] ss:$124 sps:$4 sm:$0xff]  }
 0x478   : > { %15843 = vmatprep.mubr.bf16.mxu0 %v19998_v46  ;;  %v20078_v46 = vld [vmem:[#allocation2 + $0x5e8] ss:$124 sps:$4 sm:$0xff]  }
 0x47b   : > { %16659 = vmatmul.mubr.bf16.gmra.mrb[56].mxu1 %v19997_v24  ;;  %v20082_v24 = vld [vmem:[#allocation2 + $0x6e4] ss:$124 sps:$4 sm:$0xff]  }
 0x47c   : > { %16666 = vmatprep.mubr.bf16.mxu1 %v20001_v58  ;;  %v20079_v58 = vld [vmem:[#allocation2 + $0x58] ss:$124 sps:$4 sm:$0xff]  }
 0x47f   : > { %15844 = vmatmul.mubr.bf16.gmra.mrb[44].mxu0 %v20000_v53  ;;  %v20085_v53 = vld [vmem:[#allocation2 + $0x154] ss:$124 sps:$4 sm:$0xff]  }
 0x480   : > { %15851 = vmatprep.mubr.bf16.mxu0 %v20004_v59  ;;  %v20084_v59 = vld [vmem:[#allocation2 + $0x6e0] ss:$124 sps:$4 sm:$0xff]  }
 0x483   : > { %16667 = vmatmul.mubr.bf16.gmra.mrb[60].mxu1 %v20003_v48  ;;  %v20088_v48 = vld [vmem:[#allocation2 + $0x7dc] ss:$124 sps:$4 sm:$0xff]  }
 0x484   : > { %16674 = vmatprep.mubr.bf16.mxu1 %v20007_v52  ;;  %v20087_v52 = vld [vmem:[#allocation2 + $0x150] ss:$124 sps:$4 sm:$0xff]  }
 0x487   : > { %15852 = vmatmul.mubr.bf16.gmra.mrb[48].mxu0 %v20006_v61  ;;  %v20091_v61 = vld [vmem:[#allocation2 + $0x24c] ss:$124 sps:$4 sm:$0xff]  }
 0x488   : > { %15859 = vmatprep.mubr.bf16.mxu0 %v20010_v17  ;;  %v20090_v17 = vld [vmem:[#allocation2 + $0x7d8] ss:$124 sps:$4 sm:$0xff]  }
 0x48b   : > { %16675 = vmatmul.mubr.bf16.gmra.mrb[64].mxu1 %v20009_v12  ;;  %v20094_v12 = vld [vmem:[#allocation2 + $0x8d4] ss:$124 sps:$4 sm:$0xff]  }
 0x48c   : > { %16682 = vmatprep.mubr.bf16.mxu1 %v20013_v50  ;;  %v20093_v50 = vld [vmem:[#allocation2 + $0x248] ss:$124 sps:$4 sm:$0xff]  }
 0x48f   : > { %15860 = vmatmul.mubr.bf16.gmra.mrb[52].mxu0 %v20012_v54  ;;  %v20097_v54 = vld [vmem:[#allocation2 + $0x344] ss:$124 sps:$4 sm:$0xff]  }
 0x490   : > { %15867 = vmatprep.mubr.bf16.mxu0 %v20016_v38  ;;  %v20096_v38 = vld [vmem:[#allocation2 + $0x8d0] ss:$124 sps:$4 sm:$0xff]  }
 0x493   : > { %16683 = vmatmul.mubr.bf16.gmra.mrb[68].mxu1 %v20015_v21  ;;  %v20099_v21 = vld [vmem:[#allocation2 + $0x340] ss:$124 sps:$4 sm:$0xff]  }
 0x494   : > { %16723 = vmatprep.mubr.bf16.mxu1 %v20021_v34  ;;  %v20100_v34 = vld [vmem:[#allocation2 + $0x20] ss:$124 sps:$4 sm:$0xff]  }
 0x497   : > { %15868 = vmatmul.mubr.bf16.gmra.mrb[56].mxu0 %v20018_v57  ;;  %v20106_v57 = vld [vmem:[#allocation2 + $0x11c] ss:$124 sps:$4 sm:$0xff]  }
 0x498   : > { %15875 = vmatprep.mubr.bf16.mxu0 %v20022_v56  ;;  %v20105_v56 = vld [vmem:[#allocation2 + $0x438] ss:$124 sps:$4 sm:$0xff]  }
 0x49b   : > { %16724 = vmatmul.mubr.bf16.vlgmr.msra.gmra.mrb[32].mxu1 %v20019_v8  ;;  %v20109_v8 = vld [vmem:[#allocation2 + $0x534] ss:$124 sps:$4 sm:$0xff]  }
 0x49c   : > { %16805 = vmatpush1.bf16.xpose.msra.mxu1 %v23391_v62  ;;  %16731 = vmatprep.mubr.bf16.mxu1 %v20025_v3  ;;  %v20042_v62 = vld [vmem:[#allocation2 + $0x1c] ss:$124 sps:$4 sm:$0xff]  }
 0x49d   : > { %16917 = vmatprep.subr.bf16.mxu1 %v23452_v23  ;;  %v20043_v23 = vld [vmem:[#allocation2 + $0x434] ss:$124 sps:$4 sm:$0xff]  }
 0x49e   : > { %v20108_v3 = vld [vmem:[#allocation2 + $0x118] ss:$124 sps:$4 sm:$0xff]  }
 0x49f   : > { %15876 = vmatmul.mubr.bf16.gmra.mrb[60].mxu0 %v20024_v28  ;;  %v20112_v28 = vld [vmem:[#allocation2 + $0x214] ss:$124 sps:$4 sm:$0xff]  }
 0x4a0   : > { %15883 = vmatprep.mubr.bf16.mxu0 %v20028_v4  ;;  %v20111_v4 = vld [vmem:[#allocation2 + $0x530] ss:$124 sps:$4 sm:$0xff]  }
 0x4a3   : > { %16732 = vmatmul.mubr.bf16.gmra.mrb[36].mxu1 %v20027_v22  ;;  %v20115_v22 = vld [vmem:[#allocation2 + $0x62c] ss:$124 sps:$4 sm:$0xff]  }
 0x4a4   : > { %16739 = vmatprep.mubr.bf16.mxu1 %v20031_v19  ;;  %v20114_v19 = vld [vmem:[#allocation2 + $0x210] ss:$124 sps:$4 sm:$0xff]  }
 0x4a7   : > { %15884 = vmatmul.mubr.bf16.gmra.mrb[64].mxu0 %v20030_v11  ;;  %v20118_v11 = vld [vmem:[#allocation2 + $0x30c] ss:$124 sps:$4 sm:$0xff]  }
 0x4a8   : > { %15891 = vmatprep.mubr.bf16.mxu0 %v20034_v18  ;;  %v20117_v18 = vld [vmem:[#allocation2 + $0x628] ss:$124 sps:$4 sm:$0xff]  }
 0x4ab   : > { %16740 = vmatmul.mubr.bf16.gmra.mrb[40].mxu1 %v20033_v47  ;;  %v20120_v47 = vld [vmem:[#allocation2 + $0x308] ss:$124 sps:$4 sm:$0xff]  }
 0x4ac   : > { %16747 = vmatprep.mubr.bf16.mxu1 %v20037_v45  ;;  %v20123_v45 = vld [vmem:[#allocation2 + $0x720] ss:$124 sps:$4 sm:$0xff]  }
 0x4af   : > { %15892 = vmatmul.mubr.bf16.gmra.mrb[68].mxu0 %v20036_v16  ;;  %v20127_v16 = vld [vmem:[#allocation2 + $0x81c] ss:$124 sps:$4 sm:$0xff]  }
 0x4b0   : > { %15932 = vmatprep.mubr.bf16.mxu0 %v20042_v62  ;;  %v20126_v62 = vld [vmem:[#allocation2 + $0x400] ss:$124 sps:$4 sm:$0xff]  }
 0x4b3   : > { %16748 = vmatmul.mubr.bf16.gmra.mrb[44].mxu1 %v20039_v6  ;;  %v20130_v6 = vld [vmem:[#allocation2 + $0x4fc] ss:$124 sps:$4 sm:$0xff]  }
 0x4b4   : > { %16755 = vmatprep.mubr.bf16.mxu1 %v20043_v23  ;;  %v20129_v23 = vld [vmem:[#allocation2 + $0x818] ss:$124 sps:$4 sm:$0xff]  }
 0x4b7   : > { %15933 = vmatmul.mubr.bf16.vlgmr.msra.gmra.mrb[32].mxu0 %v20040_v15  ;;  %v20133_v15 = vld [vmem:[#allocation2 + $0x914] ss:$124 sps:$4 sm:$0xff]  }
 0x4b8   : > { %16014 = vmatpush1.bf16.xpose.msra.mxu0 %v23423_v40  ;;  %15940 = vmatprep.mubr.bf16.mxu0 %v20046_v1  ;;  %v20061_v40 = vld [vmem:[#allocation2 + $0x71c] ss:$124 sps:$4 sm:$0xff]  }
 0x4b9   : > { %16126 = vmatprep.subr.bf16.mxu0 %v23373_v41  ;;  %v20064_v41 = vld [vmem:[#allocation2 + $0x3fc] ss:$124 sps:$4 sm:$0xff]  }
 0x4ba   : > { %v20132_v1 = vld [vmem:[#allocation2 + $0x4f8] ss:$124 sps:$4 sm:$0xff]  }
 0x4bb   : > { %16756 = vmatmul.mubr.bf16.gmra.mrb[48].mxu1 %v20045_v2  ;;  %v20136_v2 = vld [vmem:[#allocation2 + $0x5f4] ss:$124 sps:$4 sm:$0xff]  }
 0x4bc   : > { %16763 = vmatprep.mubr.bf16.mxu1 %v20049_v63  ;;  %v20135_v63 = vld [vmem:[#allocation2 + $0x910] ss:$124 sps:$4 sm:$0xff]  }
 0x4bf   : > { %15941 = vmatmul.mubr.bf16.gmra.mrb[36].mxu0 %v20048_v20  ;;  %v20141_v20 = vld [vmem:[#allocation2 + $0x64] ss:$124 sps:$4 sm:$0xff]  }
 0x4c0   : > { %15948 = vmatprep.mubr.bf16.mxu0 %v20052_v31  ;;  %v20138_v31 = vld [vmem:[#allocation2 + $0x5f0] ss:$124 sps:$4 sm:$0xff]  }
 0x4c3   : > { %16764 = vmatmul.mubr.bf16.gmra.mrb[52].mxu1 %v20051_v55  ;;  %v20142_v55 = vld [vmem:[#allocation2 + $0x6ec] ss:$124 sps:$4 sm:$0xff]  }
 0x4c4   : > { %16771 = vmatprep.mubr.bf16.mxu1 %v20055_v9  ;;  %v20139_v9 = vld [vmem:[#allocation2 + $0x60] ss:$124 sps:$4 sm:$0xff]  }
 0x4c7   : > { %15949 = vmatmul.mubr.bf16.gmra.mrb[40].mxu0 %v20054_v5  ;;  %v20145_v5 = vld [vmem:[#allocation2 + $0x15c] ss:$124 sps:$4 sm:$0xff]  }
 0x4c8   : > { %15956 = vmatprep.mubr.bf16.mxu0 %v20058_v36  ;;  %v20144_v36 = vld [vmem:[#allocation2 + $0x6e8] ss:$124 sps:$4 sm:$0xff]  }
 0x4cb   : > { %16772 = vmatmul.mubr.bf16.gmra.mrb[56].mxu1 %v20057_v32  ;;  %v20148_v32 = vld [vmem:[#allocation2 + $0x7e4] ss:$124 sps:$4 sm:$0xff]  }
 0x4cc   : > { %16779 = vmatprep.mubr.bf16.mxu1 %v20061_v40  ;;  %v20147_v40 = vld [vmem:[#allocation2 + $0x158] ss:$124 sps:$4 sm:$0xff]  }
 0x4cf   : > { %15957 = vmatmul.mubr.bf16.gmra.mrb[44].mxu0 %v20060_v39  ;;  %v20151_v39 = vld [vmem:[#allocation2 + $0x254] ss:$124 sps:$4 sm:$0xff]  }
 0x4d0   : > { %15964 = vmatprep.mubr.bf16.mxu0 %v20064_v41  ;;  %v20150_v41 = vld [vmem:[#allocation2 + $0x7e0] ss:$124 sps:$4 sm:$0xff]  }
 0x4d3   : > { %16780 = vmatmul.mubr.bf16.gmra.mrb[60].mxu1 %v20063_v33  ;;  %v20154_v33 = vld [vmem:[#allocation2 + $0x8dc] ss:$124 sps:$4 sm:$0xff]  }
 0x4d4   : > { %16787 = vmatprep.mubr.bf16.mxu1 %v20067_v26  ;;  %v20153_v26 = vld [vmem:[#allocation2 + $0x250] ss:$124 sps:$4 sm:$0xff]  }
 0x4d7   : > { %15965 = vmatmul.mubr.bf16.gmra.mrb[48].mxu0 %v20066_v60  ;;  %v20157_v60 = vld [vmem:[#allocation2 + $0x34c] ss:$124 sps:$4 sm:$0xff]  }
 0x4d8   : > { %15972 = vmatprep.mubr.bf16.mxu0 %v20070_v51  ;;  %v20156_v51 = vld [vmem:[#allocation2 + $0x8d8] ss:$124 sps:$4 sm:$0xff]  }
 0x4db   : > { %16788 = vmatmul.mubr.bf16.gmra.mrb[64].mxu1 %v20069_v25  ;;  %v20159_v25 = vld [vmem:[#allocation2 + $0x348] ss:$124 sps:$4 sm:$0xff]  }
 0x4dc   : > { %16795 = vmatprep.mubr.bf16.mxu1 %v20073_v43  ;;  %v20160_v43 = vld [vmem:[#allocation2 + $0x28] ss:$124 sps:$4 sm:$0xff]  }
 0x4df   : > { %15973 = vmatmul.mubr.bf16.gmra.mrb[52].mxu0 %v20072_v27  ;;  %v20166_v27 = vld [vmem:[#allocation2 + $0x124] ss:$124 sps:$4 sm:$0xff]  }
 0x4e0   : > { %15980 = vmatprep.mubr.bf16.mxu0 %v20076_v37  ;;  %v20165_v37 = vld [vmem:[#allocation2 + $0x440] ss:$124 sps:$4 sm:$0xff]  }
 0x4e3   : > { %16796 = vmatmul.mubr.bf16.gmra.mrb[68].mxu1 %v20075_v0  ;;  %v20169_v0 = vld [vmem:[#allocation2 + $0x53c] ss:$124 sps:$4 sm:$0xff]  }
 0x4e4   : > { %16836 = vmatprep.mubr.bf16.mxu1 %v20081_v30  ;;  %v20168_v30 = vld [vmem:[#allocation2 + $0x120] ss:$124 sps:$4 sm:$0xff]  }
 0x4e7   : > { %15981 = vmatmul.mubr.bf16.gmra.mrb[56].mxu0 %v20078_v46  ;;  %v20172_v46 = vld [vmem:[#allocation2 + $0x21c] ss:$124 sps:$4 sm:$0xff]  }
 0x4e8   : > { %15988 = vmatprep.mubr.bf16.mxu0 %v20082_v24  ;;  %v20171_v24 = vld [vmem:[#allocation2 + $0x538] ss:$124 sps:$4 sm:$0xff]  }
 0x4eb   : > { %16837 = vmatmul.mubr.bf16.vlgmr.msra.gmra.mrb[32].mxu1 %v20079_v58  ;;  %v20175_v58 = vld [vmem:[#allocation2 + $0x634] ss:$124 sps:$4 sm:$0xff]  }
 0x4ec   : > { %16918 = vmatpush1.bf16.xpose.msra.mxu1 %v23450_v7  ;;  %16844 = vmatprep.mubr.bf16.mxu1 %v20085_v53  ;;  %v20102_v7 = vld [vmem:[#allocation2 + $0x24] ss:$124 sps:$4 sm:$0xff]   ;;  %v20174_v53 = vld [vmem:[#allocation2 + $0x218] ss:$124 sps:$4 sm:$0xff]  }
 0x4ed   : > { %17030 = vmatprep.subr.bf16.mxu1 %v23405_v14  ;;  %v20103_v14 = vld [vmem:[#allocation2 + $0x43c] ss:$124 sps:$4 sm:$0xff]  }
 0x4ef   : > { %15989 = vmatmul.mubr.bf16.gmra.mrb[60].mxu0 %v20084_v59  ;;  %v20178_v59 = vld [vmem:[#allocation2 + $0x314] ss:$124 sps:$4 sm:$0xff]  }
 0x4f0   : > { %15996 = vmatprep.mubr.bf16.mxu0 %v20088_v48  ;;  %v20177_v48 = vld [vmem:[#allocation2 + $0x630] ss:$124 sps:$4 sm:$0xff]  }
 0x4f3   : > { %16845 = vmatmul.mubr.bf16.gmra.mrb[36].mxu1 %v20087_v52  ;;  %v20180_v52 = vld [vmem:[#allocation2 + $0x310] ss:$124 sps:$4 sm:$0xff]  }
 0x4f4   : > { %16852 = vmatprep.mubr.bf16.mxu1 %v20091_v61  ;;  %v20184_v61 = vld [vmem:[#allocation2 + $0x40c] ss:$124 sps:$4 sm:$0xff]  }
 0x4f7   : > { %15997 = vmatmul.mubr.bf16.gmra.mrb[64].mxu0 %v20090_v17  ;;  %v20183_v17 = vld [vmem:[#allocation2 + $0x728] ss:$124 sps:$4 sm:$0xff]  }
 0x4f8   : > { %16004 = vmatprep.mubr.bf16.mxu0 %v20094_v12  ;;  %v20187_v12 = vld [vmem:[#allocation2 + $0x824] ss:$124 sps:$4 sm:$0xff]  }
 0x4fb   : > { %16853 = vmatmul.mubr.bf16.gmra.mrb[40].mxu1 %v20093_v50  ;;  %v20186_v50 = vld [vmem:[#allocation2 + $0x408] ss:$124 sps:$4 sm:$0xff]  }
 0x4fc   : > { %16860 = vmatprep.mubr.bf16.mxu1 %v20097_v54  ;;  %v20190_v54 = vld [vmem:[#allocation2 + $0x504] ss:$124 sps:$4 sm:$0xff]  }
 0x4ff   : > { %16005 = vmatmul.mubr.bf16.gmra.mrb[68].mxu0 %v20096_v38  ;;  %v20189_v38 = vld [vmem:[#allocation2 + $0x820] ss:$124 sps:$4 sm:$0xff]  }
 0x500   : > { %16045 = vmatprep.mubr.bf16.mxu0 %v20102_v7  ;;  %v20193_v7 = vld [vmem:[#allocation2 + $0x91c] ss:$124 sps:$4 sm:$0xff]  }
 0x503   : > { %16861 = vmatmul.mubr.bf16.gmra.mrb[44].mxu1 %v20099_v21  ;;  %v20192_v21 = vld [vmem:[#allocation2 + $0x500] ss:$124 sps:$4 sm:$0xff]  }
 0x504   : > { %16868 = vmatprep.mubr.bf16.mxu1 %v20103_v14  ;;  %v20196_v14 = vld [vmem:[#allocation2 + $0x5fc] ss:$124 sps:$4 sm:$0xff]  }
 0x507   : > { %16046 = vmatmul.mubr.bf16.vlgmr.msra.gmra.mrb[32].mxu0 %v20100_v34  ;;  %v20195_v34 = vld [vmem:[#allocation2 + $0x918] ss:$124 sps:$4 sm:$0xff]  }
 0x508   : > { %16127 = vmatpush1.bf16.xpose.msra.mxu0 %v23371_v49  ;;  %16053 = vmatprep.mubr.bf16.mxu0 %v20106_v57  ;;  %v20121_v49 = vld [vmem:[#allocation2 + $0x724] ss:$124 sps:$4 sm:$0xff]   ;;  %v20201_v57 = vld [vmem:[#allocation2 + $0x6c] ss:$124 sps:$4 sm:$0xff]  }
 0x509   : > { %16239 = vmatprep.subr.bf16.mxu0 %v23433_v42  ;;  %v20124_v42 = vld [vmem:[#allocation2 + $0x404] ss:$124 sps:$4 sm:$0xff]  }
 0x50b   : > { %16869 = vmatmul.mubr.bf16.gmra.mrb[48].mxu1 %v20105_v56  ;;  %v20198_v56 = vld [vmem:[#allocation2 + $0x5f8] ss:$124 sps:$4 sm:$0xff]  }
 0x50c   : > { %16876 = vmatprep.mubr.bf16.mxu1 %v20109_v8  ;;  %v20202_v8 = vld [vmem:[#allocation2 + $0x6f4] ss:$124 sps:$4 sm:$0xff]  }
 0x50f   : > { %16054 = vmatmul.mubr.bf16.gmra.mrb[36].mxu0 %v20108_v3  ;;  %v20199_v3 = vld [vmem:[#allocation2 + $0x68] ss:$124 sps:$4 sm:$0xff]  }
 0x510   : > { %16061 = vmatprep.mubr.bf16.mxu0 %v20112_v28  ;;  %v20205_v28 = vld [vmem:[#allocation2 + $0x164] ss:$124 sps:$4 sm:$0xff]  }
 0x513   : > { %16877 = vmatmul.mubr.bf16.gmra.mrb[52].mxu1 %v20111_v4  ;;  %v20204_v4 = vld [vmem:[#allocation2 + $0x6f0] ss:$124 sps:$4 sm:$0xff]  }
 0x514   : > { %16884 = vmatprep.mubr.bf16.mxu1 %v20115_v22  ;;  %v20208_v22 = vld [vmem:[#allocation2 + $0x7ec] ss:$124 sps:$4 sm:$0xff]  }
 0x517   : > { %16062 = vmatmul.mubr.bf16.gmra.mrb[40].mxu0 %v20114_v19  ;;  %v20207_v19 = vld [vmem:[#allocation2 + $0x160] ss:$124 sps:$4 sm:$0xff]  }
 0x518   : > { %16069 = vmatprep.mubr.bf16.mxu0 %v20118_v11  ;;  %v20211_v11 = vld [vmem:[#allocation2 + $0x25c] ss:$124 sps:$4 sm:$0xff]  }
 0x51b   : > { %16885 = vmatmul.mubr.bf16.gmra.mrb[56].mxu1 %v20117_v18  ;;  %v20210_v18 = vld [vmem:[#allocation2 + $0x7e8] ss:$124 sps:$4 sm:$0xff]  }
 0x51c   : > { %16892 = vmatprep.mubr.bf16.mxu1 %v20121_v49  ;;  %v20214_v49 = vld [vmem:[#allocation2 + $0x8e4] ss:$124 sps:$4 sm:$0xff]  }
 0x51f   : > { %16070 = vmatmul.mubr.bf16.gmra.mrb[44].mxu0 %v20120_v47  ;;  %v20213_v47 = vld [vmem:[#allocation2 + $0x258] ss:$124 sps:$4 sm:$0xff]  }
 0x520   : > { %16077 = vmatprep.mubr.bf16.mxu0 %v20124_v42  ;;  %v20217_v42 = vld [vmem:[#allocation2 + $0x354] ss:$124 sps:$4 sm:$0xff]  }
 0x523   : > { %16893 = vmatmul.mubr.bf16.gmra.mrb[60].mxu1 %v20123_v45  ;;  %v20216_v45 = vld [vmem:[#allocation2 + $0x8e0] ss:$124 sps:$4 sm:$0xff]  }
 0x524   : > { %16900 = vmatprep.mubr.bf16.mxu1 %v20127_v16  ;;  %v20222_v16 = vld [vmem:[#allocation2 + $0x34] ss:$124 sps:$4 sm:$0xff]  }
 0x527   : > { %16078 = vmatmul.mubr.bf16.gmra.mrb[48].mxu0 %v20126_v62  ;;  %v20223_v62 = vld [vmem:[#allocation2 + $0x44c] ss:$124 sps:$4 sm:$0xff]  }
 0x528   : > { %16085 = vmatprep.mubr.bf16.mxu0 %v20130_v6  ;;  %v20220_v6 = vld [vmem:[#allocation2 + $0x30] ss:$124 sps:$4 sm:$0xff]  }
 0x52b   : > { %16901 = vmatmul.mubr.bf16.gmra.mrb[64].mxu1 %v20129_v23  ;;  %v20226_v23 = vld [vmem:[#allocation2 + $0x12c] ss:$124 sps:$4 sm:$0xff]  }
 0x52c   : > { %16908 = vmatprep.mubr.bf16.mxu1 %v20133_v15  ;;  %v15559_v15 = vsel %vm3165_vm3, %v23409_v35, 0 }
 0x52f   : > { %16086 = vmatmul.mubr.bf16.gmra.mrb[52].mxu0 %v20132_v1  ;;  %v20225_v1 = vld [vmem:[#allocation2 + $0x448] ss:$124 sps:$4 sm:$0xff]  }
 0x530   : > { %16093 = vmatprep.mubr.bf16.mxu0 %v20136_v2  ;;  %v20229_v2 = vld [vmem:[#allocation2 + $0x544] ss:$124 sps:$4 sm:$0xff]  }
 0x533   : > { %16909 = vmatmul.mubr.bf16.gmra.mrb[68].mxu1 %v20135_v63  ;;  %v20228_v63 = vld [vmem:[#allocation2 + $0x128] ss:$124 sps:$4 sm:$0xff]  }
 0x534   : > { %16949 = vmatprep.mubr.bf16.mxu1 %v20141_v20  ;;  %v20232_v20 = vld [vmem:[#allocation2 + $0x224] ss:$124 sps:$4 sm:$0xff]  }
 0x537   : > { %16094 = vmatmul.mubr.bf16.gmra.mrb[56].mxu0 %v20138_v31  ;;  %v20231_v31 = vld [vmem:[#allocation2 + $0x540] ss:$124 sps:$4 sm:$0xff]  }
 0x538   : > { %16101 = vmatprep.mubr.bf16.mxu0 %v20142_v55  ;;  %v20235_v55 = vld [vmem:[#allocation2 + $0x63c] ss:$124 sps:$4 sm:$0xff]  }
 0x53b   : > { %16950 = vmatmul.mubr.bf16.vlgmr.msra.gmra.mrb[32].mxu1 %v20139_v9  ;;  %v20234_v9 = vld [vmem:[#allocation2 + $0x220] ss:$124 sps:$4 sm:$0xff]  }
 0x53c   : > { %17031 = vmatpush1.bf16.xpose.msra.mxu1 %v23401_v29  ;;  %16957 = vmatprep.mubr.bf16.mxu1 %v20145_v5  ;;  %v20162_v29 = vld [vmem:[#allocation2 + $0x2c] ss:$124 sps:$4 sm:$0xff]   ;;  %v20238_v5 = vld [vmem:[#allocation2 + $0x31c] ss:$124 sps:$4 sm:$0xff]  }
 0x53d   : > { %17143 = vmatprep.subr.bf16.mxu1 %v23460_v10  ;;  %v20163_v10 = vld [vmem:[#allocation2 + $0x444] ss:$124 sps:$4 sm:$0xff]  }
 0x53f   : > { %16102 = vmatmul.mubr.bf16.gmra.mrb[60].mxu0 %v20144_v36  ;;  %v20237_v36 = vld [vmem:[#allocation2 + $0x638] ss:$124 sps:$4 sm:$0xff]  }
 0x540   : > { %16109 = vmatprep.mubr.bf16.mxu0 %v20148_v32  ;;  %v20240_v32 = vld [vmem:[#allocation2 + $0x318] ss:$124 sps:$4 sm:$0xff]  }
 0x543   : > { %16958 = vmatmul.mubr.bf16.gmra.mrb[36].mxu1 %v20147_v40  ;;  %v20244_v40 = vld [vmem:[#allocation2 + $0x414] ss:$124 sps:$4 sm:$0xff]  }
 0x544   : > { %16965 = vmatprep.mubr.bf16.mxu1 %v20151_v39  ;;  %v20243_v39 = vld [vmem:[#allocation2 + $0x730] ss:$124 sps:$4 sm:$0xff]  }
 0x547   : > { %16110 = vmatmul.mubr.bf16.gmra.mrb[64].mxu0 %v20150_v41  ;;  %v20247_v41 = vld [vmem:[#allocation2 + $0x82c] ss:$124 sps:$4 sm:$0xff]  }
 0x548   : > { %16117 = vmatprep.mubr.bf16.mxu0 %v20154_v33  ;;  %v20246_v33 = vld [vmem:[#allocation2 + $0x410] ss:$124 sps:$4 sm:$0xff]  }
 0x54b   : > { %16966 = vmatmul.mubr.bf16.gmra.mrb[40].mxu1 %v20153_v26  ;;  %v20250_v26 = vld [vmem:[#allocation2 + $0x50c] ss:$124 sps:$4 sm:$0xff]  }
 0x54c   : > { %16973 = vmatprep.mubr.bf16.mxu1 %v20157_v60  ;;  %v20249_v60 = vld [vmem:[#allocation2 + $0x828] ss:$124 sps:$4 sm:$0xff]  }
 0x54f   : > { %16118 = vmatmul.mubr.bf16.gmra.mrb[68].mxu0 %v20156_v51  ;;  %v20253_v51 = vld [vmem:[#allocation2 + $0x924] ss:$124 sps:$4 sm:$0xff]  }
 0x550   : > { %16158 = vmatprep.mubr.bf16.mxu0 %v20162_v29  ;;  %v20252_v29 = vld [vmem:[#allocation2 + $0x508] ss:$124 sps:$4 sm:$0xff]  }
 0x553   : > { %16974 = vmatmul.mubr.bf16.gmra.mrb[44].mxu1 %v20159_v25  ;;  %v20256_v25 = vld [vmem:[#allocation2 + $0x604] ss:$124 sps:$4 sm:$0xff]  }
 0x554   : > { %16981 = vmatprep.mubr.bf16.mxu1 %v20163_v10  ;;  %v20255_v10 = vld [vmem:[#allocation2 + $0x920] ss:$124 sps:$4 sm:$0xff]  }
 0x557   : > { %16159 = vmatmul.mubr.bf16.vlgmr.msra.gmra.mrb[32].mxu0 %v20160_v43  ;;  %v20261_v43 = vld [vmem:[#allocation2 + $0x74] ss:$124 sps:$4 sm:$0xff]  }
 0x558   : > { %16240 = vmatpush1.bf16.xpose.msra.mxu0 %v23431_v44  ;;  %16166 = vmatprep.mubr.bf16.mxu0 %v20166_v27  ;;  %v20181_v44 = vld [vmem:[#allocation2 + $0x72c] ss:$124 sps:$4 sm:$0xff]   ;;  %v20258_v27 = vld [vmem:[#allocation2 + $0x600] ss:$124 sps:$4 sm:$0xff]  }
 0x559   : > { %19681 = vmatprep.subr.msk.bf16.mxu0 %vm3165_vm3, %v23409_v35  ;;  %v20241_v35 = vld [vmem:[#allocation2 + $0x734] ss:$124 sps:$4 sm:$0xff]  }
 0x55b   : > { %16982 = vmatmul.mubr.bf16.gmra.mrb[48].mxu1 %v20165_v37  ;;  %v20262_v37 = vld [vmem:[#allocation2 + $0x6fc] ss:$124 sps:$4 sm:$0xff]  }
 0x55c   : > { %16989 = vmatprep.mubr.bf16.mxu1 %v20169_v0  ;;  %v20259_v0 = vld [vmem:[#allocation2 + $0x70] ss:$124 sps:$4 sm:$0xff]  }
 0x55f   : > { %16167 = vmatmul.mubr.bf16.gmra.mrb[36].mxu0 %v20168_v30  ;;  %v20265_v30 = vld [vmem:[#allocation2 + $0x16c] ss:$124 sps:$4 sm:$0xff]  }
 0x560   : > { %16174 = vmatprep.mubr.bf16.mxu0 %v20172_v46  ;;  %v20264_v46 = vld [vmem:[#allocation2 + $0x6f8] ss:$124 sps:$4 sm:$0xff]  }
 0x563   : > { %16990 = vmatmul.mubr.bf16.gmra.mrb[52].mxu1 %v20171_v24  ;;  %v20268_v24 = vld [vmem:[#allocation2 + $0x7f4] ss:$124 sps:$4 sm:$0xff]  }
 0x564   : > { %16997 = vmatprep.mubr.bf16.mxu1 %v20175_v58  ;;  %v20267_v58 = vld [vmem:[#allocation2 + $0x168] ss:$124 sps:$4 sm:$0xff]  }
 0x567   : > { %16175 = vmatmul.mubr.bf16.gmra.mrb[40].mxu0 %v20174_v53  ;;  %v20271_v53 = vld [vmem:[#allocation2 + $0x264] ss:$124 sps:$4 sm:$0xff]  }
 0x568   : > { %16182 = vmatprep.mubr.bf16.mxu0 %v20178_v59  ;;  %v20270_v59 = vld [vmem:[#allocation2 + $0x7f0] ss:$124 sps:$4 sm:$0xff]  }
 0x56b   : > { %16998 = vmatmul.mubr.bf16.gmra.mrb[56].mxu1 %v20177_v48  ;;  %v20274_v48 = vld [vmem:[#allocation2 + $0x8ec] ss:$124 sps:$4 sm:$0xff]  }
 0x56c   : > { %17005 = vmatprep.mubr.bf16.mxu1 %v20181_v44  ;;  %v20273_v44 = vld [vmem:[#allocation2 + $0x260] ss:$124 sps:$4 sm:$0xff]  }
 0x56f   : > { %16183 = vmatmul.mubr.bf16.gmra.mrb[44].mxu0 %v20180_v52  ;;  %v20277_v52 = vld [vmem:[#allocation2 + $0x35c] ss:$124 sps:$4 sm:$0xff]  }
 0x570   : > { %16190 = vmatprep.mubr.bf16.mxu0 %v20184_v61  ;;  %v20276_v61 = vld [vmem:[#allocation2 + $0x8e8] ss:$124 sps:$4 sm:$0xff]  }
 0x573   : > { %17006 = vmatmul.mubr.bf16.gmra.mrb[60].mxu1 %v20183_v17  ;;  %v20280_v17 = vld [vmem:[#allocation2 + $0x78] ss:$124 sps:$4 sm:$0xff]  }
 0x574   : > { %17013 = vmatprep.mubr.bf16.mxu1 %v20187_v12  ;;  %v20279_v12 = vld [vmem:[#allocation2 + $0x358] ss:$124 sps:$4 sm:$0xff]  }
 0x577   : > { %16191 = vmatmul.mubr.bf16.gmra.mrb[48].mxu0 %v20186_v50  ;;  %v20282_v50 = vld [vmem:[#allocation2 + $0x454] ss:$124 sps:$4 sm:$0xff]  }
 0x578   : > { %16198 = vmatprep.mubr.bf16.mxu0 %v20190_v54  ;;  %v20281_v54 = vld [vmem:[#allocation2 + $0x170] ss:$124 sps:$4 sm:$0xff]  }
 0x57b   : > { %17014 = vmatmul.mubr.bf16.gmra.mrb[64].mxu1 %v20189_v38  ;;  %v20285_v38 = vld [vmem:[#allocation2 + $0x268] ss:$124 sps:$4 sm:$0xff]  }
 0x57c   : > { %17021 = vmatprep.mubr.bf16.mxu1 %v20193_v7  ;;  %v20284_v7 = vld [vmem:[#allocation2 + $0x450] ss:$124 sps:$4 sm:$0xff]  }
 0x57f   : > { %16199 = vmatmul.mubr.bf16.gmra.mrb[52].mxu0 %v20192_v21  ;;  %v20287_v21 = vld [vmem:[#allocation2 + $0x54c] ss:$124 sps:$4 sm:$0xff]  }
 0x580   : > { %16206 = vmatprep.mubr.bf16.mxu0 %v20196_v14  ;;  %v20286_v14 = vld [vmem:[#allocation2 + $0x360] ss:$124 sps:$4 sm:$0xff]  }
 0x583   : > { %17022 = vmatmul.mubr.bf16.gmra.mrb[68].mxu1 %v20195_v34  ;;  %v20290_v34 = vld [vmem:[#allocation2 + $0x458] ss:$124 sps:$4 sm:$0xff]  }
 0x584   : > { %17062 = vmatprep.mubr.bf16.mxu1 %v20201_v57  ;;  %v20289_v57 = vld [vmem:[#allocation2 + $0x548] ss:$124 sps:$4 sm:$0xff]  }
 0x587   : > { %16207 = vmatmul.mubr.bf16.gmra.mrb[56].mxu0 %v20198_v56  ;;  %v20292_v56 = vld [vmem:[#allocation2 + $0x644] ss:$124 sps:$4 sm:$0xff]  }
 0x588   : > { %16214 = vmatprep.mubr.bf16.mxu0 %v20202_v8  ;;  %v20291_v8 = vld [vmem:[#allocation2 + $0x550] ss:$124 sps:$4 sm:$0xff]  }
 0x58b   : > { %17063 = vmatmul.mubr.bf16.vlgmr.msra.gmra.mrb[32].mxu1 %v20199_v3  ;;  %v20295_v3 = vld [vmem:[#allocation2 + $0x648] ss:$124 sps:$4 sm:$0xff]  }
 0x58c   : > { %17144 = vmatpush1.bf16.xpose.msra.mxu1 %v23458_v13  ;;  %17070 = vmatprep.mubr.bf16.mxu1 %v20205_v28  ;;  %v20219_v13 = vld [vmem:[#allocation2 + $0x350] ss:$124 sps:$4 sm:$0xff]   ;;  %v20294_v28 = vld [vmem:[#allocation2 + $0x640] ss:$124 sps:$4 sm:$0xff]  }
 0x58f   : > { %16215 = vmatmul.mubr.bf16.gmra.mrb[60].mxu0 %v20204_v4  ;;  %v20297_v4 = vld [vmem:[#allocation2 + $0x73c] ss:$124 sps:$4 sm:$0xff]  }
 0x590   : > { %16222 = vmatprep.mubr.bf16.mxu0 %v20208_v22  ;;  %v20296_v22 = vld [vmem:[#allocation2 + $0x740] ss:$124 sps:$4 sm:$0xff]  }
 0x593   : > { %17071 = vmatmul.mubr.bf16.gmra.mrb[36].mxu1 %v20207_v19  ;;  %v20303_v19 = vld [vmem:[#allocation2 + $0x838] ss:$124 sps:$4 sm:$0xff]  }
 0x594   : > { %17078 = vmatprep.mubr.bf16.mxu1 %v20211_v11  ;;  %v20299_v11 = vld [vmem:[#allocation2 + $0x738] ss:$124 sps:$4 sm:$0xff]  }
 0x597   : > { %16223 = vmatmul.mubr.bf16.gmra.mrb[64].mxu0 %v20210_v18  ;;  %v20300_v18 = vld [vmem:[#allocation2 + $0x834] ss:$124 sps:$4 sm:$0xff]  }
 0x598   : > { %16230 = vmatprep.mubr.bf16.mxu0 %v20214_v49  ;;  %v20304_v49 = vld [vmem:[#allocation2 + $0x930] ss:$124 sps:$4 sm:$0xff]  }
 0x59b   : > { %17079 = vmatmul.mubr.bf16.gmra.mrb[40].mxu1 %v20213_v47  ;;  %v20302_v47 = vld [vmem:[#allocation2 + $0x830] ss:$124 sps:$4 sm:$0xff]  }
 0x59c   : > { %17086 = vmatprep.mubr.bf16.mxu1 %v20217_v42  ;;  %v20305_v42 = vld [vmem:[#allocation2 + $0x92c] ss:$124 sps:$4 sm:$0xff]  }
 0x59f   : > { %16231 = vmatmul.mubr.bf16.gmra.mrb[68].mxu0 %v20216_v45  ;;  %v20307_v45 = vld [vmem:[#allocation2 + $0x928] ss:$124 sps:$4 sm:$0xff]  }
 0x5a0   : > { %16271 = vmatprep.mubr.bf16.mxu0 %v20222_v16  ;;  %v20409_v16 = vmov 0.0|0.0  }
 0x5a3   : > { %17087 = vmatmul.mubr.bf16.gmra.mrb[44].mxu1 %v20219_v13 }
 0x5a4   : > { %17094 = vmatprep.mubr.bf16.mxu1 %v20223_v62 }
 0x5a7   : > { %16272 = vmatmul.mubr.bf16.vlgmr.msra.gmra.mrb[32].mxu0 %v20220_v6 }
 0x5a8   : > { %18594 = vmatpush3.bf16.xpose.msra.mxu0 %v15559_v15  ;;  %16279 = vmatprep.mubr.bf16.mxu0 %v20226_v23  ;;  %v17370_v15 = vld [vmem:[#allocation4 + $0x8] sm:$0xff] }
 0x5a9   : > { %18615 = vmatprep.subr.bf16.mxu0 %v20409_v16 }
 0x5ab   : > { %17095 = vmatmul.mubr.bf16.gmra.mrb[48].mxu1 %v20225_v1 }
 0x5ac   : > { %17102 = vmatprep.mubr.bf16.mxu1 %v20229_v2 }
 0x5af   : > { %16280 = vmatmul.mubr.bf16.gmra.mrb[36].mxu0 %v20228_v63 }
 0x5b0   : > { %16287 = vmatprep.mubr.bf16.mxu0 %v20232_v20 }
 0x5b3   : > { %17103 = vmatmul.mubr.bf16.gmra.mrb[52].mxu1 %v20231_v31 }
 0x5b4   : > { %17110 = vmatprep.mubr.bf16.mxu1 %v20235_v55 }
 0x5b7   : > { %16288 = vmatmul.mubr.bf16.gmra.mrb[40].mxu0 %v20234_v9 }
 0x5b8   : > { %16295 = vmatprep.mubr.bf16.mxu0 %v20238_v5 }
 0x5bb   : > { %17111 = vmatmul.mubr.bf16.gmra.mrb[56].mxu1 %v20237_v36 }
 0x5bc   : > { %17118 = vmatprep.mubr.bf16.mxu1 %v20241_v35 }
 0x5bf   : > { %16296 = vmatmul.mubr.bf16.gmra.mrb[44].mxu0 %v20240_v32 }
 0x5c0   : > { %16303 = vmatprep.mubr.bf16.mxu0 %v20244_v40 }
 0x5c3   : > { %17119 = vmatmul.mubr.bf16.gmra.mrb[60].mxu1 %v20243_v39 }
 0x5c4   : > { %17126 = vmatprep.mubr.bf16.mxu1 %v20247_v41 }
 0x5c7   : > { %16304 = vmatmul.mubr.bf16.gmra.mrb[48].mxu0 %v20246_v33 }
 0x5c8   : > { %16311 = vmatprep.mubr.bf16.mxu0 %v20250_v26 }
 0x5cb   : > { %17127 = vmatmul.mubr.bf16.gmra.mrb[64].mxu1 %v20249_v60 }
 0x5cc   : > { %17134 = vmatprep.mubr.bf16.mxu1 %v20253_v51 }
 0x5cf   : > { %16312 = vmatmul.mubr.bf16.gmra.mrb[52].mxu0 %v20252_v29 }
 0x5d0   : > { %16319 = vmatprep.mubr.bf16.mxu0 %v20256_v25 }
 0x5d3   : > { %17135 = vmatmul.mubr.bf16.gmra.mrb[68].mxu1 %v20255_v10 }
 0x5d4   : > { %17175 = vmatprep.mubr.bf16.mxu1 %v20261_v43 }
 0x5d7   : > { %16320 = vmatmul.mubr.bf16.gmra.mrb[56].mxu0 %v20258_v27 }
 0x5d8   : > { %16327 = vmatprep.mubr.bf16.mxu0 %v20262_v37 }
 0x5db   : > { %17176 = vmatmul.mubr.bf16.vlgmr.msra.gmra.mrb[32].mxu1 %v20259_v0 }
 0x5dc   : > { %17183 = vmatprep.mubr.bf16.mxu1 %v20265_v30 }
 0x5df   : > { %16328 = vmatmul.mubr.bf16.gmra.mrb[60].mxu0 %v20264_v46 }
 0x5e0   : > { %16335 = vmatprep.mubr.bf16.mxu0 %v20268_v24 }
 0x5e3   : > { %17184 = vmatmul.mubr.bf16.gmra.mrb[36].mxu1 %v20267_v58 }
 0x5e4   : > { %17191 = vmatprep.mubr.bf16.mxu1 %v20271_v53 }
 0x5e7   : > { %16336 = vmatmul.mubr.bf16.gmra.mrb[64].mxu0 %v20270_v59 }
 0x5e8   : > { %16343 = vmatprep.mubr.bf16.mxu0 %v20274_v48 }
 0x5eb   : > { %17192 = vmatmul.mubr.bf16.gmra.mrb[40].mxu1 %v20273_v44 }
 0x5ec   : > { %17199 = vmatprep.mubr.bf16.mxu1 %v20277_v52 }
 0x5ef   : > { %16344 = vmatmul.mubr.bf16.gmra.mrb[68].mxu0 %v20276_v61 }
 0x5f0   : > { %18595 = vmatprep.mubr.msk.bf16.mxu0 %vm3165_vm3, %v20280_v17 }
 0x5f3   : > { %17200 = vmatmul.mubr.bf16.gmra.mrb[44].mxu1 %v20279_v12 }
 0x5f4   : > { %17207 = vmatprep.mubr.bf16.mxu1 %v20282_v50 }
 0x5f7   : > { %18596 = vmatmul.mubr.msk.bf16.vlgmr.msra.gmra.mrb[72].mxu0 %vm3165_vm3, %v20281_v54 }
 0x5f8   : > { %18599 = vmatprep.mubr.msk.bf16.mxu0 %vm3165_vm3, %v20285_v38 }
 0x5fb   : > { %17208 = vmatmul.mubr.bf16.gmra.mrb[48].mxu1 %v20284_v7 }
 0x5fc   : > { %17215 = vmatprep.mubr.bf16.mxu1 %v20287_v21 }
 0x5ff   : > { %18600 = vmatmul.mubr.msk.bf16.gmra.mrb[76].mxu0 %vm3165_vm3, %v20286_v14 }
 0x600   : > { %18603 = vmatprep.mubr.msk.bf16.mxu0 %vm3165_vm3, %v20290_v34 }
 0x603   : > { %17216 = vmatmul.mubr.bf16.gmra.mrb[52].mxu1 %v20289_v57 }
 0x604   : > { %17223 = vmatprep.mubr.bf16.mxu1 %v20292_v56 }
 0x607   : > { %18604 = vmatmul.mubr.msk.bf16.gmra.mrb[80].mxu0 %vm3165_vm3, %v20291_v8 }
 0x608   : > { %18607 = vmatprep.mubr.msk.bf16.mxu0 %vm3165_vm3, %v20295_v3 }
 0x60b   : > { %17224 = vmatmul.mubr.bf16.gmra.mrb[56].mxu1 %v20294_v28 }
 0x60c   : > { %17231 = vmatprep.mubr.bf16.mxu1 %v20297_v4 }
 0x60f   : > { %18608 = vmatmul.mubr.msk.bf16.gmra.mrb[84].mxu0 %vm3165_vm3, %v20296_v22 }
 0x610   : > { %18611 = vmatprep.mubr.msk.bf16.mxu0 %vm3165_vm3, %v20303_v19 }
 0x613   : > { %17232 = vmatmul.mubr.bf16.gmra.mrb[60].mxu1 %v20299_v11 }
 0x614   : > { %17239 = vmatprep.mubr.bf16.mxu1 %v20300_v18 }
 0x617   : > { %18612 = vmatmul.mubr.msk.bf16.gmra.mrb[88].mxu0 %vm3165_vm3, %v20304_v49 }
 0x618   : > { %18504 = vmatprep.mubr.msk.f32.mxu0 %vm17413_vm7, %v17370_v15 }
 0x61b   : > { %17240 = vmatmul.mubr.bf16.gmra.mrb[64].mxu1 %v20302_v47 }
 0x61c   : > { %17247 = vmatprep.mubr.bf16.mxu1 %v20305_v42 }
 0x623   : > { %17248 = vmatmul.mubr.bf16.gmra.mrb[68].mxu1 %v20307_v45 }
 0x67a   : > { %v16273_v13 = vpop.f32.mrb[32].mxu0 }
 0x67b   : > { %v16275_v62 = vpop.f32.mrb[33].mxu0 }
 0x67c   : > { %v16276_v6 = vpop.f32.mrb[34].mxu0 }
 0x67d   : > { %v16278_v23 = vpop.f32.mrb[35].mxu0 }
 0x682   : > { %v16281_v1 = vpop.f32.mrb[36].mxu0 }
 0x683   : > { %v16283_v2 = vpop.f32.mrb[37].mxu0 }
 0x684   : > { %v16284_v63 = vpop.f32.mrb[38].mxu0 }
 0x685   : > { %v16286_v20 = vpop.f32.mrb[39].mxu0 }
 0x686   : > { %v17376_v20 = vld [vmem:[%s23621_s5 + $0x18] sm:$0xff] }
 0x68a   : > { %v16289_v31 = vpop.f32.mrb[40].mxu0 }
 0x68b   : > { %v16291_v55 = vpop.f32.mrb[41].mxu0 }
 0x68c   : > { %v16292_v9 = vpop.f32.mrb[42].mxu0 }
 0x68d   : > { %v16294_v5 = vpop.f32.mrb[43].mxu0 }
 0x68e   : > { %v17374_v5 = vld [vmem:[%s23621_s5 + $0x8] sm:$0xff] }
 0x692   : > { %v16297_v36 = vpop.f32.mrb[44].mxu0 }
 0x693   : > { %v16299_v35 = vpop.f32.mrb[45].mxu0 }
 0x694   : > { %v16300_v32 = vpop.f32.mrb[46].mxu0 }
 0x695   : > { %v16302_v40 = vpop.f32.mrb[47].mxu0 }
 0x69a   : > { %v23497_v39 = vpop.f32.mrb[48].mxu0 }
 0x69b   : > { %v16307_v41 = vpop.f32.mrb[49].mxu0 }
 0x69c   : > { %v23499_v33 = vpop.f32.mrb[50].mxu0 }
 0x69d   : > { %v16310_v26 = vpop.f32.mrb[51].mxu0 }
 0x6a2   : > { %v23501_v60 = vpop.f32.mrb[52].mxu0 }
 0x6a3   : > { %v16315_v51 = vpop.f32.mrb[53].mxu0 }
 0x6a4   : > { %v23503_v29 = vpop.f32.mrb[54].mxu0 }
 0x6a5   : > { %v16318_v25 = vpop.f32.mrb[55].mxu0 }
 0x6aa   : > { %v23505_v10 = vpop.f32.mrb[56].mxu0 }
 0x6ab   : > { %v16323_v43 = vpop.f32.mrb[57].mxu0 }
 0x6ac   : > { %v23507_v27 = vpop.f32.mrb[58].mxu0 }
 0x6ad   : > { %v16326_v37 = vpop.f32.mrb[59].mxu0 }
 0x6ae   : > { %v17177_v0 = vpop.f32.mrb[32].mxu1 }
 0x6af   : > { %v18645_v30 = vadd.f32 %v17177_v0, %v16273_v13  ;;  %v17179_v46 = vpop.f32.mrb[33].mxu1 }
 0x6b0   : > { %v17180_v24 = vpop.f32.mrb[34].mxu1 }
 0x6b1   : > { %v18646_v58 = vadd.f32 %v17180_v24, %v16276_v6  ;;  %v17182_v53 = vpop.f32.mrb[35].mxu1 }
 0x6b2   : > { %v23509_v59 = vpop.f32.mrb[60].mxu0 }
 0x6b3   : > { %v16331_v48 = vpop.f32.mrb[61].mxu0 }
 0x6b4   : > { %v23511_v44 = vpop.f32.mrb[62].mxu0 }
 0x6b5   : > { %v16334_v52 = vpop.f32.mrb[63].mxu0 }
 0x6b6   : > { %v17185_v61 = vpop.f32.mrb[36].mxu1 }
 0x6b7   : > { %v18647_v17 = vadd.f32 %v17185_v61, %v16281_v1  ;;  %v17187_v12 = vpop.f32.mrb[37].mxu1  ;;  %v17375_v1 = vld [vmem:[%s23621_s5 + $0x10] sm:$0xff] }
 0x6b8   : > { %v17188_v50 = vpop.f32.mrb[38].mxu1 }
 0x6b9   : > { %v18648_v54 = vadd.f32 %v17188_v50, %v16284_v63  ;;  %v17190_v38 = vpop.f32.mrb[39].mxu1  ;;  %v17378_v50 = vld [vmem:[%s23621_s5 + $0x28] sm:$0xff] }
 0x6ba   : > { %v23513_v7 = vpop.f32.mrb[64].mxu0 }
 0x6bb   : > { %v16339_v21 = vpop.f32.mrb[65].mxu0 }
 0x6bc   : > { %v23515_v14 = vpop.f32.mrb[66].mxu0 }
 0x6bd   : > { %v16342_v34 = vpop.f32.mrb[67].mxu0 }
 0x6be   : > { %v17193_v57 = vpop.f32.mrb[40].mxu1 }
 0x6bf   : > { %v18649_v56 = vadd.f32 %v17193_v57, %v16289_v31  ;;  %v17195_v8 = vpop.f32.mrb[41].mxu1  ;;  %v17373_v31 = vld [vmem:[%s23621_s5] sm:$0xff] }
 0x6c0   : > { %v17196_v3 = vpop.f32.mrb[42].mxu1 }
 0x6c1   : > { %v18650_v28 = vadd.f32 %v17196_v3, %v16292_v9  ;;  %v17198_v4 = vpop.f32.mrb[43].mxu1 }
 0x6c2   : > { %v23517_v22 = vpop.f32.mrb[68].mxu0 }
 0x6c3   : > { %v16347_v19 = vpop.f32.mrb[69].mxu0 }
 0x6c4   : > { %v23519_v11 = vpop.f32.mrb[70].mxu0 }
 0x6c5   : > { %v16350_v18 = vpop.f32.mrb[71].mxu0 }
 0x6c6   : > { %v17201_v49 = vpop.f32.mrb[44].mxu1 }
 0x6c7   : > { %v18651_v47 = vadd.f32 %v17201_v49, %v16297_v36  ;;  %v17203_v42 = vpop.f32.mrb[45].mxu1 }
 0x6c8   : > { %v17204_v45 = vpop.f32.mrb[46].mxu1 }
 0x6c9   : > { %v18652_v13 = vadd.f32 %v17204_v45, %v16300_v32  ;;  %v17206_v62 = vpop.f32.mrb[47].mxu1 }
 0x6ca   : > { %v18597_v6 = vpop.f32.mrb[72].mxu0 }
 0x6cb   : > { %v17299_v23 = vadd.f32 %v18647_v17, %v18597_v6  ;;  %v17290_v15 = vpop.f32.mrb[73].mxu0  ;;  %v17384_v6 = vld [vmem:[%s23621_s5 + $0x58] sm:$0xff] }
 0x6cc   : > { %v17291_v2 = vadd.f32 %v18645_v30, %v17290_v15  ;;  %v18598_v63 = vpop.f32.mrb[74].mxu0 }
 0x6cd   : > { %v17302_v55 = vadd.f32 %v18648_v54, %v18598_v63  ;;  %v17293_v9 = vpop.f32.mrb[75].mxu0  ;;  %v17395_v32 = vmul.f32 %v17375_v1, %v17299_v23  ;;  %v17382_v1 = vld [vmem:[%s23621_s5 + $0x48] sm:$0xff] }
 0x6ce   : > { %v17294_v36 = vadd.f32 %v18646_v58, %v17293_v9  ;;  %v17209_v35 = vpop.f32.mrb[48].mxu1  ;;  %v17393_v51 = vmul.f32 %v17373_v31, %v17291_v2  ;;  %v17379_v58 = vld [vmem:[%s23621_s5 + $0x30] sm:$0xff] }
 0x6cf   : > { %v17396_v40 = vmul.f32 %v17376_v20, %v17302_v55  ;;  %v18653_v41 = vadd.f32 %v17209_v35, %v23497_v39  ;;  %v17211_v26 = vpop.f32.mrb[49].mxu1  ;;  %v17380_v39 = vld [vmem:[%s23621_s5 + $0x38] sm:$0xff] }
 0x6d0   : > { %v17394_v25 = vmul.f32 %v17374_v5, %v17294_v36  ;;  %v17212_v43 = vpop.f32.mrb[50].mxu1 }
 0x6d1   : > { %v18619_v37 = vpack.c.bf16 %v17396_v40, %v17395_v32  ;;  %v18654_v0 = vadd.f32 %v17212_v43, %v23499_v33  ;;  %v17214_v30 = vpop.f32.mrb[51].mxu1  ;;  %v17377_v33 = vld [vmem:[%s23621_s5 + $0x20] sm:$0xff] }
 0x6d2   : > { %v18616_v46 = vpack.c.bf16 %v17394_v25, %v17393_v51  ;;  %v18601_v24 = vpop.f32.mrb[76].mxu0  ;;  %v17386_v30 = vld [vmem:[%s23621_s5 + $0x68] sm:$0xff] }
 0x6d3   : > { %v17315_v53 = vadd.f32 %v18651_v47, %v18601_v24  ;;  %v17306_v48 = vpop.f32.mrb[77].mxu0 }
 0x6d4   : > { %v17307_v52 = vadd.f32 %v18649_v56, %v17306_v48  ;;  %v18602_v61 = vpop.f32.mrb[78].mxu0  ;;  %18617 = vmatpush1.bf16.msra.mxu0 %v18616_v46 }
 0x6d5   : > { %v17318_v17 = vadd.f32 %v18652_v13, %v18602_v61  ;;  %v17309_v12 = vpop.f32.mrb[79].mxu0  ;;  %18618 = vmatprep.subr.bf16.mxu0 %v20409_v16  ;;  %v17399_v21 = vmul.f32 %v17379_v58, %v17315_v53  ;;  %v17383_v13 = vld [vmem:[%s23621_s5 + $0x50] sm:$0xff] }
 0x6d6   : > { %v17310_v54 = vadd.f32 %v18650_v28, %v17309_v12  ;;  %v17217_v38 = vpop.f32.mrb[52].mxu1  ;;  %v17397_v8 = vmul.f32 %v17377_v33, %v17307_v52  ;;  %v17387_v12 = vld [vmem:[%s23621_s5 + $0x70] sm:$0xff] }
 0x6d7   : > { %v17400_v34 = vmul.f32 %v17380_v39, %v17318_v17  ;;  %v18655_v57 = vadd.f32 %v17217_v38, %v23501_v60  ;;  %v17219_v56 = vpop.f32.mrb[53].mxu1 }
 0x6d8   : > { %v17398_v3 = vmul.f32 %v17378_v50, %v17310_v54  ;;  %v17220_v4 = vpop.f32.mrb[54].mxu1  ;;  %18620 = vmatpush1.bf16.msra.mxu0 %v18619_v37 }
 0x6d9   : > { %v18625_v19 = vpack.c.bf16 %v17400_v34, %v17399_v21  ;;  %v18656_v18 = vadd.f32 %v17220_v4, %v23503_v29  ;;  %v17222_v49 = vpop.f32.mrb[55].mxu1  ;;  %18621 = vmatprep.subr.bf16.mxu0 %v20409_v16  ;;  %v17381_v29 = vld [vmem:[%s23621_s5 + $0x40] sm:$0xff] }
 0x6da   : > { %v18622_v47 = vpack.c.bf16 %v17398_v3, %v17397_v8  ;;  %v18605_v42 = vpop.f32.mrb[80].mxu0 }
 0x6db   : > { %v17331_v45 = vadd.f32 %v18655_v57, %v18605_v42  ;;  %v17322_v28 = vpop.f32.mrb[81].mxu0  ;;  %v17389_v42 = vld [vmem:[%s23621_s5 + $0x80] sm:$0xff] }
 0x6dc   : > { %v17323_v60 = vadd.f32 %v18653_v41, %v17322_v28  ;;  %v18606_v62 = vpop.f32.mrb[82].mxu0  ;;  %18623 = vmatpush1.bf16.msra.mxu0 %v18622_v47 }
 0x6dd   : > { %v17334_v23 = vadd.f32 %v18656_v18, %v18606_v62  ;;  %v17325_v15 = vpop.f32.mrb[83].mxu0  ;;  %18624 = vmatprep.subr.bf16.mxu0 %v20409_v16  ;;  %v17403_v20 = vmul.f32 %v17383_v13, %v17331_v45  ;;  %v17390_v45 = vld [vmem:[%s23621_s5 + $0x88] sm:$0xff] }
 0x6de   : > { %v17326_v2 = vadd.f32 %v18654_v0, %v17325_v15  ;;  %v17225_v63 = vpop.f32.mrb[56].mxu1  ;;  %v17401_v5 = vmul.f32 %v17381_v29, %v17323_v60 }
 0x6df   : > { %v17404_v31 = vmul.f32 %v17384_v6, %v17334_v23  ;;  %v18657_v55 = vadd.f32 %v17225_v63, %v23505_v10  ;;  %v17227_v9 = vpop.f32.mrb[57].mxu1  ;;  %v17385_v10 = vld [vmem:[%s23621_s5 + $0x60] sm:$0xff]  ;;  %v17392_v63 = vld [vmem:[%s23621_s5 + $0x98] sm:$0xff] }
 0x6e0   : > { %v17402_v36 = vmul.f32 %v17382_v1, %v17326_v2  ;;  %v17228_v35 = vpop.f32.mrb[58].mxu1  ;;  %18626 = vmatpush1.bf16.msra.mxu0 %v18625_v19  ;;  %v17391_v2 = vld [vmem:[%s23621_s5 + $0x90] sm:$0xff] }
 0x6e1   : > { %v18631_v32 = vpack.c.bf16 %v17404_v31, %v17403_v20  ;;  %v18658_v40 = vadd.f32 %v17228_v35, %v23507_v27  ;;  %v17230_v41 = vpop.f32.mrb[59].mxu1  ;;  %18627 = vmatprep.subr.bf16.mxu0 %v20409_v16  ;;  %v17369_v9 = vld [vmem:[#allocation4] sm:$0xff] }
 0x6e2   : > { %v18628_v26 = vpack.c.bf16 %v17402_v36, %v17401_v5  ;;  %v18609_v51 = vpop.f32.mrb[84].mxu0  ;;  %v17371_v5 = vld [vmem:[#allocation4 + $0x10] sm:$0x3] }
 0x6e3   : > { %v17338_v25 = vpop.f32.mrb[85].mxu0 }
 0x6e4   : > { %v17339_v43 = vadd.f32 %v18657_v55, %v17338_v25  ;;  %v18610_v37 = vpop.f32.mrb[86].mxu0  ;;  %18629 = vmatpush1.bf16.msra.mxu0 %v18628_v26  ;;  %v17503_v26 = vld [vmem:[%s23620_s4] sm:$0xff] }
 0x6e5   : > { %v17341_v0 = vpop.f32.mrb[87].mxu0  ;;  %18630 = vmatprep.subr.bf16.mxu0 %v20409_v16 }
 0x6e6   : > { %v17342_v27 = vadd.f32 %v18658_v40, %v17341_v0  ;;  %v17233_v46 = vpop.f32.mrb[60].mxu1  ;;  %v17405_v48 = vmul.f32 %v17385_v10, %v17339_v43  ;;  %v17504_v43 = vld [vmem:[%s23620_s4 + $0x8] sm:$0x3] }
 0x6e7   : > { %v18659_v24 = vadd.f32 %v17233_v46, %v23509_v59  ;;  %v17235_v53 = vpop.f32.mrb[61].mxu1  ;;  %v17388_v59 = vld [vmem:[%s23621_s5 + $0x78] sm:$0xff] }
 0x6e8   : > { %v17406_v58 = vmul.f32 %v17386_v30, %v17342_v27  ;;  %v17236_v52 = vpop.f32.mrb[62].mxu1  ;;  %18632 = vmatpush1.bf16.msra.mxu0 %v18631_v32 }
 0x6e9   : > { %v17347_v61 = vadd.f32 %v18659_v24, %v18609_v51  ;;  %v18660_v39 = vadd.f32 %v17236_v52, %v23511_v44  ;;  %v17238_v33 = vpop.f32.mrb[63].mxu1  ;;  %18633 = vmatprep.subr.bf16.mxu0 %v20409_v16 }
 0x6ea   : > { %v18634_v17 = vpack.c.bf16 %v17406_v58, %v17405_v48  ;;  %v18613_v50 = vpop.f32.mrb[88].mxu0 }
 0x6eb   : > { %v17350_v54 = vadd.f32 %v18660_v39, %v18610_v37  ;;  %v17354_v38 = vpop.f32.mrb[89].mxu0  ;;  %v17407_v34 = vmul.f32 %v17387_v12, %v17347_v61 }
 0x6ec   : > { %18635 = vmatpush1.bf16.msra.mxu0 %v18634_v17  ;;  %v18614_v21 = vpop.f32.mrb[90].mxu0 }
 0x6ed   : > { %v17408_v57 = vmul.f32 %v17388_v59, %v17350_v54  ;;  %18636 = vmatprep.subr.bf16.mxu0 %v20409_v16  ;;  %v17357_v44 = vpop.f32.mrb[91].mxu0 }
 0x6ee   : > { %v17241_v56 = vpop.f32.mrb[64].mxu1 }
 0x6ef   : > { %v18637_v8 = vpack.c.bf16 %v17408_v57, %v17407_v34  ;;  %v18661_v3 = vadd.f32 %v17241_v56, %v23513_v7  ;;  %v17243_v4 = vpop.f32.mrb[65].mxu1 }
 0x6f0   : > { %v17244_v19 = vpop.f32.mrb[66].mxu1 }
 0x6f1   : > { %v18662_v18 = vadd.f32 %v17244_v19, %v23515_v14  ;;  %v17355_v49 = vadd.f32 %v18661_v3, %v17354_v38  ;;  %v17246_v47 = vpop.f32.mrb[67].mxu1  ;;  %18638 = vmatpush1.bf16.msra.mxu0 %v18637_v8 }
 0x6f2   : > { %18639 = vmatprep.subr.bf16.mxu0 %v20409_v16 }
 0x6f3   : > { %v17358_v28 = vadd.f32 %v18662_v18, %v17357_v44  ;;  %v17409_v13 = vmul.f32 %v17389_v42, %v17355_v49 }
 0x6f5   : > { %v17410_v7 = vmul.f32 %v17390_v45, %v17358_v28 }
 0x6f6   : > { %v17249_v60 = vpop.f32.mrb[68].mxu1 }
 0x6f7   : > { %v18640_v62 = vpack.c.bf16 %v17410_v7, %v17409_v13  ;;  %v18663_v14 = vadd.f32 %v17249_v60, %v23517_v22  ;;  %v17251_v6 = vpop.f32.mrb[69].mxu1 }
 0x6f8   : > { %v17252_v29 = vpop.f32.mrb[70].mxu1 }
 0x6f9   : > { %v17363_v23 = vadd.f32 %v18663_v14, %v18613_v50  ;;  %v18664_v15 = vadd.f32 %v17252_v29, %v23519_v11  ;;  %v17254_v1 = vpop.f32.mrb[71].mxu1  ;;  %18641 = vmatpush1.bf16.msra.mxu0 %v18640_v62  ;;  %v17372_v11 = vld [vmem:[#allocation4 + $0x18] sm:$0x3] }
 0x6fa   : > { %18642 = vmatprep.subr.bf16.mxu0 %v20409_v16 }
 0x6fb   : > { %v17366_v20 = vadd.f32 %v18664_v15, %v18614_v21  ;;  %v17411_v31 = vmul.f32 %v17391_v2, %v17363_v23 }
 0x6fd   : > { %v17412_v22 = vmul.f32 %v17392_v63, %v17366_v20 }
 0x6ff   : > { %v18643_v55 = vpack.c.bf16 %v17412_v22, %v17411_v31 }
 0x701   : > { %18644 = vmatpush1.bf16.msra.mxu0 %v18643_v55 }
 0x704   : > { %17485 = vmatmul.mubr.f32.vlgmr.msra.gmra.mrb[92].mxu0 %v17369_v9 }
 0x705   : > { %18505 = vmatprep.mubr.msk.f32.mxu0 %vm17413_vm7, %v17372_v11 }
 0x708   : > { %17490 = vmatmul.mubr.f32.gmra.mrb[94].mxu0 %v17371_v5 }
 0x7d7   : > { %v17486_v36 = vpop.f32.mrb[92].mxu0 }
 0x7d8   : > { %v17496_v35 = vsel %vm17495_vm8, %v17486_v36, 0.0  ;;  %v17488_v32 = vpop.f32.mrb[93].mxu0 }
 0x7d9   : > { %17497 = vadd.xlane.f32.xlu1 %v17496_v35 }
 0x7db   : > { %v17491_v16 = vpop.f32.mrb[94].mxu0 }
 0x7dc   : > { %v17500_v40 = vsel %vm17499_vm9, %v17491_v16, 0.0  ;;  %v17493_v41 = vpop.f32.mrb[95].mxu0 }
 0x7dd   : > { %17501 = vadd.xlane.f32.xlu0 %v17500_v40 }
 0x866   : > { %v17498_v51 = vpop.xlane.xlu1 %17497 }
 0x867   : > { %v17505_v25 = vadd.f32 %v17503_v26, %v17498_v51 }
 0x869   : > { %17508 = vst.msk [vmem:[%s308_s29] sm:$0xff] %vm17507_vm10, %v17505_v25 }
 0x86a   : > { %v17502_v37 = vpop.xlane.xlu0 %17501 }
 0x86b   : > { %v17506_v10 = vadd.f32 %v17504_v43, %v17502_v37 }
 0x86d   : > { %17510 = vst.msk [vmem:[%s308_s29 + $0x8] sm:$0x3] %vm17509_vm11, %v17506_v10 }
 0x86e PF: > { %s19_s24 = sadd.s32 1, %s20394_s24  }
 0x86f   : > { %p16_p5 = scmp.ge.s32.totalorder %s19_s24, 4  }
 0x871   :  { %18 = sbr.rel (!%p16_p5) target bundleno = 2 (0x2), region = 95 }
 0x878   :  { %17532 = vsyncpa [#allocation3], 1 }
 0x879   :  { %17534 = vsyncpa [#allocation3 + $0x1], 1 }
 0x87a   :  { %17535 = vsyncpa [#allocation5], 1 }

</bundles_post_ra>
